<compile_context>
chip_gen: v6e
topology: v6e:2x2x1
jax: 0.10.0
libtpu: 0.0.40
codegen_flags: <defaults>
</compile_context>

<pallas_src>
import math
import functools

import jax
import jax.numpy as jnp
from jax.experimental import pallas as pl
from jax.experimental.pallas import tpu as pltpu


_EPS = 1e-5
_NEG = -1e9


# ----------------------------------------------------------------------------
# In-kernel helpers (pure functions on values already loaded into vregs)
# ----------------------------------------------------------------------------

def _layernorm(y, g, b, eps=_EPS):
    # PyTorch LayerNorm: biased variance, eps inside rsqrt.  All f32.
    mu = jnp.mean(y, axis=-1, keepdims=True)
    var = jnp.mean(jnp.square(y - mu), axis=-1, keepdims=True)
    return (y - mu) * jax.lax.rsqrt(var + eps) * g + b


def _causal_bias(S):
    """Additive causal bias generated in-kernel (no HBM traffic)."""
    r = jax.lax.broadcasted_iota(jnp.int32, (S, S), 0)
    c = jax.lax.broadcasted_iota(jnp.int32, (S, S), 1)
    return jnp.where(c > r, _NEG, 0.0).astype(jnp.float32)


def _mha_block(q, k, v, bias, wo, n_heads, head_dim):
    """Multi-head attention.  q:(Sq,D) k,v:(Sk,D) f32 (q pre-scaled via weights),
    bias: None or (Sq,Sk) additive f32, wo:(D,D) bf16.

    Per-head scores/softmax/PV, then ONE dense (Sq,D)@(D,D) output projection
    (no per-head wo row slices, no H small-K matmuls for the projection)."""
    qb = q.astype(jnp.bfloat16)
    kb = k.astype(jnp.bfloat16)
    vb = v.astype(jnp.bfloat16)
    o_heads = []
    for h in range(n_heads):
        sl = slice(h * head_dim, (h + 1) * head_dim)
        s = jax.lax.dot_general(qb[:, sl], kb[:, sl], (((1,), (1,)), ((), ())),
                                preferred_element_type=jnp.float32)
        if bias is not None:
            s = s + bias
        m = jnp.max(s, axis=-1, keepdims=True)
        e = jnp.exp(s - m)
        p = e * pl.reciprocal(jnp.sum(e, axis=-1, keepdims=True), approx=True)
        o_heads.append(jnp.dot(p.astype(jnp.bfloat16), vb[:, sl],
                               preferred_element_type=jnp.float32))
    o = jnp.concatenate(o_heads, axis=-1).astype(jnp.bfloat16)      # (Sq, D)
    return jnp.dot(o, wo, preferred_element_type=jnp.float32)


def _self_attention(x, bias, wqkv, bqkv, wo, bo, n_heads, head_dim):
    D = x.shape[-1]
    qkv = jnp.dot(x.astype(jnp.bfloat16), wqkv,
                  preferred_element_type=jnp.float32) + bqkv         # (S, 3D)
    q, k, v = qkv[:, :D], qkv[:, D:2 * D], qkv[:, 2 * D:]
    return _mha_block(q, k, v, bias, wo, n_heads, head_dim) + bo


def _cross_attention(xq, xkv, bias, wq, bq, wkv, bkv, wo, bo, n_heads, head_dim):
    D = xq.shape[-1]
    q = jnp.dot(xq.astype(jnp.bfloat16), wq,
                preferred_element_type=jnp.float32) + bq             # (Sq, D)
    kv = jnp.dot(xkv.astype(jnp.bfloat16), wkv,
                 preferred_element_type=jnp.float32) + bkv           # (Sk, 2D)
    k, v = kv[:, :D], kv[:, D:]
    return _mha_block(q, k, v, bias, wo, n_heads, head_dim) + bo


def _ffn(x, w1, b1, w2, b2):
    h = jnp.dot(x.astype(jnp.bfloat16), w1,
                preferred_element_type=jnp.float32) + b1
    h = jnp.maximum(h, 0.0)
    return jnp.dot(h.astype(jnp.bfloat16), w2,
                   preferred_element_type=jnp.float32) + b2


# ----------------------------------------------------------------------------
# Fused Pallas kernels (one batch element per grid step)
# ----------------------------------------------------------------------------

def _encoder_layer_kernel(*refs, n_heads, head_dim, has_bias):
    it = iter(refs)
    x_ref = next(it)
    bias_ref = next(it) if has_bias else None
    (wqkv, bqkv, wo, bo, g1, be1,
     w1, bh1, w2, bh2, g2, be2, o_ref) = [next(it) for _ in range(13)]

    x = x_ref[0].astype(jnp.float32)                       # (S, D)
    bias = bias_ref[0] if has_bias else None
    attn = _self_attention(x, bias, wqkv[...], bqkv[...], wo[...], bo[...],
                           n_heads, head_dim)
    y = _layernorm(x + attn, g1[...], be1[...])
    ff = _ffn(y, w1[...], bh1[...], w2[...], bh2[...])
    o_ref[0] = _layernorm(y + ff, g2[...], be2[...]).astype(o_ref.dtype)


def _decoder_layer_kernel(*refs, n_heads, head_dim, tgt_causal, has_src_bias):
    it = iter(refs)
    x_ref = next(it)
    enc_ref = next(it)
    tgt_bias_ref = None if tgt_causal else next(it)
    src_bias_ref = next(it) if has_src_bias else None
    (s_wqkv, s_bqkv, s_wo, s_bo, g1, be1,
     c_wq, c_bq, c_wkv, c_bkv, c_wo, c_bo, g2, be2,
     w1, bh1, w2, bh2, g3, be3, o_ref) = [next(it) for _ in range(21)]

    x = x_ref[0].astype(jnp.float32)                       # (St, D)
    enc = enc_ref[0].astype(jnp.float32)                   # (Ss, D)
    St = x.shape[0]

    tgt_bias = _causal_bias(St) if tgt_causal else tgt_bias_ref[0]
    src_bias = src_bias_ref[0] if has_src_bias else None

    attn = _self_attention(x, tgt_bias, s_wqkv[...], s_bqkv[...],
                           s_wo[...], s_bo[...], n_heads, head_dim)
    y = _layernorm(x + attn, g1[...], be1[...])
    attn = _cross_attention(y, enc, src_bias,
                            c_wq[...], c_bq[...], c_wkv[...], c_bkv[...],
                            c_wo[...], c_bo[...], n_heads, head_dim)
    y = _layernorm(y + attn, g2[...], be2[...])
    ff = _ffn(y, w1[...], bh1[...], w2[...], bh2[...])
    o_ref[0] = _layernorm(y + ff, g3[...], be3[...]).astype(o_ref.dtype)


def _layernorm_kernel(x_ref, g_ref, b_ref, o_ref):
    o_ref[0] = _layernorm(x_ref[0].astype(jnp.float32),
                          g_ref[...], b_ref[...]).astype(o_ref.dtype)


def _norm_project_kernel(x_ref, g_ref, b_ref, w_ref, bo_ref, o_ref):
    # Fused final decoder LayerNorm + one vocab tile of the output projection.
    y = _layernorm(x_ref[0].astype(jnp.float32), g_ref[...], b_ref[...])
    out = jnp.dot(y.astype(jnp.bfloat16), w_ref[...],
                  preferred_element_type=jnp.float32) + bo_ref[...]
    o_ref[0] = out.astype(o_ref.dtype)


# ----------------------------------------------------------------------------
# pallas_call wrappers (grid over batch / vocab tiles, weights replicated)
# ----------------------------------------------------------------------------

def _nbytes(a):
    return int(a.size) * int(a.dtype.itemsize)


def _batched_spec(shape):
    nd = len(shape)
    return pl.BlockSpec((1,) + tuple(shape[1:]),
                        lambda b: (b,) + (0,) * (nd - 1))


def _replicated_spec(shape):
    nd = len(shape)
    return pl.BlockSpec(tuple(shape), lambda b: (0,) * nd)


def _mask_spec(mask):
    if mask.shape[0] == 1:
        return pl.BlockSpec((1,) + mask.shape[1:], lambda b: (0, 0, 0))
    return pl.BlockSpec((1,) + mask.shape[1:], lambda b: (b, 0, 0))


def _params_for(grid_rank, per_step_bytes):
    # Explicit VMEM budget: ~2x per-step blocks (double buffering) + headroom,
    # clamped to [32 MiB, 100 MiB] (defaults are 16/32 MiB; physical 64-128).
    vmem = int(min(max(2 * per_step_bytes + (16 << 20), 32 << 20), 100 << 20))
    return pltpu.CompilerParams(
        dimension_semantics=("parallel",) * grid_rank,
        vmem_limit_bytes=vmem)


def _pick_vocab_tile(V, cap=1024):
    """Largest multiple-of-128 divisor of V not exceeding cap (else full V)."""
    if V % 128 != 0 or V <= cap:
        return V
    best, t = 128, 128
    while t <= cap:
        if V % t == 0:
            best = t
        t += 128
    return best


def encoder_layer(x, p, n_heads, mask_bias=None):
    B, S, D = x.shape
    Dh = D // n_heads
    mha, ln1, f, ln2 = p["mha"], p["ln1"], p["ffn"], p["ln2"]
    weights = (mha["wqkv"], mha["bqkv"], mha["wo"], mha["bo"],
               ln1["g"], ln1["b"],
               f["w1"], f["b1"], f["w2"], f["b2"],
               ln2["g"], ln2["b"])
    has_bias = mask_bias is not None

    inputs = [x] + ([mask_bias] if has_bias else []) + list(weights)
    in_specs = [_batched_spec(x.shape)]
    if has_bias:
        in_specs.append(_mask_spec(mask_bias))
    in_specs += [_replicated_spec(w.shape) for w in weights]

    kernel = functools.partial(_encoder_layer_kernel, n_heads=n_heads,
                               head_dim=Dh, has_bias=has_bias)

    per_step = (sum(_nbytes(w) for w in weights) + 2 * S * D * 2
                + (S * S * 4 if has_bias else 0))
    flops = B * (24 * S * D * D + 4 * S * S * D)
    trans = B * n_heads * S * S
    bytes_acc = sum(_nbytes(a) for a in inputs) + B * S * D * 2

    return pl.pallas_call(
        kernel,
        out_shape=jax.ShapeDtypeStruct((B, S, D), jnp.bfloat16),
        grid=(B,),
        in_specs=in_specs,
        out_specs=_batched_spec((B, S, D)),
        compiler_params=_params_for(1, per_step),
        cost_estimate=pl.CostEstimate(flops=flops, transcendentals=trans,
                                      bytes_accessed=bytes_acc),
    )(*inputs)


def decoder_layer(x, enc_out, p, n_heads, tgt_bias=None, src_bias=None):
    B, S, D = x.shape
    Ss = enc_out.shape[1]
    Dh = D // n_heads
    sm, cm, f = p["self_mha"], p["cross_mha"], p["ffn"]
    ln1, ln2, ln3 = p["ln1"], p["ln2"], p["ln3"]
    weights = (sm["wqkv"], sm["bqkv"], sm["wo"], sm["bo"],
               ln1["g"], ln1["b"],
               cm["wq"], cm["bq"], cm["wkv"], cm["bkv"], cm["wo"], cm["bo"],
               ln2["g"], ln2["b"],
               f["w1"], f["b1"], f["w2"], f["b2"],
               ln3["g"], ln3["b"])
    tgt_causal = tgt_bias is None          # causal bias generated in-kernel
    has_src_bias = src_bias is not None

    inputs = [x, enc_out]
    in_specs = [_batched_spec(x.shape), _batched_spec(enc_out.shape)]
    if not tgt_causal:
        inputs.append(tgt_bias)
        in_specs.append(_mask_spec(tgt_bias))
    if has_src_bias:
        inputs.append(src_bias)
        in_specs.append(_mask_spec(src_bias))
    inputs += list(weights)
    in_specs += [_replicated_spec(w.shape) for w in weights]

    kernel = functools.partial(_decoder_layer_kernel, n_heads=n_heads,
                               head_dim=Dh, tgt_causal=tgt_causal,
                               has_src_bias=has_src_bias)

    per_step = (sum(_nbytes(w) for w in weights) + (2 * S + Ss) * D * 2
                + (0 if tgt_causal else S * S * 4)
                + (S * Ss * 4 if has_src_bias else 0))
    flops = B * (28 * S * D * D + 4 * Ss * D * D + 4 * S * (S + Ss) * D)
    trans = B * n_heads * (S * S + S * Ss)
    bytes_acc = sum(_nbytes(a) for a in inputs) + B * S * D * 2

    return pl.pallas_call(
        kernel,
        out_shape=jax.ShapeDtypeStruct((B, S, D), jnp.bfloat16),
        grid=(B,),
        in_specs=in_specs,
        out_specs=_batched_spec((B, S, D)),
        compiler_params=_params_for(1, per_step),
        cost_estimate=pl.CostEstimate(flops=flops, transcendentals=trans,
                                      bytes_accessed=bytes_acc),
    )(*inputs)


def layer_norm(x, p):
    B, S, D = x.shape
    per_step = 2 * S * D * 2 + _nbytes(p["g"]) + _nbytes(p["b"])
    return pl.pallas_call(
        _layernorm_kernel,
        out_shape=jax.ShapeDtypeStruct((B, S, D), jnp.bfloat16),
        grid=(B,),
        in_specs=[_batched_spec(x.shape),
                  _replicated_spec(p["g"].shape), _replicated_spec(p["b"].shape)],
        out_specs=_batched_spec((B, S, D)),
        compiler_params=_params_for(1, per_step),
        cost_estimate=pl.CostEstimate(flops=B * S * D * 10,
                                      transcendentals=B * S,
                                      bytes_accessed=2 * B * S * D * 2),
    )(x, p["g"], p["b"])


def norm_project(x, ln, w, bvec, tile_v_cap=1024):
    """Fused final decoder LayerNorm + vocab projection, tiled over V."""
    B, S, D = x.shape
    V = w.shape[1]
    tV = _pick_vocab_tile(V, tile_v_cap)
    nvt = V // tV

    in_specs = [
        pl.BlockSpec((1, S, D), lambda b, vt: (b, 0, 0)),
        pl.BlockSpec(ln["g"].shape, lambda b, vt: (0, 0)),
        pl.BlockSpec(ln["b"].shape, lambda b, vt: (0, 0)),
        pl.BlockSpec((D, tV), lambda b, vt: (0, vt)),
        pl.BlockSpec((1, tV), lambda b, vt: (0, vt)),
    ]
    out_specs = pl.BlockSpec((1, S, tV), lambda b, vt: (b, 0, vt))

    per_step = (S * D * 2 + _nbytes(ln["g"]) + _nbytes(ln["b"])
                + D * tV * 2 + tV * 4 + S * tV * 4)
    flops = B * 2 * S * D * V
    bytes_acc = _nbytes(x) + _nbytes(w) + _nbytes(bvec) + B * S * V * 4

    return pl.pallas_call(
        _norm_project_kernel,
        out_shape=jax.ShapeDtypeStruct((B, S, V), jnp.float32),
        grid=(B, nvt),
        in_specs=in_specs,
        out_specs=out_specs,
        compiler_params=_params_for(2, per_step),
        cost_estimate=pl.CostEstimate(flops=flops, transcendentals=0,
                                      bytes_accessed=bytes_acc),
    )(x, ln["g"], ln["b"], w, bvec)


# ----------------------------------------------------------------------------
# Model glue (plain JAX: embedding gather, masks, positional encoding)
# ----------------------------------------------------------------------------

def encoder_forward(x, mask_bias, layers, final_norm, n_heads):
    # NOTE: replicates the reference bug — early return after the FIRST layer.
    for lp in layers:
        x = encoder_layer(x, lp, n_heads, mask_bias=mask_bias)
        return layer_norm(x, final_norm)


def decoder_forward(x, enc_out, src_bias, tgt_bias, layers, n_heads):
    # NOTE: replicates the reference bug — early return after the FIRST layer.
    for lp in layers:
        x = decoder_layer(x, enc_out, lp, n_heads,
                          tgt_bias=tgt_bias, src_bias=src_bias)
        return x   # final LayerNorm fused with the vocab projection by caller


def positional_encoding(max_len, D):
    pos = jnp.arange(max_len, dtype=jnp.float32)[:, None]
    div = jnp.exp(jnp.arange(0, D, 2, dtype=jnp.float32) * (-math.log(10000.0) / D))
    pe = jnp.zeros((max_len, D), dtype=jnp.float32)
    pe = pe.at[:, 0::2].set(jnp.sin(pos * div))
    pe = pe.at[:, 1::2].set(jnp.cos(pos * div))
    return pe[None]  # (1, max_len, D)


def mask_to_bias(mask, Sq, Sk):
    """1/0 keep-mask -> additive bias (0 keep / -1e9 blocked).
    NOTE: if a row blocks every key, softmax degrades to uniform over blocked
    keys (same behavior as the reference additive-mask trick)."""
    m = jnp.asarray(mask, jnp.float32).reshape((-1, Sq, Sk))
    return jnp.where(m == 0.0, _NEG, 0.0).astype(jnp.float32)


def transformer_forward(params, cfg, src, tgt, src_mask=None, tgt_mask=None):
    D = cfg["emb_dim"]
    H = cfg["n_heads"]
    pe = params["pe"]
    S_src, S_tgt = src.shape[1], tgt.shape[1]

    # Embedding gather + positional encoding in plain JAX; activations are cast
    # to bf16 for HBM transit (kernels upcast to f32 for LN/softmax math).
    src_emb = jnp.take(params["embedding"], src, axis=0) * math.sqrt(D)
    src_emb = (src_emb + pe[:, :S_src, :]).astype(jnp.bfloat16)
    enc_bias = None if src_mask is None else mask_to_bias(src_mask, S_src, S_src)
    enc_out = encoder_forward(src_emb, enc_bias, params["enc_layers"],
                              params["enc_norm"], H)

    tgt_emb = jnp.take(params["embedding"], tgt, axis=0) * math.sqrt(D)
    tgt_emb = (tgt_emb + pe[:, :S_tgt, :]).astype(jnp.bfloat16)
    # tgt_mask None -> causal bias generated INSIDE the decoder kernel.
    tgt_bias = None if tgt_mask is None else mask_to_bias(tgt_mask, S_tgt, S_tgt)
    src_bias = None if src_mask is None else mask_to_bias(src_mask, S_tgt, S_src)

    dec_out = decoder_forward(tgt_emb, enc_out, src_bias, tgt_bias,
                              params["dec_layers"], H)
    # Final decoder LayerNorm fused with the (V-tiled) vocab projection.
    return norm_project(dec_out, params["dec_norm"],
                        params["out_w"], params["out_b"])


# ----------------------------------------------------------------------------
# Deterministic parameter initialization (matmul weights bf16, biases/LN f32).
# 1/sqrt(head_dim) is folded into the Q projection weights/bias at init.
# ----------------------------------------------------------------------------

def _dense(key, shape):
    return 0.02 * jax.random.normal(key, shape, dtype=jnp.float32)


def _init_self_mha(key, D, n_heads):
    inv_scale = 1.0 / math.sqrt(D // n_heads)
    kq, kk, kv, ko = jax.random.split(key, 4)
    wqkv = jnp.concatenate([_dense(kq, (D, D)) * inv_scale,
                            _dense(kk, (D, D)),
                            _dense(kv, (D, D))], axis=1)
    bqkv = jnp.zeros((1, 3 * D), jnp.float32)   # q-part scale folded (zeros anyway)
    return dict(
        wqkv=wqkv.astype(jnp.bfloat16), bqkv=bqkv,
        wo=_dense(ko, (D, D)).astype(jnp.bfloat16),
        bo=jnp.zeros((1, D), jnp.float32),
    )


def _init_cross_mha(key, D, n_heads):
    inv_scale = 1.0 / math.sqrt(D // n_heads)
    kq, kk, kv, ko = jax.random.split(key, 4)
    wkv = jnp.concatenate([_dense(kk, (D, D)), _dense(kv, (D, D))], axis=1)
    return dict(
        wq=(_dense(kq, (D, D)) * inv_scale).astype(jnp.bfloat16),
        bq=jnp.zeros((1, D), jnp.float32),
        wkv=wkv.astype(jnp.bfloat16), bkv=jnp.zeros((1, 2 * D), jnp.float32),
        wo=_dense(ko, (D, D)).astype(jnp.bfloat16),
        bo=jnp.zeros((1, D), jnp.float32),
    )


def _init_ffn(key, D):
    k1, k2 = jax.random.split(key)
    return dict(
        w1=_dense(k1, (D, 4 * D)).astype(jnp.bfloat16),
        b1=jnp.zeros((1, 4 * D), jnp.float32),
        w2=_dense(k2, (4 * D, D)).astype(jnp.bfloat16),
        b2=jnp.zeros((1, D), jnp.float32),
    )


def _init_ln(D):
    return dict(g=jnp.ones((1, D), jnp.float32), b=jnp.zeros((1, D), jnp.float32))


def init_params(key, cfg):
    D, V, L, H = cfg["emb_dim"], cfg["vocab_size"], cfg["n_layers"], cfg["n_heads"]
    n_keys = 2 + 2 * L + 3 * L   # embedding + out_w + enc(2/layer) + dec(3/layer)
    keys = iter(jax.random.split(key, n_keys))

    enc_layers = [dict(mha=_init_self_mha(next(keys), D, H),
                       ffn=_init_ffn(next(keys), D),
                       ln1=_init_ln(D), ln2=_init_ln(D))
                  for _ in range(L)]

    dec_layers = [dict(self_mha=_init_self_mha(next(keys), D, H),
                       cross_mha=_init_cross_mha(next(keys), D, H),
                       ffn=_init_ffn(next(keys), D),
                       ln1=_init_ln(D), ln2=_init_ln(D), ln3=_init_ln(D))
                  for _ in range(L)]

    return dict(
        embedding=_dense(next(keys), (V, D)),
        pe=positional_encoding(cfg["context_length"], D),
        enc_layers=enc_layers,
        enc_norm=_init_ln(D),
        dec_layers=dec_layers,
        dec_norm=_init_ln(D),
        out_w=_dense(next(keys), (D, V)).astype(jnp.bfloat16),
        out_b=jnp.zeros((1, V), jnp.float32),
    )


# ----------------------------------------------------------------------------
# Main
# ----------------------------------------------------------------------------

if __name__ == "__main__":
    # Lane-dense toy config (D and V multiples of 128 -> unmasked vector stores).
    config = dict(
        vocab_size=256,
        emb_dim=128,
        n_heads=4,
        n_layers=2,
        drop_rate=0.0,
        qkv_bias=True,
        context_length=16,
    )
    B, S = 2, 8

    root = jax.random.PRNGKey(0)
    kp, ks, kt = jax.random.split(root, 3)
    params = init_params(kp, config)
    src = jax.random.randint(ks, (B, S), 0, config["vocab_size"], dtype=jnp.int32)
    tgt = jax.random.randint(kt, (B, S), 0, config["vocab_size"], dtype=jnp.int32)

    fwd = jax.jit(lambda s, t: transformer_forward(params, config, s, t))
    out = jax.block_until_ready(fwd(src, tgt))
    assert out.shape == (B, S, config["vocab_size"]), out.shape
    assert bool(jnp.all(jnp.isfinite(out)))
    print("KERNEL_OK")
</pallas_src>

<mosaic_0001>
module attributes {stable_mosaic.version = 11 : i64} {
  func.func @_layernorm_kernel(%arg0: i32, %arg1: memref<1x8x128xbf16, #tpu.memory_space<vmem>>, %arg2: memref<1x128xf32, #tpu.memory_space<vmem>>, %arg3: memref<1x128xf32, #tpu.memory_space<vmem>>, %arg4: memref<1x8x128xbf16, #tpu.memory_space<vmem>>) attributes {dimension_semantics = [#tpu.dimension_semantics<parallel>], iteration_bounds = array<i64: 2>, scalar_prefetch = 0 : i64, scratch_operands = 0 : i64, tpu.core_type = #tpu.core_type<tc>, window_params = [{transform_indices = @transform_0, window_bounds = array<i64: 1, 8, 128>}, {pipeline_mode = #tpu.pipeline_mode<synchronous>, transform_indices = @transform_1, window_bounds = array<i64: 1, 128>}, {pipeline_mode = #tpu.pipeline_mode<synchronous>, transform_indices = @transform_2, window_bounds = array<i64: 1, 128>}, {transform_indices = @transform_3, window_bounds = array<i64: 1, 8, 128>}]} {
    %c0 = arith.constant 0 : index
    %c0_0 = arith.constant 0 : index
    %c0_1 = arith.constant 0 : index
    %0 = vector.load %arg1[%c0, %c0_0, %c0_1] : memref<1x8x128xbf16, #tpu.memory_space<vmem>>, vector<1x8x128xbf16>
    %1 = vector.shape_cast %0 : vector<1x8x128xbf16> to vector<8x128xbf16>
    %2 = arith.extf %1 : vector<8x128xbf16> to vector<8x128xf32>
    %c0_2 = arith.constant 0 : index
    %c0_3 = arith.constant 0 : index
    %3 = vector.load %arg2[%c0_2, %c0_3] : memref<1x128xf32, #tpu.memory_space<vmem>>, vector<1x128xf32>
    %c0_4 = arith.constant 0 : index
    %c0_5 = arith.constant 0 : index
    %4 = vector.load %arg3[%c0_4, %c0_5] : memref<1x128xf32, #tpu.memory_space<vmem>>, vector<1x128xf32>
    %cst = arith.constant dense<0.000000e+00> : vector<8xf32>
    %5 = vector.multi_reduction <add>, %2, %cst [1] : vector<8x128xf32> to vector<8xf32>
    %6 = vector.shape_cast %5 : vector<8xf32> to vector<8x1xf32>
    %cst_6 = arith.constant 1.280000e+02 : f32
    %7 = vector.broadcast %cst_6 : f32 to vector<8x1xf32>
    %8 = arith.divf %6, %7 : vector<8x1xf32>
    %9 = vector.broadcast %8 : vector<8x1xf32> to vector<8x128xf32>
    %10 = arith.subf %2, %9 : vector<8x128xf32>
    %11 = arith.mulf %10, %10 : vector<8x128xf32>
    %cst_7 = arith.constant dense<0.000000e+00> : vector<8xf32>
    %12 = vector.multi_reduction <add>, %11, %cst_7 [1] : vector<8x128xf32> to vector<8xf32>
    %13 = vector.shape_cast %12 : vector<8xf32> to vector<8x1xf32>
    %cst_8 = arith.constant 1.280000e+02 : f32
    %14 = vector.broadcast %cst_8 : f32 to vector<8x1xf32>
    %15 = arith.divf %13, %14 : vector<8x1xf32>
    %16 = vector.broadcast %8 : vector<8x1xf32> to vector<8x128xf32>
    %17 = arith.subf %2, %16 : vector<8x128xf32>
    %cst_9 = arith.constant 9.99999974E-6 : f32
    %18 = vector.broadcast %cst_9 : f32 to vector<8x1xf32>
    %19 = arith.addf %15, %18 : vector<8x1xf32>
    %20 = math.rsqrt %19 : vector<8x1xf32>
    %21 = vector.broadcast %20 : vector<8x1xf32> to vector<8x128xf32>
    %22 = arith.mulf %17, %21 : vector<8x128xf32>
    %23 = vector.broadcast %3 : vector<1x128xf32> to vector<8x128xf32>
    %24 = arith.mulf %22, %23 : vector<8x128xf32>
    %25 = vector.broadcast %4 : vector<1x128xf32> to vector<8x128xf32>
    %26 = arith.addf %24, %25 : vector<8x128xf32>
    %27 = arith.truncf %26 : vector<8x128xf32> to vector<8x128xbf16>
    %c0_10 = arith.constant 0 : index
    %c0_11 = arith.constant 0 : index
    %c0_12 = arith.constant 0 : index
    %28 = vector.load %arg4[%c0_10, %c0_11, %c0_12] : memref<1x8x128xbf16, #tpu.memory_space<vmem>>, vector<1x8x128xbf16>
    %29 = vector.shape_cast %28 : vector<1x8x128xbf16> to vector<8x128xbf16>
    %30 = vector.shape_cast %27 : vector<8x128xbf16> to vector<1x8x128xbf16>
    tpu.vector_store %arg4[%c0_10, %c0_11, %c0_12], %30 {strides = array<i32>} : memref<1x8x128xbf16, #tpu.memory_space<vmem>>, vector<1x8x128xbf16>,
    return
  }
  func.func @transform_0(%arg0: i32) -> (i32, i32, i32) {
    %c0_i32 = arith.constant 0 : i32
    %c0_i32_0 = arith.constant 0 : i32
    %c0_i32_1 = arith.constant 0 : i32
    return %arg0, %c0_i32, %c0_i32_0 : i32, i32, i32
  }
  func.func @transform_1(%arg0: i32) -> (i32, i32) {
    %c0_i32 = arith.constant 0 : i32
    %c0_i32_0 = arith.constant 0 : i32
    %c0_i32_1 = arith.constant 0 : i32
    return %c0_i32, %c0_i32_0 : i32, i32
  }
  func.func @transform_2(%arg0: i32) -> (i32, i32) {
    %c0_i32 = arith.constant 0 : i32
    %c0_i32_0 = arith.constant 0 : i32
    %c0_i32_1 = arith.constant 0 : i32
    return %c0_i32, %c0_i32_0 : i32, i32
  }
  func.func @transform_3(%arg0: i32) -> (i32, i32, i32) {
    %c0_i32 = arith.constant 0 : i32
    %c0_i32_0 = arith.constant 0 : i32
    %c0_i32_1 = arith.constant 0 : i32
    return %arg0, %c0_i32, %c0_i32_0 : i32, i32, i32
  }
}

module attributes {stable_mosaic.version = 11 : i64} {
  func.func @_encoder_layer_kernel(%arg0: i32, %arg1: memref<1x8x128xbf16, #tpu.memory_space<vmem>>, %arg2: memref<128x384xbf16, #tpu.memory_space<vmem>>, %arg3: memref<1x384xf32, #tpu.memory_space<vmem>>, %arg4: memref<128x128xbf16, #tpu.memory_space<vmem>>, %arg5: memref<1x128xf32, #tpu.memory_space<vmem>>, %arg6: memref<1x128xf32, #tpu.memory_space<vmem>>, %arg7: memref<1x128xf32, #tpu.memory_space<vmem>>, %arg8: memref<128x512xbf16, #tpu.memory_space<vmem>>, %arg9: memref<1x512xf32, #tpu.memory_space<vmem>>, %arg10: memref<512x128xbf16, #tpu.memory_space<vmem>>, %arg11: memref<1x128xf32, #tpu.memory_space<vmem>>, %arg12: memref<1x128xf32, #tpu.memory_space<vmem>>, %arg13: memref<1x128xf32, #tpu.memory_space<vmem>>, %arg14: memref<1x8x128xbf16, #tpu.memory_space<vmem>>) attributes {dimension_semantics = [#tpu.dimension_semantics<parallel>], iteration_bounds = array<i64: 2>, scalar_prefetch = 0 : i64, scratch_operands = 0 : i64, tpu.core_type = #tpu.core_type<tc>, window_params = [{transform_indices = @transform_0, window_bounds = array<i64: 1, 8, 128>}, {pipeline_mode = #tpu.pipeline_mode<synchronous>, transform_indices = @transform_1, window_bounds = array<i64: 128, 384>}, {pipeline_mode = #tpu.pipeline_mode<synchronous>, transform_indices = @transform_2, window_bounds = array<i64: 1, 384>}, {pipeline_mode = #tpu.pipeline_mode<synchronous>, transform_indices = @transform_3, window_bounds = array<i64: 128, 128>}, {pipeline_mode = #tpu.pipeline_mode<synchronous>, transform_indices = @transform_4, window_bounds = array<i64: 1, 128>}, {pipeline_mode = #tpu.pipeline_mode<synchronous>, transform_indices = @transform_5, window_bounds = array<i64: 1, 128>}, {pipeline_mode = #tpu.pipeline_mode<synchronous>, transform_indices = @transform_6, window_bounds = array<i64: 1, 128>}, {pipeline_mode = #tpu.pipeline_mode<synchronous>, transform_indices = @transform_7, window_bounds = array<i64: 128, 512>}, {pipeline_mode = #tpu.pipeline_mode<synchronous>, transform_indices = @transform_8, window_bounds = array<i64: 1, 512>}, {pipeline_mode = #tpu.pipeline_mode<synchronous>, transform_indices = @transform_9, window_bounds = array<i64: 512, 128>}, {pipeline_mode = #tpu.pipeline_mode<synchronous>, transform_indices = @transform_10, window_bounds = array<i64: 1, 128>}, {pipeline_mode = #tpu.pipeline_mode<synchronous>, transform_indices = @transform_11, window_bounds = array<i64: 1, 128>}, {pipeline_mode = #tpu.pipeline_mode<synchronous>, transform_indices = @transform_12, window_bounds = array<i64: 1, 128>}, {transform_indices = @transform_13, window_bounds = array<i64: 1, 8, 128>}]} {
    %c0 = arith.constant 0 : index
    %c0_0 = arith.constant 0 : index
    %c0_1 = arith.constant 0 : index
    %0 = vector.load %arg1[%c0, %c0_0, %c0_1] : memref<1x8x128xbf16, #tpu.memory_space<vmem>>, vector<1x8x128xbf16>
    %1 = vector.shape_cast %0 : vector<1x8x128xbf16> to vector<8x128xbf16>
    %2 = arith.extf %1 : vector<8x128xbf16> to vector<8x128xf32>
    %c0_2 = arith.constant 0 : index
    %c0_3 = arith.constant 0 : index
    %3 = vector.load %arg2[%c0_2, %c0_3] : memref<128x384xbf16, #tpu.memory_space<vmem>>, vector<128x384xbf16>
    %c0_4 = arith.constant 0 : index
    %c0_5 = arith.constant 0 : index
    %4 = vector.load %arg3[%c0_4, %c0_5] : memref<1x384xf32, #tpu.memory_space<vmem>>, vector<1x384xf32>
    %c0_6 = arith.constant 0 : index
    %c0_7 = arith.constant 0 : index
    %5 = vector.load %arg4[%c0_6, %c0_7] : memref<128x128xbf16, #tpu.memory_space<vmem>>, vector<128x128xbf16>
    %c0_8 = arith.constant 0 : index
    %c0_9 = arith.constant 0 : index
    %6 = vector.load %arg5[%c0_8, %c0_9] : memref<1x128xf32, #tpu.memory_space<vmem>>, vector<1x128xf32>
    %7 = arith.truncf %2 : vector<8x128xf32> to vector<8x128xbf16>
    %cst = arith.constant dense<0.000000e+00> : vector<8x384xf32>
    %8 = tpu.matmul %7, %3, %cst {dimension_numbers = #tpu.dot_dimension_numbers<[1], [0], [0], [1], [0, 0, 1, 1], [], []>} : vector<8x128xbf16>, vector<128x384xbf16>, vector<8x384xf32> -> vector<8x384xf32>
    %9 = vector.broadcast %4 : vector<1x384xf32> to vector<8x384xf32>
    %10 = arith.addf %8, %9 : vector<8x384xf32>
    %11 = vector.extract_strided_slice %10 {offsets = [0, 0], sizes = [8, 128], strides = [1, 1]} : vector<8x384xf32> to vector<8x128xf32>
    %12 = vector.extract_strided_slice %10 {offsets = [0, 128], sizes = [8, 128], strides = [1, 1]} : vector<8x384xf32> to vector<8x128xf32>
    %13 = vector.extract_strided_slice %10 {offsets = [0, 256], sizes = [8, 128], strides = [1, 1]} : vector<8x384xf32> to vector<8x128xf32>
    %14 = arith.truncf %11 : vector<8x128xf32> to vector<8x128xbf16>
    %15 = arith.truncf %12 : vector<8x128xf32> to vector<8x128xbf16>
    %16 = arith.truncf %13 : vector<8x128xf32> to vector<8x128xbf16>
    %17 = vector.extract_strided_slice %14 {offsets = [0, 0], sizes = [8, 32], strides = [1, 1]} : vector<8x128xbf16> to vector<8x32xbf16>
    %18 = vector.extract_strided_slice %15 {offsets = [0, 0], sizes = [8, 32], strides = [1, 1]} : vector<8x128xbf16> to vector<8x32xbf16>
    %cst_10 = arith.constant dense<0.000000e+00> : vector<8x8xf32>
    %19 = tpu.matmul %17, %18, %cst_10 {dimension_numbers = #tpu.dot_dimension_numbers<[1], [1], [0], [0], [0, 0, 1, 0], [], []>} : vector<8x32xbf16>, vector<8x32xbf16>, vector<8x8xf32> -> vector<8x8xf32>
    %cst_11 = arith.constant dense<0xFF800000> : vector<8xf32>
    %20 = vector.multi_reduction <maximumf>, %19, %cst_11 [1] : vector<8x8xf32> to vector<8xf32>
    %21 = vector.shape_cast %20 : vector<8xf32> to vector<8x1xf32>
    %22 = vector.broadcast %21 : vector<8x1xf32> to vector<8x8xf32>
    %23 = arith.subf %19, %22 : vector<8x8xf32>
    %24 = math.exp %23 : vector<8x8xf32>
    %cst_12 = arith.constant dense<0.000000e+00> : vector<8xf32>
    %25 = vector.multi_reduction <add>, %24, %cst_12 [1] : vector<8x8xf32> to vector<8xf32>
    %26 = vector.shape_cast %25 : vector<8xf32> to vector<8x1xf32>
    %27 = tpu.reciprocal %26 {approx = true} : vector<8x1xf32> -> vector<8x1xf32>
    %28 = vector.broadcast %27 : vector<8x1xf32> to vector<8x8xf32>
    %29 = arith.mulf %24, %28 : vector<8x8xf32>
    %30 = arith.truncf %29 : vector<8x8xf32> to vector<8x8xbf16>
    %31 = vector.extract_strided_slice %16 {offsets = [0, 0], sizes = [8, 32], strides = [1, 1]} : vector<8x128xbf16> to vector<8x32xbf16>
    %cst_13 = arith.constant dense<0.000000e+00> : vector<8x32xf32>
    %32 = tpu.matmul %30, %31, %cst_13 {dimension_numbers = #tpu.dot_dimension_numbers<[1], [0], [0], [1], [0, 0, 1, 1], [], []>} : vector<8x8xbf16>, vector<8x32xbf16>, vector<8x32xf32> -> vector<8x32xf32>
    %33 = vector.extract_strided_slice %14 {offsets = [0, 32], sizes = [8, 32], strides = [1, 1]} : vector<8x128xbf16> to vector<8x32xbf16>
    %34 = vector.extract_strided_slice %15 {offsets = [0, 32], sizes = [8, 32], strides = [1, 1]} : vector<8x128xbf16> to vector<8x32xbf16>
    %cst_14 = arith.constant dense<0.000000e+00> : vector<8x8xf32>
    %35 = tpu.matmul %33, %34, %cst_14 {dimension_numbers = #tpu.dot_dimension_numbers<[1], [1], [0], [0], [0, 0, 1, 0], [], []>} : vector<8x32xbf16>, vector<8x32xbf16>, vector<8x8xf32> -> vector<8x8xf32>
    %cst_15 = arith.constant dense<0xFF800000> : vector<8xf32>
    %36 = vector.multi_reduction <maximumf>, %35, %cst_15 [1] : vector<8x8xf32> to vector<8xf32>
    %37 = vector.shape_cast %36 : vector<8xf32> to vector<8x1xf32>
    %38 = vector.broadcast %37 : vector<8x1xf32> to vector<8x8xf32>
    %39 = arith.subf %35, %38 : vector<8x8xf32>
    %40 = math.exp %39 : vector<8x8xf32>
    %cst_16 = arith.constant dense<0.000000e+00> : vector<8xf32>
    %41 = vector.multi_reduction <add>, %40, %cst_16 [1] : vector<8x8xf32> to vector<8xf32>
    %42 = vector.shape_cast %41 : vector<8xf32> to vector<8x1xf32>
    %43 = tpu.reciprocal %42 {approx = true} : vector<8x1xf32> -> vector<8x1xf32>
    %44 = vector.broadcast %43 : vector<8x1xf32> to vector<8x8xf32>
    %45 = arith.mulf %40, %44 : vector<8x8xf32>
    %46 = arith.truncf %45 : vector<8x8xf32> to vector<8x8xbf16>
    %47 = vector.extract_strided_slice %16 {offsets = [0, 32], sizes = [8, 32], strides = [1, 1]} : vector<8x128xbf16> to vector<8x32xbf16>
    %cst_17 = arith.constant dense<0.000000e+00> : vector<8x32xf32>
    %48 = tpu.matmul %46, %47, %cst_17 {dimension_numbers = #tpu.dot_dimension_numbers<[1], [0], [0], [1], [0, 0, 1, 1], [], []>} : vector<8x8xbf16>, vector<8x32xbf16>, vector<8x32xf32> -> vector<8x32xf32>
    %49 = vector.extract_strided_slice %14 {offsets = [0, 64], sizes = [8, 32], strides = [1, 1]} : vector<8x128xbf16> to vector<8x32xbf16>
    %50 = vector.extract_strided_slice %15 {offsets = [0, 64], sizes = [8, 32], strides = [1, 1]} : vector<8x128xbf16> to vector<8x32xbf16>
    %cst_18 = arith.constant dense<0.000000e+00> : vector<8x8xf32>
    %51 = tpu.matmul %49, %50, %cst_18 {dimension_numbers = #tpu.dot_dimension_numbers<[1], [1], [0], [0], [0, 0, 1, 0], [], []>} : vector<8x32xbf16>, vector<8x32xbf16>, vector<8x8xf32> -> vector<8x8xf32>
    %cst_19 = arith.constant dense<0xFF800000> : vector<8xf32>
    %52 = vector.multi_reduction <maximumf>, %51, %cst_19 [1] : vector<8x8xf32> to vector<8xf32>
    %53 = vector.shape_cast %52 : vector<8xf32> to vector<8x1xf32>
    %54 = vector.broadcast %53 : vector<8x1xf32> to vector<8x8xf32>
    %55 = arith.subf %51, %54 : vector<8x8xf32>
    %56 = math.exp %55 : vector<8x8xf32>
    %cst_20 = arith.constant dense<0.000000e+00> : vector<8xf32>
    %57 = vector.multi_reduction <add>, %56, %cst_20 [1] : vector<8x8xf32> to vector<8xf32>
    %58 = vector.shape_cast %57 : vector<8xf32> to vector<8x1xf32>
    %59 = tpu.reciprocal %58 {approx = true} : vector<8x1xf32> -> vector<8x1xf32>
    %60 = vector.broadcast %59 : vector<8x1xf32> to vector<8x8xf32>
    %61 = arith.mulf %56, %60 : vector<8x8xf32>
    %62 = arith.truncf %61 : vector<8x8xf32> to vector<8x8xbf16>
    %63 = vector.extract_strided_slice %16 {offsets = [0, 64], sizes = [8, 32], strides = [1, 1]} : vector<8x128xbf16> to vector<8x32xbf16>
    %cst_21 = arith.constant dense<0.000000e+00> : vector<8x32xf32>
    %64 = tpu.matmul %62, %63, %cst_21 {dimension_numbers = #tpu.dot_dimension_numbers<[1], [0], [0], [1], [0, 0, 1, 1], [], []>} : vector<8x8xbf16>, vector<8x32xbf16>, vector<8x32xf32> -> vector<8x32xf32>
    %65 = vector.extract_strided_slice %14 {offsets = [0, 96], sizes = [8, 32], strides = [1, 1]} : vector<8x128xbf16> to vector<8x32xbf16>
    %66 = vector.extract_strided_slice %15 {offsets = [0, 96], sizes = [8, 32], strides = [1, 1]} : vector<8x128xbf16> to vector<8x32xbf16>
    %cst_22 = arith.constant dense<0.000000e+00> : vector<8x8xf32>
    %67 = tpu.matmul %65, %66, %cst_22 {dimension_numbers = #tpu.dot_dimension_numbers<[1], [1], [0], [0], [0, 0, 1, 0], [], []>} : vector<8x32xbf16>, vector<8x32xbf16>, vector<8x8xf32> -> vector<8x8xf32>
    %cst_23 = arith.constant dense<0xFF800000> : vector<8xf32>
    %68 = vector.multi_reduction <maximumf>, %67, %cst_23 [1] : vector<8x8xf32> to vector<8xf32>
    %69 = vector.shape_cast %68 : vector<8xf32> to vector<8x1xf32>
    %70 = vector.broadcast %69 : vector<8x1xf32> to vector<8x8xf32>
    %71 = arith.subf %67, %70 : vector<8x8xf32>
    %72 = math.exp %71 : vector<8x8xf32>
    %cst_24 = arith.constant dense<0.000000e+00> : vector<8xf32>
    %73 = vector.multi_reduction <add>, %72, %cst_24 [1] : vector<8x8xf32> to vector<8xf32>
    %74 = vector.shape_cast %73 : vector<8xf32> to vector<8x1xf32>
    %75 = tpu.reciprocal %74 {approx = true} : vector<8x1xf32> -> vector<8x1xf32>
    %76 = vector.broadcast %75 : vector<8x1xf32> to vector<8x8xf32>
    %77 = arith.mulf %72, %76 : vector<8x8xf32>
    %78 = arith.truncf %77 : vector<8x8xf32> to vector<8x8xbf16>
    %79 = vector.extract_strided_slice %16 {offsets = [0, 96], sizes = [8, 32], strides = [1, 1]} : vector<8x128xbf16> to vector<8x32xbf16>
    %cst_25 = arith.constant dense<0.000000e+00> : vector<8x32xf32>
    %80 = tpu.matmul %78, %79, %cst_25 {dimension_numbers = #tpu.dot_dimension_numbers<[1], [0], [0], [1], [0, 0, 1, 1], [], []>} : vector<8x8xbf16>, vector<8x32xbf16>, vector<8x32xf32> -> vector<8x32xf32>
    %81 = tpu.concatenate %32, %48, %64, %80 in 1 : vector<8x32xf32>, vector<8x32xf32>, vector<8x32xf32>, vector<8x32xf32> -> vector<8x128xf32>
    %82 = arith.truncf %81 : vector<8x128xf32> to vector<8x128xbf16>
    %cst_26 = arith.constant dense<0.000000e+00> : vector<8x128xf32>
    %83 = tpu.matmul %82, %5, %cst_26 {dimension_numbers = #tpu.dot_dimension_numbers<[1], [0], [0], [1], [0, 0, 1, 1], [], []>} : vector<8x128xbf16>, vector<128x128xbf16>, vector<8x128xf32> -> vector<8x128xf32>
    %84 = vector.broadcast %6 : vector<1x128xf32> to vector<8x128xf32>
    %85 = arith.addf %83, %84 : vector<8x128xf32>
    %86 = arith.addf %2, %85 : vector<8x128xf32>
    %c0_27 = arith.constant 0 : index
    %c0_28 = arith.constant 0 : index
    %87 = vector.load %arg6[%c0_27, %c0_28] : memref<1x128xf32, #tpu.memory_space<vmem>>, vector<1x128xf32>
    %c0_29 = arith.constant 0 : index
    %c0_30 = arith.constant 0 : index
    %88 = vector.load %arg7[%c0_29, %c0_30] : memref<1x128xf32, #tpu.memory_space<vmem>>, vector<1x128xf32>
    %cst_31 = arith.constant dense<0.000000e+00> : vector<8xf32>
    %89 = vector.multi_reduction <add>, %86, %cst_31 [1] : vector<8x128xf32> to vector<8xf32>
    %90 = vector.shape_cast %89 : vector<8xf32> to vector<8x1xf32>
    %cst_32 = arith.constant 1.280000e+02 : f32
    %91 = vector.broadcast %cst_32 : f32 to vector<8x1xf32>
    %92 = arith.divf %90, %91 : vector<8x1xf32>
    %93 = vector.broadcast %92 : vector<8x1xf32> to vector<8x128xf32>
    %94 = arith.subf %86, %93 : vector<8x128xf32>
    %95 = arith.mulf %94, %94 : vector<8x128xf32>
    %cst_33 = arith.constant dense<0.000000e+00> : vector<8xf32>
    %96 = vector.multi_reduction <add>, %95, %cst_33 [1] : vector<8x128xf32> to vector<8xf32>
    %97 = vector.shape_cast %96 : vector<8xf32> to vector<8x1xf32>
    %cst_34 = arith.constant 1.280000e+02 : f32
    %98 = vector.broadcast %cst_34 : f32 to vector<8x1xf32>
    %99 = arith.divf %97, %98 : vector<8x1xf32>
    %100 = vector.broadcast %92 : vector<8x1xf32> to vector<8x128xf32>
    %101 = arith.subf %86, %100 : vector<8x128xf32>
    %cst_35 = arith.constant 9.99999974E-6 : f32
    %102 = vector.broadcast %cst_35 : f32 to vector<8x1xf32>
    %103 = arith.addf %99, %102 : vector<8x1xf32>
    %104 = math.rsqrt %103 : vector<8x1xf32>
    %105 = vector.broadcast %104 : vector<8x1xf32> to vector<8x128xf32>
    %106 = arith.mulf %101, %105 : vector<8x128xf32>
    %107 = vector.broadcast %87 : vector<1x128xf32> to vector<8x128xf32>
    %108 = arith.mulf %106, %107 : vector<8x128xf32>
    %109 = vector.broadcast %88 : vector<1x128xf32> to vector<8x128xf32>
    %110 = arith.addf %108, %109 : vector<8x128xf32>
    %c0_36 = arith.constant 0 : index
    %c0_37 = arith.constant 0 : index
    %111 = vector.load %arg8[%c0_36, %c0_37] : memref<128x512xbf16, #tpu.memory_space<vmem>>, vector<128x512xbf16>
    %c0_38 = arith.constant 0 : index
    %c0_39 = arith.constant 0 : index
    %112 = vector.load %arg9[%c0_38, %c0_39] : memref<1x512xf32, #tpu.memory_space<vmem>>, vector<1x512xf32>
    %c0_40 = arith.constant 0 : index
    %c0_41 = arith.constant 0 : index
    %113 = vector.load %arg10[%c0_40, %c0_41] : memref<512x128xbf16, #tpu.memory_space<vmem>>, vector<512x128xbf16>
    %c0_42 = arith.constant 0 : index
    %c0_43 = arith.constant 0 : index
    %114 = vector.load %arg11[%c0_42, %c0_43] : memref<1x128xf32, #tpu.memory_space<vmem>>, vector<1x128xf32>
    %115 = arith.truncf %110 : vector<8x128xf32> to vector<8x128xbf16>
    %cst_44 = arith.constant dense<0.000000e+00> : vector<8x512xf32>
    %116 = tpu.matmul %115, %111, %cst_44 {dimension_numbers = #tpu.dot_dimension_numbers<[1], [0], [0], [1], [0, 0, 1, 1], [], []>} : vector<8x128xbf16>, vector<128x512xbf16>, vector<8x512xf32> -> vector<8x512xf32>
    %117 = vector.broadcast %112 : vector<1x512xf32> to vector<8x512xf32>
    %118 = arith.addf %116, %117 : vector<8x512xf32>
    %cst_45 = arith.constant 0.000000e+00 : f32
    %119 = vector.broadcast %cst_45 : f32 to vector<8x512xf32>
    %120 = arith.maximumf %118, %119 : vector<8x512xf32>
    %121 = arith.truncf %120 : vector<8x512xf32> to vector<8x512xbf16>
    %cst_46 = arith.constant dense<0.000000e+00> : vector<8x128xf32>
    %122 = tpu.matmul %121, %113, %cst_46 {dimension_numbers = #tpu.dot_dimension_numbers<[1], [0], [0], [1], [0, 0, 1, 1], [], []>} : vector<8x512xbf16>, vector<512x128xbf16>, vector<8x128xf32> -> vector<8x128xf32>
    %123 = vector.broadcast %114 : vector<1x128xf32> to vector<8x128xf32>
    %124 = arith.addf %122, %123 : vector<8x128xf32>
    %125 = arith.addf %110, %124 : vector<8x128xf32>
    %c0_47 = arith.constant 0 : index
    %c0_48 = arith.constant 0 : index
    %126 = vector.load %arg12[%c0_47, %c0_48] : memref<1x128xf32, #tpu.memory_space<vmem>>, vector<1x128xf32>
    %c0_49 = arith.constant 0 : index
    %c0_50 = arith.constant 0 : index
    %127 = vector.load %arg13[%c0_49, %c0_50] : memref<1x128xf32, #tpu.memory_space<vmem>>, vector<1x128xf32>
    %cst_51 = arith.constant dense<0.000000e+00> : vector<8xf32>
    %128 = vector.multi_reduction <add>, %125, %cst_51 [1] : vector<8x128xf32> to vector<8xf32>
    %129 = vector.shape_cast %128 : vector<8xf32> to vector<8x1xf32>
    %cst_52 = arith.constant 1.280000e+02 : f32
    %130 = vector.broadcast %cst_52 : f32 to vector<8x1xf32>
    %131 = arith.divf %129, %130 : vector<8x1xf32>
    %132 = vector.broadcast %131 : vector<8x1xf32> to vector<8x128xf32>
    %133 = arith.subf %125, %132 : vector<8x128xf32>
    %134 = arith.mulf %133, %133 : vector<8x128xf32>
    %cst_53 = arith.constant dense<0.000000e+00> : vector<8xf32>
    %135 = vector.multi_reduction <add>, %134, %cst_53 [1] : vector<8x128xf32> to vector<8xf32>
    %136 = vector.shape_cast %135 : vector<8xf32> to vector<8x1xf32>
    %cst_54 = arith.constant 1.280000e+02 : f32
    %137 = vector.broadcast %cst_54 : f32 to vector<8x1xf32>
    %138 = arith.divf %136, %137 : vector<8x1xf32>
    %139 = vector.broadcast %131 : vector<8x1xf32> to vector<8x128xf32>
    %140 = arith.subf %125, %139 : vector<8x128xf32>
    %cst_55 = arith.constant 9.99999974E-6 : f32
    %141 = vector.broadcast %cst_55 : f32 to vector<8x1xf32>
    %142 = arith.addf %138, %141 : vector<8x1xf32>
    %143 = math.rsqrt %142 : vector<8x1xf32>
    %144 = vector.broadcast %143 : vector<8x1xf32> to vector<8x128xf32>
    %145 = arith.mulf %140, %144 : vector<8x128xf32>
    %146 = vector.broadcast %126 : vector<1x128xf32> to vector<8x128xf32>
    %147 = arith.mulf %145, %146 : vector<8x128xf32>
    %148 = vector.broadcast %127 : vector<1x128xf32> to vector<8x128xf32>
    %149 = arith.addf %147, %148 : vector<8x128xf32>
    %150 = arith.truncf %149 : vector<8x128xf32> to vector<8x128xbf16>
    %c0_56 = arith.constant 0 : index
    %c0_57 = arith.constant 0 : index
    %c0_58 = arith.constant 0 : index
    %151 = vector.load %arg14[%c0_56, %c0_57, %c0_58] : memref<1x8x128xbf16, #tpu.memory_space<vmem>>, vector<1x8x128xbf16>
    %152 = vector.shape_cast %151 : vector<1x8x128xbf16> to vector<8x128xbf16>
    %153 = vector.shape_cast %150 : vector<8x128xbf16> to vector<1x8x128xbf16>
    tpu.vector_store %arg14[%c0_56, %c0_57, %c0_58], %153 {strides = array<i32>} : memref<1x8x128xbf16, #tpu.memory_space<vmem>>, vector<1x8x128xbf16>,
    return
  }
  func.func @transform_0(%arg0: i32) -> (i32, i32, i32) {
    %c0_i32 = arith.constant 0 : i32
    %c0_i32_0 = arith.constant 0 : i32
    %c0_i32_1 = arith.constant 0 : i32
    return %arg0, %c0_i32, %c0_i32_0 : i32, i32, i32
  }
  func.func @transform_1(%arg0: i32) -> (i32, i32) {
    %c0_i32 = arith.constant 0 : i32
    %c0_i32_0 = arith.constant 0 : i32
    %c0_i32_1 = arith.constant 0 : i32
    return %c0_i32, %c0_i32_0 : i32, i32
  }
  func.func @transform_2(%arg0: i32) -> (i32, i32) {
    %c0_i32 = arith.constant 0 : i32
    %c0_i32_0 = arith.constant 0 : i32
    %c0_i32_1 = arith.constant 0 : i32
    return %c0_i32, %c0_i32_0 : i32, i32
  }
  func.func @transform_3(%arg0: i32) -> (i32, i32) {
    %c0_i32 = arith.constant 0 : i32
    %c0_i32_0 = arith.constant 0 : i32
    %c0_i32_1 = arith.constant 0 : i32
    return %c0_i32, %c0_i32_0 : i32, i32
  }
  func.func @transform_4(%arg0: i32) -> (i32, i32) {
    %c0_i32 = arith.constant 0 : i32
    %c0_i32_0 = arith.constant 0 : i32
    %c0_i32_1 = arith.constant 0 : i32
    return %c0_i32, %c0_i32_0 : i32, i32
  }
  func.func @transform_5(%arg0: i32) -> (i32, i32) {
    %c0_i32 = arith.constant 0 : i32
    %c0_i32_0 = arith.constant 0 : i32
    %c0_i32_1 = arith.constant 0 : i32
    return %c0_i32, %c0_i32_0 : i32, i32
  }
  func.func @transform_6(%arg0: i32) -> (i32, i32) {
    %c0_i32 = arith.constant 0 : i32
    %c0_i32_0 = arith.constant 0 : i32
    %c0_i32_1 = arith.constant 0 : i32
    return %c0_i32, %c0_i32_0 : i32, i32
  }
  func.func @transform_7(%arg0: i32) -> (i32, i32) {
    %c0_i32 = arith.constant 0 : i32
    %c0_i32_0 = arith.constant 0 : i32
    %c0_i32_1 = arith.constant 0 : i32
    return %c0_i32, %c0_i32_0 : i32, i32
  }
  func.func @transform_8(%arg0: i32) -> (i32, i32) {
    %c0_i32 = arith.constant 0 : i32
    %c0_i32_0 = arith.constant 0 : i32
    %c0_i32_1 = arith.constant 0 : i32
    return %c0_i32, %c0_i32_0 : i32, i32
  }
  func.func @transform_9(%arg0: i32) -> (i32, i32) {
    %c0_i32 = arith.constant 0 : i32
    %c0_i32_0 = arith.constant 0 : i32
    %c0_i32_1 = arith.constant 0 : i32
    return %c0_i32, %c0_i32_0 : i32, i32
  }
  func.func @transform_10(%arg0: i32) -> (i32, i32) {
    %c0_i32 = arith.constant 0 : i32
    %c0_i32_0 = arith.constant 0 : i32
    %c0_i32_1 = arith.constant 0 : i32
    return %c0_i32, %c0_i32_0 : i32, i32
  }
  func.func @transform_11(%arg0: i32) -> (i32, i32) {
    %c0_i32 = arith.constant 0 : i32
    %c0_i32_0 = arith.constant 0 : i32
    %c0_i32_1 = arith.constant 0 : i32
    return %c0_i32, %c0_i32_0 : i32, i32
  }
  func.func @transform_12(%arg0: i32) -> (i32, i32) {
    %c0_i32 = arith.constant 0 : i32
    %c0_i32_0 = arith.constant 0 : i32
    %c0_i32_1 = arith.constant 0 : i32
    return %c0_i32, %c0_i32_0 : i32, i32
  }
  func.func @transform_13(%arg0: i32) -> (i32, i32, i32) {
    %c0_i32 = arith.constant 0 : i32
    %c0_i32_0 = arith.constant 0 : i32
    %c0_i32_1 = arith.constant 0 : i32
    return %arg0, %c0_i32, %c0_i32_0 : i32, i32, i32
  }
}

module attributes {stable_mosaic.version = 11 : i64} {
  func.func @_decoder_layer_kernel(%arg0: i32, %arg1: memref<1x8x128xbf16, #tpu.memory_space<vmem>>, %arg2: memref<1x8x128xbf16, #tpu.memory_space<vmem>>, %arg3: memref<128x384xbf16, #tpu.memory_space<vmem>>, %arg4: memref<1x384xf32, #tpu.memory_space<vmem>>, %arg5: memref<128x128xbf16, #tpu.memory_space<vmem>>, %arg6: memref<1x128xf32, #tpu.memory_space<vmem>>, %arg7: memref<1x128xf32, #tpu.memory_space<vmem>>, %arg8: memref<1x128xf32, #tpu.memory_space<vmem>>, %arg9: memref<128x128xbf16, #tpu.memory_space<vmem>>, %arg10: memref<1x128xf32, #tpu.memory_space<vmem>>, %arg11: memref<128x256xbf16, #tpu.memory_space<vmem>>, %arg12: memref<1x256xf32, #tpu.memory_space<vmem>>, %arg13: memref<128x128xbf16, #tpu.memory_space<vmem>>, %arg14: memref<1x128xf32, #tpu.memory_space<vmem>>, %arg15: memref<1x128xf32, #tpu.memory_space<vmem>>, %arg16: memref<1x128xf32, #tpu.memory_space<vmem>>, %arg17: memref<128x512xbf16, #tpu.memory_space<vmem>>, %arg18: memref<1x512xf32, #tpu.memory_space<vmem>>, %arg19: memref<512x128xbf16, #tpu.memory_space<vmem>>, %arg20: memref<1x128xf32, #tpu.memory_space<vmem>>, %arg21: memref<1x128xf32, #tpu.memory_space<vmem>>, %arg22: memref<1x128xf32, #tpu.memory_space<vmem>>, %arg23: memref<1x8x128xbf16, #tpu.memory_space<vmem>>) attributes {dimension_semantics = [#tpu.dimension_semantics<parallel>], iteration_bounds = array<i64: 2>, scalar_prefetch = 0 : i64, scratch_operands = 0 : i64, tpu.core_type = #tpu.core_type<tc>, window_params = [{transform_indices = @transform_0, window_bounds = array<i64: 1, 8, 128>}, {transform_indices = @transform_1, window_bounds = array<i64: 1, 8, 128>}, {pipeline_mode = #tpu.pipeline_mode<synchronous>, transform_indices = @transform_2, window_bounds = array<i64: 128, 384>}, {pipeline_mode = #tpu.pipeline_mode<synchronous>, transform_indices = @transform_3, window_bounds = array<i64: 1, 384>}, {pipeline_mode = #tpu.pipeline_mode<synchronous>, transform_indices = @transform_4, window_bounds = array<i64: 128, 128>}, {pipeline_mode = #tpu.pipeline_mode<synchronous>, transform_indices = @transform_5, window_bounds = array<i64: 1, 128>}, {pipeline_mode = #tpu.pipeline_mode<synchronous>, transform_indices = @transform_6, window_bounds = array<i64: 1, 128>}, {pipeline_mode = #tpu.pipeline_mode<synchronous>, transform_indices = @transform_7, window_bounds = array<i64: 1, 128>}, {pipeline_mode = #tpu.pipeline_mode<synchronous>, transform_indices = @transform_8, window_bounds = array<i64: 128, 128>}, {pipeline_mode = #tpu.pipeline_mode<synchronous>, transform_indices = @transform_9, window_bounds = array<i64: 1, 128>}, {pipeline_mode = #tpu.pipeline_mode<synchronous>, transform_indices = @transform_10, window_bounds = array<i64: 128, 256>}, {pipeline_mode = #tpu.pipeline_mode<synchronous>, transform_indices = @transform_11, window_bounds = array<i64: 1, 256>}, {pipeline_mode = #tpu.pipeline_mode<synchronous>, transform_indices = @transform_12, window_bounds = array<i64: 128, 128>}, {pipeline_mode = #tpu.pipeline_mode<synchronous>, transform_indices = @transform_13, window_bounds = array<i64: 1, 128>}, {pipeline_mode = #tpu.pipeline_mode<synchronous>, transform_indices = @transform_14, window_bounds = array<i64: 1, 128>}, {pipeline_mode = #tpu.pipeline_mode<synchronous>, transform_indices = @transform_15, window_bounds = array<i64: 1, 128>}, {pipeline_mode = #tpu.pipeline_mode<synchronous>, transform_indices = @transform_16, window_bounds = array<i64: 128, 512>}, {pipeline_mode = #tpu.pipeline_mode<synchronous>, transform_indices = @transform_17, window_bounds = array<i64: 1, 512>}, {pipeline_mode = #tpu.pipeline_mode<synchronous>, transform_indices = @transform_18, window_bounds = array<i64: 512, 128>}, {pipeline_mode = #tpu.pipeline_mode<synchronous>, transform_indices = @transform_19, window_bounds = array<i64: 1, 128>}, {pipeline_mode = #tpu.pipeline_mode<synchronous>, transform_indices = @transform_20, window_bounds = array<i64: 1, 128>}, {pipeline_mode = #tpu.pipeline_mode<synchronous>, transform_indices = @transform_21, window_bounds = array<i64: 1, 128>}, {transform_indices = @transform_22, window_bounds = array<i64: 1, 8, 128>}]} {
    %c0 = arith.constant 0 : index
    %c0_0 = arith.constant 0 : index
    %c0_1 = arith.constant 0 : index
    %0 = vector.load %arg1[%c0, %c0_0, %c0_1] : memref<1x8x128xbf16, #tpu.memory_space<vmem>>, vector<1x8x128xbf16>
    %1 = vector.shape_cast %0 : vector<1x8x128xbf16> to vector<8x128xbf16>
    %2 = arith.extf %1 : vector<8x128xbf16> to vector<8x128xf32>
    %c0_2 = arith.constant 0 : index
    %c0_3 = arith.constant 0 : index
    %c0_4 = arith.constant 0 : index
    %3 = vector.load %arg2[%c0_2, %c0_3, %c0_4] : memref<1x8x128xbf16, #tpu.memory_space<vmem>>, vector<1x8x128xbf16>
    %4 = vector.shape_cast %3 : vector<1x8x128xbf16> to vector<8x128xbf16>
    %5 = arith.extf %4 : vector<8x128xbf16> to vector<8x128xf32>
    %6 = tpu.iota {dimensions = array<i32: 0>} : vector<8x8xi32>
    %7 = tpu.iota {dimensions = array<i32: 1>} : vector<8x8xi32>
    %8 = arith.cmpi sgt, %7, %6 : vector<8x8xi32>
    %cst = arith.constant -1.000000e+09 : f32
    %cst_5 = arith.constant 0.000000e+00 : f32
    %9 = vector.broadcast %cst : f32 to vector<8x8xf32>
    %10 = vector.broadcast %cst_5 : f32 to vector<8x8xf32>
    %11 = arith.select %8, %9, %10 : vector<8x8xi1>, vector<8x8xf32>
    %c0_6 = arith.constant 0 : index
    %c0_7 = arith.constant 0 : index
    %12 = vector.load %arg3[%c0_6, %c0_7] : memref<128x384xbf16, #tpu.memory_space<vmem>>, vector<128x384xbf16>
    %c0_8 = arith.constant 0 : index
    %c0_9 = arith.constant 0 : index
    %13 = vector.load %arg4[%c0_8, %c0_9] : memref<1x384xf32, #tpu.memory_space<vmem>>, vector<1x384xf32>
    %c0_10 = arith.constant 0 : index
    %c0_11 = arith.constant 0 : index
    %14 = vector.load %arg5[%c0_10, %c0_11] : memref<128x128xbf16, #tpu.memory_space<vmem>>, vector<128x128xbf16>
    %c0_12 = arith.constant 0 : index
    %c0_13 = arith.constant 0 : index
    %15 = vector.load %arg6[%c0_12, %c0_13] : memref<1x128xf32, #tpu.memory_space<vmem>>, vector<1x128xf32>
    %16 = arith.truncf %2 : vector<8x128xf32> to vector<8x128xbf16>
    %cst_14 = arith.constant dense<0.000000e+00> : vector<8x384xf32>
    %17 = tpu.matmul %16, %12, %cst_14 {dimension_numbers = #tpu.dot_dimension_numbers<[1], [0], [0], [1], [0, 0, 1, 1], [], []>} : vector<8x128xbf16>, vector<128x384xbf16>, vector<8x384xf32> -> vector<8x384xf32>
    %18 = vector.broadcast %13 : vector<1x384xf32> to vector<8x384xf32>
    %19 = arith.addf %17, %18 : vector<8x384xf32>
    %20 = vector.extract_strided_slice %19 {offsets = [0, 0], sizes = [8, 128], strides = [1, 1]} : vector<8x384xf32> to vector<8x128xf32>
    %21 = vector.extract_strided_slice %19 {offsets = [0, 128], sizes = [8, 128], strides = [1, 1]} : vector<8x384xf32> to vector<8x128xf32>
    %22 = vector.extract_strided_slice %19 {offsets = [0, 256], sizes = [8, 128], strides = [1, 1]} : vector<8x384xf32> to vector<8x128xf32>
    %23 = arith.truncf %20 : vector<8x128xf32> to vector<8x128xbf16>
    %24 = arith.truncf %21 : vector<8x128xf32> to vector<8x128xbf16>
    %25 = arith.truncf %22 : vector<8x128xf32> to vector<8x128xbf16>
    %26 = vector.extract_strided_slice %23 {offsets = [0, 0], sizes = [8, 32], strides = [1, 1]} : vector<8x128xbf16> to vector<8x32xbf16>
    %27 = vector.extract_strided_slice %24 {offsets = [0, 0], sizes = [8, 32], strides = [1, 1]} : vector<8x128xbf16> to vector<8x32xbf16>
    %cst_15 = arith.constant dense<0.000000e+00> : vector<8x8xf32>
    %28 = tpu.matmul %26, %27, %cst_15 {dimension_numbers = #tpu.dot_dimension_numbers<[1], [1], [0], [0], [0, 0, 1, 0], [], []>} : vector<8x32xbf16>, vector<8x32xbf16>, vector<8x8xf32> -> vector<8x8xf32>
    %29 = arith.addf %28, %11 : vector<8x8xf32>
    %cst_16 = arith.constant dense<0xFF800000> : vector<8xf32>
    %30 = vector.multi_reduction <maximumf>, %29, %cst_16 [1] : vector<8x8xf32> to vector<8xf32>
    %31 = vector.shape_cast %30 : vector<8xf32> to vector<8x1xf32>
    %32 = vector.broadcast %31 : vector<8x1xf32> to vector<8x8xf32>
    %33 = arith.subf %29, %32 : vector<8x8xf32>
    %34 = math.exp %33 : vector<8x8xf32>
    %cst_17 = arith.constant dense<0.000000e+00> : vector<8xf32>
    %35 = vector.multi_reduction <add>, %34, %cst_17 [1] : vector<8x8xf32> to vector<8xf32>
    %36 = vector.shape_cast %35 : vector<8xf32> to vector<8x1xf32>
    %37 = tpu.reciprocal %36 {approx = true} : vector<8x1xf32> -> vector<8x1xf32>
    %38 = vector.broadcast %37 : vector<8x1xf32> to vector<8x8xf32>
    %39 = arith.mulf %34, %38 : vector<8x8xf32>
    %40 = arith.truncf %39 : vector<8x8xf32> to vector<8x8xbf16>
    %41 = vector.extract_strided_slice %25 {offsets = [0, 0], sizes = [8, 32], strides = [1, 1]} : vector<8x128xbf16> to vector<8x32xbf16>
    %cst_18 = arith.constant dense<0.000000e+00> : vector<8x32xf32>
    %42 = tpu.matmul %40, %41, %cst_18 {dimension_numbers = #tpu.dot_dimension_numbers<[1], [0], [0], [1], [0, 0, 1, 1], [], []>} : vector<8x8xbf16>, vector<8x32xbf16>, vector<8x32xf32> -> vector<8x32xf32>
    %43 = vector.extract_strided_slice %23 {offsets = [0, 32], sizes = [8, 32], strides = [1, 1]} : vector<8x128xbf16> to vector<8x32xbf16>
    %44 = vector.extract_strided_slice %24 {offsets = [0, 32], sizes = [8, 32], strides = [1, 1]} : vector<8x128xbf16> to vector<8x32xbf16>
    %cst_19 = arith.constant dense<0.000000e+00> : vector<8x8xf32>
    %45 = tpu.matmul %43, %44, %cst_19 {dimension_numbers = #tpu.dot_dimension_numbers<[1], [1], [0], [0], [0, 0, 1, 0], [], []>} : vector<8x32xbf16>, vector<8x32xbf16>, vector<8x8xf32> -> vector<8x8xf32>
    %46 = arith.addf %45, %11 : vector<8x8xf32>
    %cst_20 = arith.constant dense<0xFF800000> : vector<8xf32>
    %47 = vector.multi_reduction <maximumf>, %46, %cst_20 [1] : vector<8x8xf32> to vector<8xf32>
    %48 = vector.shape_cast %47 : vector<8xf32> to vector<8x1xf32>
    %49 = vector.broadcast %48 : vector<8x1xf32> to vector<8x8xf32>
    %50 = arith.subf %46, %49 : vector<8x8xf32>
    %51 = math.exp %50 : vector<8x8xf32>
    %cst_21 = arith.constant dense<0.000000e+00> : vector<8xf32>
    %52 = vector.multi_reduction <add>, %51, %cst_21 [1] : vector<8x8xf32> to vector<8xf32>
    %53 = vector.shape_cast %52 : vector<8xf32> to vector<8x1xf32>
    %54 = tpu.reciprocal %53 {approx = true} : vector<8x1xf32> -> vector<8x1xf32>
    %55 = vector.broadcast %54 : vector<8x1xf32> to vector<8x8xf32>
    %56 = arith.mulf %51, %55 : vector<8x8xf32>
    %57 = arith.truncf %56 : vector<8x8xf32> to vector<8x8xbf16>
    %58 = vector.extract_strided_slice %25 {offsets = [0, 32], sizes = [8, 32], strides = [1, 1]} : vector<8x128xbf16> to vector<8x32xbf16>
    %cst_22 = arith.constant dense<0.000000e+00> : vector<8x32xf32>
    %59 = tpu.matmul %57, %58, %cst_22 {dimension_numbers = #tpu.dot_dimension_numbers<[1], [0], [0], [1], [0, 0, 1, 1], [], []>} : vector<8x8xbf16>, vector<8x32xbf16>, vector<8x32xf32> -> vector<8x32xf32>
    %60 = vector.extract_strided_slice %23 {offsets = [0, 64], sizes = [8, 32], strides = [1, 1]} : vector<8x128xbf16> to vector<8x32xbf16>
    %61 = vector.extract_strided_slice %24 {offsets = [0, 64], sizes = [8, 32], strides = [1, 1]} : vector<8x128xbf16> to vector<8x32xbf16>
    %cst_23 = arith.constant dense<0.000000e+00> : vector<8x8xf32>
    %62 = tpu.matmul %60, %61, %cst_23 {dimension_numbers = #tpu.dot_dimension_numbers<[1], [1], [0], [0], [0, 0, 1, 0], [], []>} : vector<8x32xbf16>, vector<8x32xbf16>, vector<8x8xf32> -> vector<8x8xf32>
    %63 = arith.addf %62, %11 : vector<8x8xf32>
    %cst_24 = arith.constant dense<0xFF800000> : vector<8xf32>
    %64 = vector.multi_reduction <maximumf>, %63, %cst_24 [1] : vector<8x8xf32> to vector<8xf32>
    %65 = vector.shape_cast %64 : vector<8xf32> to vector<8x1xf32>
    %66 = vector.broadcast %65 : vector<8x1xf32> to vector<8x8xf32>
    %67 = arith.subf %63, %66 : vector<8x8xf32>
    %68 = math.exp %67 : vector<8x8xf32>
    %cst_25 = arith.constant dense<0.000000e+00> : vector<8xf32>
    %69 = vector.multi_reduction <add>, %68, %cst_25 [1] : vector<8x8xf32> to vector<8xf32>
    %70 = vector.shape_cast %69 : vector<8xf32> to vector<8x1xf32>
    %71 = tpu.reciprocal %70 {approx = true} : vector<8x1xf32> -> vector<8x1xf32>
    %72 = vector.broadcast %71 : vector<8x1xf32> to vector<8x8xf32>
    %73 = arith.mulf %68, %72 : vector<8x8xf32>
    %74 = arith.truncf %73 : vector<8x8xf32> to vector<8x8xbf16>
    %75 = vector.extract_strided_slice %25 {offsets = [0, 64], sizes = [8, 32], strides = [1, 1]} : vector<8x128xbf16> to vector<8x32xbf16>
    %cst_26 = arith.constant dense<0.000000e+00> : vector<8x32xf32>
    %76 = tpu.matmul %74, %75, %cst_26 {dimension_numbers = #tpu.dot_dimension_numbers<[1], [0], [0], [1], [0, 0, 1, 1], [], []>} : vector<8x8xbf16>, vector<8x32xbf16>, vector<8x32xf32> -> vector<8x32xf32>
    %77 = vector.extract_strided_slice %23 {offsets = [0, 96], sizes = [8, 32], strides = [1, 1]} : vector<8x128xbf16> to vector<8x32xbf16>
    %78 = vector.extract_strided_slice %24 {offsets = [0, 96], sizes = [8, 32], strides = [1, 1]} : vector<8x128xbf16> to vector<8x32xbf16>
    %cst_27 = arith.constant dense<0.000000e+00> : vector<8x8xf32>
    %79 = tpu.matmul %77, %78, %cst_27 {dimension_numbers = #tpu.dot_dimension_numbers<[1], [1], [0], [0], [0, 0, 1, 0], [], []>} : vector<8x32xbf16>, vector<8x32xbf16>, vector<8x8xf32> -> vector<8x8xf32>
    %80 = arith.addf %79, %11 : vector<8x8xf32>
    %cst_28 = arith.constant dense<0xFF800000> : vector<8xf32>
    %81 = vector.multi_reduction <maximumf>, %80, %cst_28 [1] : vector<8x8xf32> to vector<8xf32>
    %82 = vector.shape_cast %81 : vector<8xf32> to vector<8x1xf32>
    %83 = vector.broadcast %82 : vector<8x1xf32> to vector<8x8xf32>
    %84 = arith.subf %80, %83 : vector<8x8xf32>
    %85 = math.exp %84 : vector<8x8xf32>
    %cst_29 = arith.constant dense<0.000000e+00> : vector<8xf32>
    %86 = vector.multi_reduction <add>, %85, %cst_29 [1] : vector<8x8xf32> to vector<8xf32>
    %87 = vector.shape_cast %86 : vector<8xf32> to vector<8x1xf32>
    %88 = tpu.reciprocal %87 {approx = true} : vector<8x1xf32> -> vector<8x1xf32>
    %89 = vector.broadcast %88 : vector<8x1xf32> to vector<8x8xf32>
    %90 = arith.mulf %85, %89 : vector<8x8xf32>
    %91 = arith.truncf %90 : vector<8x8xf32> to vector<8x8xbf16>
    %92 = vector.extract_strided_slice %25 {offsets = [0, 96], sizes = [8, 32], strides = [1, 1]} : vector<8x128xbf16> to vector<8x32xbf16>
    %cst_30 = arith.constant dense<0.000000e+00> : vector<8x32xf32>
    %93 = tpu.matmul %91, %92, %cst_30 {dimension_numbers = #tpu.dot_dimension_numbers<[1], [0], [0], [1], [0, 0, 1, 1], [], []>} : vector<8x8xbf16>, vector<8x32xbf16>, vector<8x32xf32> -> vector<8x32xf32>
    %94 = tpu.concatenate %42, %59, %76, %93 in 1 : vector<8x32xf32>, vector<8x32xf32>, vector<8x32xf32>, vector<8x32xf32> -> vector<8x128xf32>
    %95 = arith.truncf %94 : vector<8x128xf32> to vector<8x128xbf16>
    %cst_31 = arith.constant dense<0.000000e+00> : vector<8x128xf32>
    %96 = tpu.matmul %95, %14, %cst_31 {dimension_numbers = #tpu.dot_dimension_numbers<[1], [0], [0], [1], [0, 0, 1, 1], [], []>} : vector<8x128xbf16>, vector<128x128xbf16>, vector<8x128xf32> -> vector<8x128xf32>
    %97 = vector.broadcast %15 : vector<1x128xf32> to vector<8x128xf32>
    %98 = arith.addf %96, %97 : vector<8x128xf32>
    %99 = arith.addf %2, %98 : vector<8x128xf32>
    %c0_32 = arith.constant 0 : index
    %c0_33 = arith.constant 0 : index
    %100 = vector.load %arg7[%c0_32, %c0_33] : memref<1x128xf32, #tpu.memory_space<vmem>>, vector<1x128xf32>
    %c0_34 = arith.constant 0 : index
    %c0_35 = arith.constant 0 : index
    %101 = vector.load %arg8[%c0_34, %c0_35] : memref<1x128xf32, #tpu.memory_space<vmem>>, vector<1x128xf32>
    %cst_36 = arith.constant dense<0.000000e+00> : vector<8xf32>
    %102 = vector.multi_reduction <add>, %99, %cst_36 [1] : vector<8x128xf32> to vector<8xf32>
    %103 = vector.shape_cast %102 : vector<8xf32> to vector<8x1xf32>
    %cst_37 = arith.constant 1.280000e+02 : f32
    %104 = vector.broadcast %cst_37 : f32 to vector<8x1xf32>
    %105 = arith.divf %103, %104 : vector<8x1xf32>
    %106 = vector.broadcast %105 : vector<8x1xf32> to vector<8x128xf32>
    %107 = arith.subf %99, %106 : vector<8x128xf32>
    %108 = arith.mulf %107, %107 : vector<8x128xf32>
    %cst_38 = arith.constant dense<0.000000e+00> : vector<8xf32>
    %109 = vector.multi_reduction <add>, %108, %cst_38 [1] : vector<8x128xf32> to vector<8xf32>
    %110 = vector.shape_cast %109 : vector<8xf32> to vector<8x1xf32>
    %cst_39 = arith.constant 1.280000e+02 : f32
    %111 = vector.broadcast %cst_39 : f32 to vector<8x1xf32>
    %112 = arith.divf %110, %111 : vector<8x1xf32>
    %113 = vector.broadcast %105 : vector<8x1xf32> to vector<8x128xf32>
    %114 = arith.subf %99, %113 : vector<8x128xf32>
    %cst_40 = arith.constant 9.99999974E-6 : f32
    %115 = vector.broadcast %cst_40 : f32 to vector<8x1xf32>
    %116 = arith.addf %112, %115 : vector<8x1xf32>
    %117 = math.rsqrt %116 : vector<8x1xf32>
    %118 = vector.broadcast %117 : vector<8x1xf32> to vector<8x128xf32>
    %119 = arith.mulf %114, %118 : vector<8x128xf32>
    %120 = vector.broadcast %100 : vector<1x128xf32> to vector<8x128xf32>
    %121 = arith.mulf %119, %120 : vector<8x128xf32>
    %122 = vector.broadcast %101 : vector<1x128xf32> to vector<8x128xf32>
    %123 = arith.addf %121, %122 : vector<8x128xf32>
    %c0_41 = arith.constant 0 : index
    %c0_42 = arith.constant 0 : index
    %124 = vector.load %arg9[%c0_41, %c0_42] : memref<128x128xbf16, #tpu.memory_space<vmem>>, vector<128x128xbf16>
    %c0_43 = arith.constant 0 : index
    %c0_44 = arith.constant 0 : index
    %125 = vector.load %arg10[%c0_43, %c0_44] : memref<1x128xf32, #tpu.memory_space<vmem>>, vector<1x128xf32>
    %c0_45 = arith.constant 0 : index
    %c0_46 = arith.constant 0 : index
    %126 = vector.load %arg11[%c0_45, %c0_46] : memref<128x256xbf16, #tpu.memory_space<vmem>>, vector<128x256xbf16>
    %c0_47 = arith.constant 0 : index
    %c0_48 = arith.constant 0 : index
    %127 = vector.load %arg12[%c0_47, %c0_48] : memref<1x256xf32, #tpu.memory_space<vmem>>, vector<1x256xf32>
    %c0_49 = arith.constant 0 : index
    %c0_50 = arith.constant 0 : index
    %128 = vector.load %arg13[%c0_49, %c0_50] : memref<128x128xbf16, #tpu.memory_space<vmem>>, vector<128x128xbf16>
    %c0_51 = arith.constant 0 : index
    %c0_52 = arith.constant 0 : index
    %129 = vector.load %arg14[%c0_51, %c0_52] : memref<1x128xf32, #tpu.memory_space<vmem>>, vector<1x128xf32>
    %130 = arith.truncf %123 : vector<8x128xf32> to vector<8x128xbf16>
    %cst_53 = arith.constant dense<0.000000e+00> : vector<8x128xf32>
    %131 = tpu.matmul %130, %124, %cst_53 {dimension_numbers = #tpu.dot_dimension_numbers<[1], [0], [0], [1], [0, 0, 1, 1], [], []>} : vector<8x128xbf16>, vector<128x128xbf16>, vector<8x128xf32> -> vector<8x128xf32>
    %132 = vector.broadcast %125 : vector<1x128xf32> to vector<8x128xf32>
    %133 = arith.addf %131, %132 : vector<8x128xf32>
    %134 = arith.truncf %5 : vector<8x128xf32> to vector<8x128xbf16>
    %cst_54 = arith.constant dense<0.000000e+00> : vector<8x256xf32>
    %135 = tpu.matmul %134, %126, %cst_54 {dimension_numbers = #tpu.dot_dimension_numbers<[1], [0], [0], [1], [0, 0, 1, 1], [], []>} : vector<8x128xbf16>, vector<128x256xbf16>, vector<8x256xf32> -> vector<8x256xf32>
    %136 = vector.broadcast %127 : vector<1x256xf32> to vector<8x256xf32>
    %137 = arith.addf %135, %136 : vector<8x256xf32>
    %138 = vector.extract_strided_slice %137 {offsets = [0, 0], sizes = [8, 128], strides = [1, 1]} : vector<8x256xf32> to vector<8x128xf32>
    %139 = vector.extract_strided_slice %137 {offsets = [0, 128], sizes = [8, 128], strides = [1, 1]} : vector<8x256xf32> to vector<8x128xf32>
    %140 = arith.truncf %133 : vector<8x128xf32> to vector<8x128xbf16>
    %141 = arith.truncf %138 : vector<8x128xf32> to vector<8x128xbf16>
    %142 = arith.truncf %139 : vector<8x128xf32> to vector<8x128xbf16>
    %143 = vector.extract_strided_slice %140 {offsets = [0, 0], sizes = [8, 32], strides = [1, 1]} : vector<8x128xbf16> to vector<8x32xbf16>
    %144 = vector.extract_strided_slice %141 {offsets = [0, 0], sizes = [8, 32], strides = [1, 1]} : vector<8x128xbf16> to vector<8x32xbf16>
    %cst_55 = arith.constant dense<0.000000e+00> : vector<8x8xf32>
    %145 = tpu.matmul %143, %144, %cst_55 {dimension_numbers = #tpu.dot_dimension_numbers<[1], [1], [0], [0], [0, 0, 1, 0], [], []>} : vector<8x32xbf16>, vector<8x32xbf16>, vector<8x8xf32> -> vector<8x8xf32>
    %cst_56 = arith.constant dense<0xFF800000> : vector<8xf32>
    %146 = vector.multi_reduction <maximumf>, %145, %cst_56 [1] : vector<8x8xf32> to vector<8xf32>
    %147 = vector.shape_cast %146 : vector<8xf32> to vector<8x1xf32>
    %148 = vector.broadcast %147 : vector<8x1xf32> to vector<8x8xf32>
    %149 = arith.subf %145, %148 : vector<8x8xf32>
    %150 = math.exp %149 : vector<8x8xf32>
    %cst_57 = arith.constant dense<0.000000e+00> : vector<8xf32>
    %151 = vector.multi_reduction <add>, %150, %cst_57 [1] : vector<8x8xf32> to vector<8xf32>
    %152 = vector.shape_cast %151 : vector<8xf32> to vector<8x1xf32>
    %153 = tpu.reciprocal %152 {approx = true} : vector<8x1xf32> -> vector<8x1xf32>
    %154 = vector.broadcast %153 : vector<8x1xf32> to vector<8x8xf32>
    %155 = arith.mulf %150, %154 : vector<8x8xf32>
    %156 = arith.truncf %155 : vector<8x8xf32> to vector<8x8xbf16>
    %157 = vector.extract_strided_slice %142 {offsets = [0, 0], sizes = [8, 32], strides = [1, 1]} : vector<8x128xbf16> to vector<8x32xbf16>
    %cst_58 = arith.constant dense<0.000000e+00> : vector<8x32xf32>
    %158 = tpu.matmul %156, %157, %cst_58 {dimension_numbers = #tpu.dot_dimension_numbers<[1], [0], [0], [1], [0, 0, 1, 1], [], []>} : vector<8x8xbf16>, vector<8x32xbf16>, vector<8x32xf32> -> vector<8x32xf32>
    %159 = vector.extract_strided_slice %140 {offsets = [0, 32], sizes = [8, 32], strides = [1, 1]} : vector<8x128xbf16> to vector<8x32xbf16>
    %160 = vector.extract_strided_slice %141 {offsets = [0, 32], sizes = [8, 32], strides = [1, 1]} : vector<8x128xbf16> to vector<8x32xbf16>
    %cst_59 = arith.constant dense<0.000000e+00> : vector<8x8xf32>
    %161 = tpu.matmul %159, %160, %cst_59 {dimension_numbers = #tpu.dot_dimension_numbers<[1], [1], [0], [0], [0, 0, 1, 0], [], []>} : vector<8x32xbf16>, vector<8x32xbf16>, vector<8x8xf32> -> vector<8x8xf32>
    %cst_60 = arith.constant dense<0xFF800000> : vector<8xf32>
    %162 = vector.multi_reduction <maximumf>, %161, %cst_60 [1] : vector<8x8xf32> to vector<8xf32>
    %163 = vector.shape_cast %162 : vector<8xf32> to vector<8x1xf32>
    %164 = vector.broadcast %163 : vector<8x1xf32> to vector<8x8xf32>
    %165 = arith.subf %161, %164 : vector<8x8xf32>
    %166 = math.exp %165 : vector<8x8xf32>
    %cst_61 = arith.constant dense<0.000000e+00> : vector<8xf32>
    %167 = vector.multi_reduction <add>, %166, %cst_61 [1] : vector<8x8xf32> to vector<8xf32>
    %168 = vector.shape_cast %167 : vector<8xf32> to vector<8x1xf32>
    %169 = tpu.reciprocal %168 {approx = true} : vector<8x1xf32> -> vector<8x1xf32>
    %170 = vector.broadcast %169 : vector<8x1xf32> to vector<8x8xf32>
    %171 = arith.mulf %166, %170 : vector<8x8xf32>
    %172 = arith.truncf %171 : vector<8x8xf32> to vector<8x8xbf16>
    %173 = vector.extract_strided_slice %142 {offsets = [0, 32], sizes = [8, 32], strides = [1, 1]} : vector<8x128xbf16> to vector<8x32xbf16>
    %cst_62 = arith.constant dense<0.000000e+00> : vector<8x32xf32>
    %174 = tpu.matmul %172, %173, %cst_62 {dimension_numbers = #tpu.dot_dimension_numbers<[1], [0], [0], [1], [0, 0, 1, 1], [], []>} : vector<8x8xbf16>, vector<8x32xbf16>, vector<8x32xf32> -> vector<8x32xf32>
    %175 = vector.extract_strided_slice %140 {offsets = [0, 64], sizes = [8, 32], strides = [1, 1]} : vector<8x128xbf16> to vector<8x32xbf16>
    %176 = vector.extract_strided_slice %141 {offsets = [0, 64], sizes = [8, 32], strides = [1, 1]} : vector<8x128xbf16> to vector<8x32xbf16>
    %cst_63 = arith.constant dense<0.000000e+00> : vector<8x8xf32>
    %177 = tpu.matmul %175, %176, %cst_63 {dimension_numbers = #tpu.dot_dimension_numbers<[1], [1], [0], [0], [0, 0, 1, 0], [], []>} : vector<8x32xbf16>, vector<8x32xbf16>, vector<8x8xf32> -> vector<8x8xf32>
    %cst_64 = arith.constant dense<0xFF800000> : vector<8xf32>
    %178 = vector.multi_reduction <maximumf>, %177, %cst_64 [1] : vector<8x8xf32> to vector<8xf32>
    %179 = vector.shape_cast %178 : vector<8xf32> to vector<8x1xf32>
    %180 = vector.broadcast %179 : vector<8x1xf32> to vector<8x8xf32>
    %181 = arith.subf %177, %180 : vector<8x8xf32>
    %182 = math.exp %181 : vector<8x8xf32>
    %cst_65 = arith.constant dense<0.000000e+00> : vector<8xf32>
    %183 = vector.multi_reduction <add>, %182, %cst_65 [1] : vector<8x8xf32> to vector<8xf32>
    %184 = vector.shape_cast %183 : vector<8xf32> to vector<8x1xf32>
    %185 = tpu.reciprocal %184 {approx = true} : vector<8x1xf32> -> vector<8x1xf32>
    %186 = vector.broadcast %185 : vector<8x1xf32> to vector<8x8xf32>
    %187 = arith.mulf %182, %186 : vector<8x8xf32>
    %188 = arith.truncf %187 : vector<8x8xf32> to vector<8x8xbf16>
    %189 = vector.extract_strided_slice %142 {offsets = [0, 64], sizes = [8, 32], strides = [1, 1]} : vector<8x128xbf16> to vector<8x32xbf16>
    %cst_66 = arith.constant dense<0.000000e+00> : vector<8x32xf32>
    %190 = tpu.matmul %188, %189, %cst_66 {dimension_numbers = #tpu.dot_dimension_numbers<[1], [0], [0], [1], [0, 0, 1, 1], [], []>} : vector<8x8xbf16>, vector<8x32xbf16>, vector<8x32xf32> -> vector<8x32xf32>
    %191 = vector.extract_strided_slice %140 {offsets = [0, 96], sizes = [8, 32], strides = [1, 1]} : vector<8x128xbf16> to vector<8x32xbf16>
    %192 = vector.extract_strided_slice %141 {offsets = [0, 96], sizes = [8, 32], strides = [1, 1]} : vector<8x128xbf16> to vector<8x32xbf16>
    %cst_67 = arith.constant dense<0.000000e+00> : vector<8x8xf32>
    %193 = tpu.matmul %191, %192, %cst_67 {dimension_numbers = #tpu.dot_dimension_numbers<[1], [1], [0], [0], [0, 0, 1, 0], [], []>} : vector<8x32xbf16>, vector<8x32xbf16>, vector<8x8xf32> -> vector<8x8xf32>
    %cst_68 = arith.constant dense<0xFF800000> : vector<8xf32>
    %194 = vector.multi_reduction <maximumf>, %193, %cst_68 [1] : vector<8x8xf32> to vector<8xf32>
    %195 = vector.shape_cast %194 : vector<8xf32> to vector<8x1xf32>
    %196 = vector.broadcast %195 : vector<8x1xf32> to vector<8x8xf32>
    %197 = arith.subf %193, %196 : vector<8x8xf32>
    %198 = math.exp %197 : vector<8x8xf32>
    %cst_69 = arith.constant dense<0.000000e+00> : vector<8xf32>
    %199 = vector.multi_reduction <add>, %198, %cst_69 [1] : vector<8x8xf32> to vector<8xf32>
    %200 = vector.shape_cast %199 : vector<8xf32> to vector<8x1xf32>
    %201 = tpu.reciprocal %200 {approx = true} : vector<8x1xf32> -> vector<8x1xf32>
    %202 = vector.broadcast %201 : vector<8x1xf32> to vector<8x8xf32>
    %203 = arith.mulf %198, %202 : vector<8x8xf32>
    %204 = arith.truncf %203 : vector<8x8xf32> to vector<8x8xbf16>
    %205 = vector.extract_strided_slice %142 {offsets = [0, 96], sizes = [8, 32], strides = [1, 1]} : vector<8x128xbf16> to vector<8x32xbf16>
    %cst_70 = arith.constant dense<0.000000e+00> : vector<8x32xf32>
    %206 = tpu.matmul %204, %205, %cst_70 {dimension_numbers = #tpu.dot_dimension_numbers<[1], [0], [0], [1], [0, 0, 1, 1], [], []>} : vector<8x8xbf16>, vector<8x32xbf16>, vector<8x32xf32> -> vector<8x32xf32>
    %207 = tpu.concatenate %158, %174, %190, %206 in 1 : vector<8x32xf32>, vector<8x32xf32>, vector<8x32xf32>, vector<8x32xf32> -> vector<8x128xf32>
    %208 = arith.truncf %207 : vector<8x128xf32> to vector<8x128xbf16>
    %cst_71 = arith.constant dense<0.000000e+00> : vector<8x128xf32>
    %209 = tpu.matmul %208, %128, %cst_71 {dimension_numbers = #tpu.dot_dimension_numbers<[1], [0], [0], [1], [0, 0, 1, 1], [], []>} : vector<8x128xbf16>, vector<128x128xbf16>, vector<8x128xf32> -> vector<8x128xf32>
    %210 = vector.broadcast %129 : vector<1x128xf32> to vector<8x128xf32>
    %211 = arith.addf %209, %210 : vector<8x128xf32>
    %212 = arith.addf %123, %211 : vector<8x128xf32>
    %c0_72 = arith.constant 0 : index
    %c0_73 = arith.constant 0 : index
    %213 = vector.load %arg15[%c0_72, %c0_73] : memref<1x128xf32, #tpu.memory_space<vmem>>, vector<1x128xf32>
    %c0_74 = arith.constant 0 : index
    %c0_75 = arith.constant 0 : index
    %214 = vector.load %arg16[%c0_74, %c0_75] : memref<1x128xf32, #tpu.memory_space<vmem>>, vector<1x128xf32>
    %cst_76 = arith.constant dense<0.000000e+00> : vector<8xf32>
    %215 = vector.multi_reduction <add>, %212, %cst_76 [1] : vector<8x128xf32> to vector<8xf32>
    %216 = vector.shape_cast %215 : vector<8xf32> to vector<8x1xf32>
    %cst_77 = arith.constant 1.280000e+02 : f32
    %217 = vector.broadcast %cst_77 : f32 to vector<8x1xf32>
    %218 = arith.divf %216, %217 : vector<8x1xf32>
    %219 = vector.broadcast %218 : vector<8x1xf32> to vector<8x128xf32>
    %220 = arith.subf %212, %219 : vector<8x128xf32>
    %221 = arith.mulf %220, %220 : vector<8x128xf32>
    %cst_78 = arith.constant dense<0.000000e+00> : vector<8xf32>
    %222 = vector.multi_reduction <add>, %221, %cst_78 [1] : vector<8x128xf32> to vector<8xf32>
    %223 = vector.shape_cast %222 : vector<8xf32> to vector<8x1xf32>
    %cst_79 = arith.constant 1.280000e+02 : f32
    %224 = vector.broadcast %cst_79 : f32 to vector<8x1xf32>
    %225 = arith.divf %223, %224 : vector<8x1xf32>
    %226 = vector.broadcast %218 : vector<8x1xf32> to vector<8x128xf32>
    %227 = arith.subf %212, %226 : vector<8x128xf32>
    %cst_80 = arith.constant 9.99999974E-6 : f32
    %228 = vector.broadcast %cst_80 : f32 to vector<8x1xf32>
    %229 = arith.addf %225, %228 : vector<8x1xf32>
    %230 = math.rsqrt %229 : vector<8x1xf32>
    %231 = vector.broadcast %230 : vector<8x1xf32> to vector<8x128xf32>
    %232 = arith.mulf %227, %231 : vector<8x128xf32>
    %233 = vector.broadcast %213 : vector<1x128xf32> to vector<8x128xf32>
    %234 = arith.mulf %232, %233 : vector<8x128xf32>
    %235 = vector.broadcast %214 : vector<1x128xf32> to vector<8x128xf32>
    %236 = arith.addf %234, %235 : vector<8x128xf32>
    %c0_81 = arith.constant 0 : index
    %c0_82 = arith.constant 0 : index
    %237 = vector.load %arg17[%c0_81, %c0_82] : memref<128x512xbf16, #tpu.memory_space<vmem>>, vector<128x512xbf16>
    %c0_83 = arith.constant 0 : index
    %c0_84 = arith.constant 0 : index
    %238 = vector.load %arg18[%c0_83, %c0_84] : memref<1x512xf32, #tpu.memory_space<vmem>>, vector<1x512xf32>
    %c0_85 = arith.constant 0 : index
    %c0_86 = arith.constant 0 : index
    %239 = vector.load %arg19[%c0_85, %c0_86] : memref<512x128xbf16, #tpu.memory_space<vmem>>, vector<512x128xbf16>
    %c0_87 = arith.constant 0 : index
    %c0_88 = arith.constant 0 : index
    %240 = vector.load %arg20[%c0_87, %c0_88] : memref<1x128xf32, #tpu.memory_space<vmem>>, vector<1x128xf32>
    %241 = arith.truncf %236 : vector<8x128xf32> to vector<8x128xbf16>
    %cst_89 = arith.constant dense<0.000000e+00> : vector<8x512xf32>
    %242 = tpu.matmul %241, %237, %cst_89 {dimension_numbers = #tpu.dot_dimension_numbers<[1], [0], [0], [1], [0, 0, 1, 1], [], []>} : vector<8x128xbf16>, vector<128x512xbf16>, vector<8x512xf32> -> vector<8x512xf32>
    %243 = vector.broadcast %238 : vector<1x512xf32> to vector<8x512xf32>
    %244 = arith.addf %242, %243 : vector<8x512xf32>
    %cst_90 = arith.constant 0.000000e+00 : f32
    %245 = vector.broadcast %cst_90 : f32 to vector<8x512xf32>
    %246 = arith.maximumf %244, %245 : vector<8x512xf32>
    %247 = arith.truncf %246 : vector<8x512xf32> to vector<8x512xbf16>
    %cst_91 = arith.constant dense<0.000000e+00> : vector<8x128xf32>
    %248 = tpu.matmul %247, %239, %cst_91 {dimension_numbers = #tpu.dot_dimension_numbers<[1], [0], [0], [1], [0, 0, 1, 1], [], []>} : vector<8x512xbf16>, vector<512x128xbf16>, vector<8x128xf32> -> vector<8x128xf32>
    %249 = vector.broadcast %240 : vector<1x128xf32> to vector<8x128xf32>
    %250 = arith.addf %248, %249 : vector<8x128xf32>
    %251 = arith.addf %236, %250 : vector<8x128xf32>
    %c0_92 = arith.constant 0 : index
    %c0_93 = arith.constant 0 : index
    %252 = vector.load %arg21[%c0_92, %c0_93] : memref<1x128xf32, #tpu.memory_space<vmem>>, vector<1x128xf32>
    %c0_94 = arith.constant 0 : index
    %c0_95 = arith.constant 0 : index
    %253 = vector.load %arg22[%c0_94, %c0_95] : memref<1x128xf32, #tpu.memory_space<vmem>>, vector<1x128xf32>
    %cst_96 = arith.constant dense<0.000000e+00> : vector<8xf32>
    %254 = vector.multi_reduction <add>, %251, %cst_96 [1] : vector<8x128xf32> to vector<8xf32>
    %255 = vector.shape_cast %254 : vector<8xf32> to vector<8x1xf32>
    %cst_97 = arith.constant 1.280000e+02 : f32
    %256 = vector.broadcast %cst_97 : f32 to vector<8x1xf32>
    %257 = arith.divf %255, %256 : vector<8x1xf32>
    %258 = vector.broadcast %257 : vector<8x1xf32> to vector<8x128xf32>
    %259 = arith.subf %251, %258 : vector<8x128xf32>
    %260 = arith.mulf %259, %259 : vector<8x128xf32>
    %cst_98 = arith.constant dense<0.000000e+00> : vector<8xf32>
    %261 = vector.multi_reduction <add>, %260, %cst_98 [1] : vector<8x128xf32> to vector<8xf32>
    %262 = vector.shape_cast %261 : vector<8xf32> to vector<8x1xf32>
    %cst_99 = arith.constant 1.280000e+02 : f32
    %263 = vector.broadcast %cst_99 : f32 to vector<8x1xf32>
    %264 = arith.divf %262, %263 : vector<8x1xf32>
    %265 = vector.broadcast %257 : vector<8x1xf32> to vector<8x128xf32>
    %266 = arith.subf %251, %265 : vector<8x128xf32>
    %cst_100 = arith.constant 9.99999974E-6 : f32
    %267 = vector.broadcast %cst_100 : f32 to vector<8x1xf32>
    %268 = arith.addf %264, %267 : vector<8x1xf32>
    %269 = math.rsqrt %268 : vector<8x1xf32>
    %270 = vector.broadcast %269 : vector<8x1xf32> to vector<8x128xf32>
    %271 = arith.mulf %266, %270 : vector<8x128xf32>
    %272 = vector.broadcast %252 : vector<1x128xf32> to vector<8x128xf32>
    %273 = arith.mulf %271, %272 : vector<8x128xf32>
    %274 = vector.broadcast %253 : vector<1x128xf32> to vector<8x128xf32>
    %275 = arith.addf %273, %274 : vector<8x128xf32>
    %276 = arith.truncf %275 : vector<8x128xf32> to vector<8x128xbf16>
    %c0_101 = arith.constant 0 : index
    %c0_102 = arith.constant 0 : index
    %c0_103 = arith.constant 0 : index
    %277 = vector.load %arg23[%c0_101, %c0_102, %c0_103] : memref<1x8x128xbf16, #tpu.memory_space<vmem>>, vector<1x8x128xbf16>
    %278 = vector.shape_cast %277 : vector<1x8x128xbf16> to vector<8x128xbf16>
    %279 = vector.shape_cast %276 : vector<8x128xbf16> to vector<1x8x128xbf16>
    tpu.vector_store %arg23[%c0_101, %c0_102, %c0_103], %279 {strides = array<i32>} : memref<1x8x128xbf16, #tpu.memory_space<vmem>>, vector<1x8x128xbf16>,
    return
  }
  func.func @transform_0(%arg0: i32) -> (i32, i32, i32) {
    %c0_i32 = arith.constant 0 : i32
    %c0_i32_0 = arith.constant 0 : i32
    %c0_i32_1 = arith.constant 0 : i32
    return %arg0, %c0_i32, %c0_i32_0 : i32, i32, i32
  }
  func.func @transform_1(%arg0: i32) -> (i32, i32, i32) {
    %c0_i32 = arith.constant 0 : i32
    %c0_i32_0 = arith.constant 0 : i32
    %c0_i32_1 = arith.constant 0 : i32
    return %arg0, %c0_i32, %c0_i32_0 : i32, i32, i32
  }
  func.func @transform_2(%arg0: i32) -> (i32, i32) {
    %c0_i32 = arith.constant 0 : i32
    %c0_i32_0 = arith.constant 0 : i32
    %c0_i32_1 = arith.constant 0 : i32
    return %c0_i32, %c0_i32_0 : i32, i32
  }
  func.func @transform_3(%arg0: i32) -> (i32, i32) {
    %c0_i32 = arith.constant 0 : i32
    %c0_i32_0 = arith.constant 0 : i32
    %c0_i32_1 = arith.constant 0 : i32
    return %c0_i32, %c0_i32_0 : i32, i32
  }
  func.func @transform_4(%arg0: i32) -> (i32, i32) {
    %c0_i32 = arith.constant 0 : i32
    %c0_i32_0 = arith.constant 0 : i32
    %c0_i32_1 = arith.constant 0 : i32
    return %c0_i32, %c0_i32_0 : i32, i32
  }
  func.func @transform_5(%arg0: i32) -> (i32, i32) {
    %c0_i32 = arith.constant 0 : i32
    %c0_i32_0 = arith.constant 0 : i32
    %c0_i32_1 = arith.constant 0 : i32
    return %c0_i32, %c0_i32_0 : i32, i32
  }
  func.func @transform_6(%arg0: i32) -> (i32, i32) {
    %c0_i32 = arith.constant 0 : i32
    %c0_i32_0 = arith.constant 0 : i32
    %c0_i32_1 = arith.constant 0 : i32
    return %c0_i32, %c0_i32_0 : i32, i32
  }
  func.func @transform_7(%arg0: i32) -> (i32, i32) {
    %c0_i32 = arith.constant 0 : i32
    %c0_i32_0 = arith.constant 0 : i32
    %c0_i32_1 = arith.constant 0 : i32
    return %c0_i32, %c0_i32_0 : i32, i32
  }
  func.func @transform_8(%arg0: i32) -> (i32, i32) {
    %c0_i32 = arith.constant 0 : i32
    %c0_i32_0 = arith.constant 0 : i32
    %c0_i32_1 = arith.constant 0 : i32
    return %c0_i32, %c0_i32_0 : i32, i32
  }
  func.func @transform_9(%arg0: i32) -> (i32, i32) {
    %c0_i32 = arith.constant 0 : i32
    %c0_i32_0 = arith.constant 0 : i32
    %c0_i32_1 = arith.constant 0 : i32
    return %c0_i32, %c0_i32_0 : i32, i32
  }
  func.func @transform_10(%arg0: i32) -> (i32, i32) {
    %c0_i32 = arith.constant 0 : i32
    %c0_i32_0 = arith.constant 0 : i32
    %c0_i32_1 = arith.constant 0 : i32
    return %c0_i32, %c0_i32_0 : i32, i32
  }
  func.func @transform_11(%arg0: i32) -> (i32, i32) {
    %c0_i32 = arith.constant 0 : i32
    %c0_i32_0 = arith.constant 0 : i32
    %c0_i32_1 = arith.constant 0 : i32
    return %c0_i32, %c0_i32_0 : i32, i32
  }
  func.func @transform_12(%arg0: i32) -> (i32, i32) {
    %c0_i32 = arith.constant 0 : i32
    %c0_i32_0 = arith.constant 0 : i32
    %c0_i32_1 = arith.constant 0 : i32
    return %c0_i32, %c0_i32_0 : i32, i32
  }
  func.func @transform_13(%arg0: i32) -> (i32, i32) {
    %c0_i32 = arith.constant 0 : i32
    %c0_i32_0 = arith.constant 0 : i32
    %c0_i32_1 = arith.constant 0 : i32
    return %c0_i32, %c0_i32_0 : i32, i32
  }
  func.func @transform_14(%arg0: i32) -> (i32, i32) {
    %c0_i32 = arith.constant 0 : i32
    %c0_i32_0 = arith.constant 0 : i32
    %c0_i32_1 = arith.constant 0 : i32
    return %c0_i32, %c0_i32_0 : i32, i32
  }
  func.func @transform_15(%arg0: i32) -> (i32, i32) {
    %c0_i32 = arith.constant 0 : i32
    %c0_i32_0 = arith.constant 0 : i32
    %c0_i32_1 = arith.constant 0 : i32
    return %c0_i32, %c0_i32_0 : i32, i32
  }
  func.func @transform_16(%arg0: i32) -> (i32, i32) {
    %c0_i32 = arith.constant 0 : i32
    %c0_i32_0 = arith.constant 0 : i32
    %c0_i32_1 = arith.constant 0 : i32
    return %c0_i32, %c0_i32_0 : i32, i32
  }
  func.func @transform_17(%arg0: i32) -> (i32, i32) {
    %c0_i32 = arith.constant 0 : i32
    %c0_i32_0 = arith.constant 0 : i32
    %c0_i32_1 = arith.constant 0 : i32
    return %c0_i32, %c0_i32_0 : i32, i32
  }
  func.func @transform_18(%arg0: i32) -> (i32, i32) {
    %c0_i32 = arith.constant 0 : i32
    %c0_i32_0 = arith.constant 0 : i32
    %c0_i32_1 = arith.constant 0 : i32
    return %c0_i32, %c0_i32_0 : i32, i32
  }
  func.func @transform_19(%arg0: i32) -> (i32, i32) {
    %c0_i32 = arith.constant 0 : i32
    %c0_i32_0 = arith.constant 0 : i32
    %c0_i32_1 = arith.constant 0 : i32
    return %c0_i32, %c0_i32_0 : i32, i32
  }
  func.func @transform_20(%arg0: i32) -> (i32, i32) {
    %c0_i32 = arith.constant 0 : i32
    %c0_i32_0 = arith.constant 0 : i32
    %c0_i32_1 = arith.constant 0 : i32
    return %c0_i32, %c0_i32_0 : i32, i32
  }
  func.func @transform_21(%arg0: i32) -> (i32, i32) {
    %c0_i32 = arith.constant 0 : i32
    %c0_i32_0 = arith.constant 0 : i32
    %c0_i32_1 = arith.constant 0 : i32
    return %c0_i32, %c0_i32_0 : i32, i32
  }
  func.func @transform_22(%arg0: i32) -> (i32, i32, i32) {
    %c0_i32 = arith.constant 0 : i32
    %c0_i32_0 = arith.constant 0 : i32
    %c0_i32_1 = arith.constant 0 : i32
    return %arg0, %c0_i32, %c0_i32_0 : i32, i32, i32
  }
}

module attributes {stable_mosaic.version = 11 : i64} {
  func.func @_norm_project_kernel(%arg0: i32, %arg1: i32, %arg2: memref<1x8x128xbf16, #tpu.memory_space<vmem>>, %arg3: memref<1x128xf32, #tpu.memory_space<vmem>>, %arg4: memref<1x128xf32, #tpu.memory_space<vmem>>, %arg5: memref<128x256xbf16, #tpu.memory_space<vmem>>, %arg6: memref<1x256xf32, #tpu.memory_space<vmem>>, %arg7: memref<1x8x256xf32, #tpu.memory_space<vmem>>) attributes {dimension_semantics = [#tpu.dimension_semantics<parallel>, #tpu.dimension_semantics<parallel>], iteration_bounds = array<i64: 2, 1>, scalar_prefetch = 0 : i64, scratch_operands = 0 : i64, tpu.core_type = #tpu.core_type<tc>, window_params = [{transform_indices = @transform_0, window_bounds = array<i64: 1, 8, 128>}, {pipeline_mode = #tpu.pipeline_mode<synchronous>, transform_indices = @transform_1, window_bounds = array<i64: 1, 128>}, {pipeline_mode = #tpu.pipeline_mode<synchronous>, transform_indices = @transform_2, window_bounds = array<i64: 1, 128>}, {transform_indices = @transform_3, window_bounds = array<i64: 128, 256>}, {transform_indices = @transform_4, window_bounds = array<i64: 1, 256>}, {transform_indices = @transform_5, window_bounds = array<i64: 1, 8, 256>}]} {
    %c0 = arith.constant 0 : index
    %c0_0 = arith.constant 0 : index
    %c0_1 = arith.constant 0 : index
    %0 = vector.load %arg2[%c0, %c0_0, %c0_1] : memref<1x8x128xbf16, #tpu.memory_space<vmem>>, vector<1x8x128xbf16>
    %1 = vector.shape_cast %0 : vector<1x8x128xbf16> to vector<8x128xbf16>
    %2 = arith.extf %1 : vector<8x128xbf16> to vector<8x128xf32>
    %c0_2 = arith.constant 0 : index
    %c0_3 = arith.constant 0 : index
    %3 = vector.load %arg3[%c0_2, %c0_3] : memref<1x128xf32, #tpu.memory_space<vmem>>, vector<1x128xf32>
    %c0_4 = arith.constant 0 : index
    %c0_5 = arith.constant 0 : index
    %4 = vector.load %arg4[%c0_4, %c0_5] : memref<1x128xf32, #tpu.memory_space<vmem>>, vector<1x128xf32>
    %cst = arith.constant dense<0.000000e+00> : vector<8xf32>
    %5 = vector.multi_reduction <add>, %2, %cst [1] : vector<8x128xf32> to vector<8xf32>
    %6 = vector.shape_cast %5 : vector<8xf32> to vector<8x1xf32>
    %cst_6 = arith.constant 1.280000e+02 : f32
    %7 = vector.broadcast %cst_6 : f32 to vector<8x1xf32>
    %8 = arith.divf %6, %7 : vector<8x1xf32>
    %9 = vector.broadcast %8 : vector<8x1xf32> to vector<8x128xf32>
    %10 = arith.subf %2, %9 : vector<8x128xf32>
    %11 = arith.mulf %10, %10 : vector<8x128xf32>
    %cst_7 = arith.constant dense<0.000000e+00> : vector<8xf32>
    %12 = vector.multi_reduction <add>, %11, %cst_7 [1] : vector<8x128xf32> to vector<8xf32>
    %13 = vector.shape_cast %12 : vector<8xf32> to vector<8x1xf32>
    %cst_8 = arith.constant 1.280000e+02 : f32
    %14 = vector.broadcast %cst_8 : f32 to vector<8x1xf32>
    %15 = arith.divf %13, %14 : vector<8x1xf32>
    %16 = vector.broadcast %8 : vector<8x1xf32> to vector<8x128xf32>
    %17 = arith.subf %2, %16 : vector<8x128xf32>
    %cst_9 = arith.constant 9.99999974E-6 : f32
    %18 = vector.broadcast %cst_9 : f32 to vector<8x1xf32>
    %19 = arith.addf %15, %18 : vector<8x1xf32>
    %20 = math.rsqrt %19 : vector<8x1xf32>
    %21 = vector.broadcast %20 : vector<8x1xf32> to vector<8x128xf32>
    %22 = arith.mulf %17, %21 : vector<8x128xf32>
    %23 = vector.broadcast %3 : vector<1x128xf32> to vector<8x128xf32>
    %24 = arith.mulf %22, %23 : vector<8x128xf32>
    %25 = vector.broadcast %4 : vector<1x128xf32> to vector<8x128xf32>
    %26 = arith.addf %24, %25 : vector<8x128xf32>
    %27 = arith.truncf %26 : vector<8x128xf32> to vector<8x128xbf16>
    %c0_10 = arith.constant 0 : index
    %c0_11 = arith.constant 0 : index
    %28 = vector.load %arg5[%c0_10, %c0_11] : memref<128x256xbf16, #tpu.memory_space<vmem>>, vector<128x256xbf16>
    %cst_12 = arith.constant dense<0.000000e+00> : vector<8x256xf32>
    %29 = tpu.matmul %27, %28, %cst_12 {dimension_numbers = #tpu.dot_dimension_numbers<[1], [0], [0], [1], [0, 0, 1, 1], [], []>} : vector<8x128xbf16>, vector<128x256xbf16>, vector<8x256xf32> -> vector<8x256xf32>
    %c0_13 = arith.constant 0 : index
    %c0_14 = arith.constant 0 : index
    %30 = vector.load %arg6[%c0_13, %c0_14] : memref<1x256xf32, #tpu.memory_space<vmem>>, vector<1x256xf32>
    %31 = vector.broadcast %30 : vector<1x256xf32> to vector<8x256xf32>
    %32 = arith.addf %29, %31 : vector<8x256xf32>
    %c0_15 = arith.constant 0 : index
    %c0_16 = arith.constant 0 : index
    %c0_17 = arith.constant 0 : index
    %33 = vector.load %arg7[%c0_15, %c0_16, %c0_17] : memref<1x8x256xf32, #tpu.memory_space<vmem>>, vector<1x8x256xf32>
    %34 = vector.shape_cast %33 : vector<1x8x256xf32> to vector<8x256xf32>
    %35 = vector.shape_cast %32 : vector<8x256xf32> to vector<1x8x256xf32>
    tpu.vector_store %arg7[%c0_15, %c0_16, %c0_17], %35 {strides = array<i32>} : memref<1x8x256xf32, #tpu.memory_space<vmem>>, vector<1x8x256xf32>,
    return
  }
  func.func @transform_0(%arg0: i32, %arg1: i32) -> (i32, i32, i32) {
    %c0_i32 = arith.constant 0 : i32
    %c0_i32_0 = arith.constant 0 : i32
    %c0_i32_1 = arith.constant 0 : i32
    return %arg0, %c0_i32, %c0_i32_0 : i32, i32, i32
  }
  func.func @transform_1(%arg0: i32, %arg1: i32) -> (i32, i32) {
    %c0_i32 = arith.constant 0 : i32
    %c0_i32_0 = arith.constant 0 : i32
    %c0_i32_1 = arith.constant 0 : i32
    return %c0_i32, %c0_i32_0 : i32, i32
  }
  func.func @transform_2(%arg0: i32, %arg1: i32) -> (i32, i32) {
    %c0_i32 = arith.constant 0 : i32
    %c0_i32_0 = arith.constant 0 : i32
    %c0_i32_1 = arith.constant 0 : i32
    return %c0_i32, %c0_i32_0 : i32, i32
  }
  func.func @transform_3(%arg0: i32, %arg1: i32) -> (i32, i32) {
    %c0_i32 = arith.constant 0 : i32
    %c0_i32_0 = arith.constant 0 : i32
    return %c0_i32, %arg1 : i32, i32
  }
  func.func @transform_4(%arg0: i32, %arg1: i32) -> (i32, i32) {
    %c0_i32 = arith.constant 0 : i32
    %c0_i32_0 = arith.constant 0 : i32
    return %c0_i32, %arg1 : i32, i32
  }
  func.func @transform_5(%arg0: i32, %arg1: i32) -> (i32, i32, i32) {
    %c0_i32 = arith.constant 0 : i32
    %c0_i32_0 = arith.constant 0 : i32
    return %arg0, %c0_i32, %arg1 : i32, i32, i32
  }
}

</mosaic_0001>

<bundles_post_ra>
// kernel: _lambda_.5
= control target key start
LH: loop header
LB: loop body
LE: loop exit
PB: predicated region body
PF: predicated region fallthrough
CT: control target
= control target key end

     0   :  { %s300_s12 = smov 0   ;;  %s323_s0 = inlined_call_operand.vmem [shape: bf16[2,8,128], index: 0, kind: input, shape index: {}]   ;;  %s324_s1 = inlined_call_operand.vmem [shape: f32[1,128], index: 1, kind: input, shape index: {}]   ;;  %s325_s2 = inlined_call_operand.vmem [shape: f32[1,128], index: 2, kind: input, shape index: {}]   ;;  %s326_s3 = inlined_call_operand.vmem [shape: bf16[2,8,128], index: 3, kind: output, shape index: {}]  }
   0x1 LB: > { %s251_s13 = sadd.s32 4294967295, %s278_s12   ;;  %p255_p0 = scmp.ge.s32.totalorder %s278_s12, 1  ;;  %s278_s12 = sphi %s300_s12, %s13_s12  }
   0x2   : > { %p136_p1 = scmp.lt.s32.totalorder %s278_s12, 3 }
   0x4   : > { %p137_p2 = pnand %p255_p0, %p136_p1 }
   0x5   : > { %p158_p3 = scmp.lt.s32.totalorder (!%p137_p2), %s251_s13, 1 }
   0x6   : > { %140 = sbr.rel (%p137_p2) target bundleno = 326 (0x146), region = 32 }
   0xb   : > { %s328_s13 = smov (!%p158_p3, %s251_s13), 1  ;;  %v258_v10 = vld [vmem:[%s324_s1] ss:$0 sm:$0xff] }
   0xc   : > { %s256_s14 = sshll.u32 %s328_s13, 2  ;;  %v259_v12 = vld [vmem:[%s325_s2] ss:$0 sm:$0xff] }
   0xd   : > { %s161_s17 = scalar_lea.vmem %s323_s0, %s256_s14  ;;  %s165_s24 = scalar_lea.vmem %s326_s3, %s256_s14 }
   0xe   : > { %v166_v0 = vld [vmem:[%s161_s17] sm:$0xf] }
   0xf   : > { %v167_v1 = vunpack.c.l.bf16 %v166_v0 }
  0x11   : > { %170 = vadd.xlane.f32.xlu0 %v167_v1 }
  0x9a   : > { %v171_v2 = vpop.xlane.xlu0 %170 }
  0x9b   : > { %v173_v3 = vmul.f32 0.0078125, %v171_v2 }
  0x9d   : > { %v174_v4 = vsub.f32 %v167_v1, %v173_v3 }
  0x9f   : > { %v175_v5 = vmul.f32 %v174_v4, %v174_v4 }
  0xa1   : > { %176 = vadd.xlane.f32.xlu0 %v175_v5 }
 0x12a   : > { %v177_v6 = vpop.xlane.xlu0 %176 }
 0x12b   : > { %v178_v7 = vmul.f32 0.0078125, %v177_v6 }
 0x12d   : > { %v179_v8 = vadd.f32 1e-05, %v178_v7 }
 0x12f   : > { %270 = vrsqrt.f32 %v179_v8 }
 0x13c   : > { %v271_v9 = vpop.eup %270 }
 0x13d   : > { %v181_v11 = vmul.f32 %v271_v9, %v174_v4 }
 0x13f   : > { %v188_v13 = vmul.f32 %v258_v10, %v181_v11 }
 0x141   : > { %v195_v14 = vadd.f32 %v259_v12, %v188_v13 }
 0x143   : > { %v196_v15 = vpack.c.bf16 %v195_v14, %v195_v14 }
 0x145   : > { %197 = vst [vmem:[%s165_s24] sm:$0xf] %v196_v15 }
 0x146 PF: > { %s13_s12 = sadd.s32 1, %s278_s12  }
 0x147   : > { %p10_p4 = scmp.ge.s32.totalorder %s13_s12, 4  }
 0x149   :  { %12 = sbr.rel (!%p10_p4) target bundleno = 1 (0x1), region = 62 }

// kernel: _lambda_.7
= control target key start
LH: loop header
LB: loop body
LE: loop exit
PB: predicated region body
PF: predicated region fallthrough
CT: control target
= control target key end

     0   :  { %10 = vsyncpa [#allocation3], 0  ;;  %s966_s0 = inlined_call_operand.vmem [shape: bf16[2,8,128], index: 0, kind: input, shape index: {}]   ;;  %s967_s1 = inlined_call_operand.vmem [shape: f32[1,128], index: 1, kind: input, shape index: {}]   ;;  %s968_s2 = inlined_call_operand.vmem [shape: f32[1,128], index: 2, kind: input, shape index: {}]   ;;  %s969_s3 = inlined_call_operand.vmem [shape: bf16[128,256], index: 3, kind: input, shape index: {}]   ;;  %s970_s4 = inlined_call_operand.vmem [shape: f32[1,256], index: 4, kind: input, shape index: {}]   ;;  %s971_s5 = inlined_call_operand.hbm [shape: f32[2,8,256], index: 5, kind: output, shape index: {}]  }
   0x1   :  { %12 = vsyncpa [#allocation3 + $0x1], 0  ;;  %s798_s18 = smov 0   ;;  %s800_s19 = smov 0  }
   0x2   :  { %s802_s20 = smov 0   ;;  %s804_s21 = smov 0  }
   0x3   :  { %s806_s22 = smov 0   ;;  %s808_s23 = smov 0  }
   0x4 LB: > { %s573_s24 = sadd.s32 4294967295, %s764_s23   ;;  %s574_s25 = sadd.s32 4294967294, %s764_s23   ;;  %s764_s23 = sphi %s808_s23, %s18_s23   ;;  %s760_s22 = sphi %s806_s22, %s978_s22   ;;  %s756_s21 = sphi %s804_s21, %s977_s21   ;;  %s752_s20 = sphi %s802_s20, %s976_s20   ;;  %s748_s19 = sphi %s800_s19, %s975_s19   ;;  %s744_s18 = sphi %s798_s18, %s974_s18  }
   0x5   : > { %s30_s26 = sadd.s32 1, %s760_s22  ;;  %s159_s27 = sadd.s32 1, %s752_s20 }
   0x6   : > { %p32_p0 = scmp.ge.s32.totalorder %s30_s26, 2  ;;  %p169_p1 = scmp.ne.s32.totalorder %s752_s20, %s748_s19 }
   0x7   : > { %p170_p2 = scmp.eq.s32.totalorder %s573_s24, 1  ;;  %p175_p3 = scmp.ne.s32.totalorder %s748_s19, %s744_s18 }
   0x8   : > { %s980_s26 = smov (%p32_p0, %s30_s26), 0  ;;  %p176_p5 = scmp.eq.s32.totalorder %s574_s25, 1 }
   0x9   : > { %p838_p4 = por %p170_p2, %p169_p1  ;;  %s154_s29 = ssub.s32 %s760_s22, %s980_s26 }
   0xa   : > { %p579_p6 = scmp.ge.s32.totalorder %s764_s23, 1  ;;  %p157_p7 = scmp.eq.s32.totalorder %s154_s29, 0 }
   0xb   : > { %p845_p8 = por %p176_p5, %p175_p3  ;;  %p224_p9 = scmp.lt.s32.totalorder %s764_s23, 3 }
   0xc   : > { %s851_s6 = scalar_select %p157_p7, %s752_s20, %s159_s27  }
   0xd   : > { %p225_p10 = pnand %p579_p6, %p224_p9 }
   0xe   : > { %p260_p11 = scmp.lt.s32.totalorder (!%p225_p10), %s756_s21, 1  ;;  %s257_s24 = sand.u32 (!%p225_p10), 1, %s748_s19  }
   0xf   : > { %228 = sbr.rel (%p225_p10) target bundleno = 546 (0x222), region = 40  ;;  %s580_s25 = sshll.u32 (!%p225_p10), %s257_s24, 4 }
  0x10   : > { %s767_s14 = smov (!%p225_p10), [#allocation2]  }
  0x11   : > { %s692_s15 = sshll.u32 (!%p225_p10), %s767_s14, 4  ;;  %s693_s15 = int_to_ptr.vmem [resolvable:$false] %s692_s15 }
  0x12   : > { %s694_s16 = scalar_lea.vmem (!%p225_p10), %s693_s15, 512 }
  0x14   : > { %s261_s7 = scalar_select %p260_p11, %s756_s21, 1  ;;  %v662_v2 = vld [vmem:[%s969_s3 + $0x74] ss:$8 sps:$4 sm:$0xff]   ;;  %v664_v3 = vld [vmem:[%s969_s3 + $0x70] ss:$8 sps:$4 sm:$0xff]   ;;  %v766_v17 = vmov 0   ;;  %v326_v33 = vlaneseq }
  0x15   : > { %v665_v4 = vld [vmem:[%s969_s3 + $0x64] ss:$8 sps:$4 sm:$0xff]   ;;  %416 = vmatprep.subr.bf16.mxu0 %v662_v2  ;;  %v667_v5 = vld [vmem:[%s969_s3 + $0x60] ss:$8 sps:$4 sm:$0xff]   ;;  %v668_v10 = vld [vmem:[%s969_s3 + $0x54] ss:$8 sps:$4 sm:$0xff]   ;;  %448 = vmatprep.mubr.bf16.mxu0 %v766_v17 }
  0x16   : > { %s581_s8 = sshll.u32 %s261_s7, 2  ;;  %417 = vmatpush1.bf16.msra.mxu0 %v664_v3  ;;  %v670_v11 = vld [vmem:[%s969_s3 + $0x50] ss:$8 sps:$4 sm:$0xff]   ;;  %v671_v12 = vld [vmem:[%s969_s3 + $0x44] ss:$8 sps:$4 sm:$0xff]   ;;  %v327_v34 = vshrl.u32 %v326_v33, 7 }
  0x17   : > { %s263_s11 = scalar_lea.vmem %s966_s0, %s581_s8  ;;  %418 = vmatprep.subr.bf16.mxu0 %v665_v4  ;;  %v673_v13 = vld [vmem:[%s969_s3 + $0x40] ss:$8 sps:$4 sm:$0xff]   ;;  %v674_v14 = vld [vmem:[%s969_s3 + $0x34] ss:$8 sps:$4 sm:$0xff]   ;;  %v676_v15 = vld [vmem:[%s969_s3 + $0x30] ss:$8 sps:$4 sm:$0xff]  }
  0x18   : > { %v277_v0 = vld [vmem:[%s263_s11] sm:$0xf]  ;;  %v677_v16 = vld [vmem:[%s969_s3 + $0x24] ss:$8 sps:$4 sm:$0xff]   ;;  %v680_v19 = vld [vmem:[%s969_s3 + $0x14] ss:$8 sps:$4 sm:$0xff]  }
  0x19   : > { %v278_v1 = vunpack.c.l.bf16 %v277_v0  ;;  %v679_v18 = vld [vmem:[%s969_s3 + $0x20] ss:$8 sps:$4 sm:$0xff]   ;;  %v682_v20 = vld [vmem:[%s969_s3 + $0x10] ss:$8 sps:$4 sm:$0xff]   ;;  %v683_v21 = vld [vmem:[%s969_s3 + $0x4] ss:$8 sps:$4 sm:$0xff]  }
  0x1a   : > { %419 = vmatpush1.bf16.msra.mxu0 %v667_v5  ;;  %v685_v22 = vld [vmem:[%s969_s3] ss:$8 sps:$4 sm:$0xff]   ;;  %v328_v35 = vsub.s32 0, %v327_v34  ;;  %v332_v37 = vsub.s32 1, %v327_v34  ;;  %s605_s7 = sshll.u32 %s756_s21, 8  ;;  %s259_s8 = scalar_lea.vmem [#allocation2], %s580_s25 }
  0x1b   : > { %281 = vadd.xlane.f32.xlu0 %v278_v1  ;;  %420 = vmatprep.subr.bf16.mxu0 %v668_v10  ;;  %v582_v27 = vld [vmem:[%s967_s1] ss:$0 sm:$0xff]  ;;  %s476_s9 = sshll.u32 %s259_s8, 4  ;;  %s920_s12 = scalar_lea.hbm %s971_s5, %s605_s7  ;;  %s922_s9 = int_to_ptr.vmem [resolvable:$true] %s476_s9 }
  0x1c   : > { %v583_v29 = vld [vmem:[%s968_s2] ss:$0 sm:$0xff]  ;;  %s460_s21 = scalar_lea.sflag [#allocation3], %s257_s24  ;;  %s688_s13 = scalar_lea.vmem %s922_s9, 256 }
  0x1d   : > { %v324_v36 = vld [vmem:[%s970_s4] sm:$0x3]  ;;  %p689_p12 = scmp.ne.s32.totalorder %s922_s9, %s688_s13  ;;  %p695_p1 = scmp.lt.s32.totalorder %s922_s9, %s693_s15 }
  0x1e   : > { %421 = vmatpush1.bf16.msra.mxu0 %v670_v11  ;;  %v329_v38 = vrot.slane %v324_v36, %v328_v35  ;;  %v333_v39 = vrot.slane %v324_v36, %v332_v37  ;;  %p696_p2 = scmp.lt.s32.totalorder %s694_s16, %s688_s13 }
  0x1f   : > { %422 = vmatprep.subr.bf16.mxu0 %v671_v12  ;;  %p690_p13 = pnand %p689_p12, %p838_p4 }
  0x20   : > { %p697_p3 = por %p696_p2, %p695_p1 }
  0x21   : > { %p691_p0 = pneg %p690_p13 }
  0x22   : > { %423 = vmatpush1.bf16.msra.mxu0 %v673_v13 }
  0x23   : > { %424 = vmatprep.subr.bf16.mxu0 %v674_v14  ;;  %p698_p5 = pnand %p697_p3, %p691_p0 }
  0x26   : > { %425 = vmatpush1.bf16.msra.mxu0 %v676_v15 }
  0x27   : > { %426 = vmatprep.subr.bf16.mxu0 %v677_v16 }
  0x2a   : > { %427 = vmatpush1.bf16.msra.mxu0 %v679_v18 }
  0x2b   : > { %428 = vmatprep.subr.bf16.mxu0 %v680_v19 }
  0x2e   : > { %429 = vmatpush1.bf16.msra.mxu0 %v682_v20 }
  0x2f   : > { %430 = vmatprep.subr.bf16.mxu0 %v683_v21 }
  0x32   : > { %431 = vmatpush1.bf16.msra.mxu0 %v685_v22 }
  0xa4   : > { %v282_v6 = vpop.xlane.xlu0 %281 }
  0xa5   : > { %v284_v7 = vmul.f32 0.0078125, %v282_v6 }
  0xa7   : > { %v285_v8 = vsub.f32 %v278_v1, %v284_v7 }
  0xa9   : > { %v286_v9 = vmul.f32 %v285_v8, %v285_v8 }
  0xab   : > { %287 = vadd.xlane.f32.xlu0 %v286_v9 }
 0x134   : > { %v288_v23 = vpop.xlane.xlu0 %287 }
 0x135   : > { %v289_v24 = vmul.f32 0.0078125, %v288_v23 }
 0x137   : > { %v290_v25 = vadd.f32 1e-05, %v289_v24 }
 0x139   : > { %686 = vrsqrt.f32 %v290_v25 }
 0x146   : > { %v687_v26 = vpop.eup %686 }
 0x147   : > { %v292_v28 = vmul.f32 %v687_v26, %v285_v8 }
 0x149   : > { %v299_v30 = vmul.f32 %v582_v27, %v292_v28 }
 0x14b   : > { %v306_v31 = vadd.f32 %v583_v29, %v299_v30 }
 0x14d   : > { %v307_v32 = vpack.c.bf16 %v306_v31, %v306_v31 }
 0x14f   : > { %449 = vmatmul.mubr.bf16.vlgmr.msra.gmra.mxu0 %v307_v32 }
 0x20f   : > { %v450_v40 = vpop.f32.mrf.mxu0 }
 0x210   : > { %v451_v41 = vadd.f32 %v450_v40, %v329_v38 }
 0x211   : > { %v452_v42 = vpop.f32.mrf.mxu0 }
 0x212   : > { %457 = vst [vmem:[%s259_s8] sm:$0xff] %v451_v41  ;;  %v453_v43 = vadd.f32 %v452_v42, %v333_v39 }
 0x213   : > { %v454_v44 = vpop.f32.mrf.mxu0 }
 0x214   : > { %458 = vst [vmem:[%s259_s8 + $0x8] sm:$0xff] %v453_v43 }
 0x215   : > { %v455_v45 = vpop.f32.mrf.mxu0 }
 0x216   : > { %701 = shalt.err (!%p698_p5)
}
 0x217   : > { %s702_s17 = scalar_lea.hbm %s920_s12, 256  ;;  %s706_s27 = scalar_lea.hbm %s971_s5, 512 }
 0x218   : > { %p703_p6 = scmp.ne.s32.totalorder %s920_s12, %s702_s17  ;;  %p707_p10 = scmp.lt.s32.totalorder %s920_s12, %s971_s5 }
 0x219   : > { %p708_p11 = scmp.lt.s32.totalorder %s706_s27, %s702_s17 }
 0x21a   : > { %p704_p7 = pnand %p703_p6, %p838_p4 }
 0x21b   : > { %p709_p12 = por %p708_p11, %p707_p10 }
 0x21c   : > { %p705_p9 = pneg %p704_p7 }
 0x21e   : > { %p710_p13 = pnand %p709_p12, %p705_p9 }
 0x220   : > { %713 = shalt.err (!%p710_p13)
}
 0x221   : > { %606 = dma.vmem_to_hbm [thread:$0]  (%p838_p4), %s922_s9, 256, %s920_s12, %s460_s21  }
 0x222 PF: > { %p612_p0 = scmp.ge.s32.totalorder %s764_s23, 2  ;;  %s488_s8 = sand.u32 1, %s744_s18  }
 0x223   : > { %s489_s10 = scalar_lea.sflag [#allocation3], %s488_s8 }
 0x224   : > { %p609_p1 = pnand %p612_p0, %p845_p8 }
 0x226   : > { %p610_p2 = pneg %p609_p1 }
 0x228   : > { %739 = dma.done.wait (%p610_p2), %s489_s10, 256  }
 0x229   : > { %741 = vsyncadd (%p610_p2), %s489_s10, 4294967040  ;;  %s18_s23 = sadd.s32 1, %s764_s23   ;;  %s974_s18 = smov %s748_s19 }
 0x22a   : > { %p15_p3 = scmp.ge.s32.totalorder %s18_s23, 4   ;;  %s975_s19 = smov %s752_s20 }
 0x22b   : > { %s976_s20 = smov %s851_s6  ;;  %s977_s21 = smov %s760_s22 }
 0x22c   : > { %s978_s22 = smov %s980_s26  ;;  %17 = sbr.rel (!%p15_p3) target bundleno = 4 (0x4), region = 81 }
 0x231   :  { %494 = vsyncpa [#allocation3], 1 }
 0x232   :  { %496 = vsyncpa [#allocation3 + $0x1], 1 }

// kernel: _lambda_.4
= control target key start
LH: loop header
LB: loop body
LE: loop exit
PB: predicated region body
PF: predicated region fallthrough
CT: control target
= control target key end

     0   :  { %18 = vsyncpa [#allocation3], 0  ;;  %s3033_s0 = inlined_call_operand.vmem [shape: bf16[2,8,128], index: 0, kind: input, shape index: {}]   ;;  %s3034_s1 = inlined_call_operand.hbm [shape: bf16[128,384], index: 1, kind: input, shape index: {}]   ;;  %s3035_s2 = inlined_call_operand.vmem [shape: f32[1,384], index: 2, kind: input, shape index: {}]   ;;  %s3036_s3 = inlined_call_operand.vmem [shape: bf16[128,128], index: 3, kind: input, shape index: {}]   ;;  %s3037_s4 = inlined_call_operand.vmem [shape: f32[1,128], index: 4, kind: input, shape index: {}, may-alias: {4,6,10,12}]   ;;  %s3038_s5 = inlined_call_operand.vmem [shape: f32[1,128], index: 5, kind: input, shape index: {}, may-alias: {5,11}]   ;;  %s3039_s6 = inlined_call_operand.vmem [shape: f32[1,128], index: 6, kind: input, shape index: {}, may-alias: {4,6,10,12}]   ;;  %s3040_s7 = inlined_call_operand.vmem [shape: bf16[128,512], index: 7, kind: input, shape index: {}]   ;;  %s3041_s8 = inlined_call_operand.vmem [shape: f32[1,512], index: 8, kind: input, shape index: {}]   ;;  %s3042_s9 = inlined_call_operand.hbm [shape: bf16[512,128], index: 9, kind: input, shape index: {}]   ;;  %s3043_s10 = inlined_call_operand.vmem [shape: f32[1,128], index: 10, kind: input, shape index: {}, may-alias: {4,6,10,12}]   ;;  %s3044_s11 = inlined_call_operand.vmem [shape: f32[1,128], index: 11, kind: input, shape index: {}, may-alias: {5,11}]   ;;  %s3045_s12 = inlined_call_operand.vmem [shape: f32[1,128], index: 12, kind: input, shape index: {}, may-alias: {4,6,10,12}]   ;;  %s3046_s13 = inlined_call_operand.vmem [shape: bf16[2,8,128], index: 13, kind: output, shape index: {}]  }
   0x1   :  { %19 = vsyncpa [#allocation5], 0  ;;  %s2699_s25 = smov 0  }
   0x2 LB: > { %s2617_s26 = smov [#allocation2]   ;;  %s2705_s28 = sadd.s32 4294967295, %s2615_s25   ;;  %s2615_s25 = sphi %s2699_s25, %s25_s25  }
   0x3   : > { %s346_s27 = sshll.u32 %s2617_s26, 4  ;;  %p2083_p0 = scmp.ge.s32.totalorder %s2615_s25, 1  ;;  %s347_s27 = int_to_ptr.vmem [resolvable:$true] %s346_s27 }
   0x4   : > { %p334_p1 = scmp.lt.s32.totalorder %s2615_s25, 3  ;;  %p2385_p3 = scmp.eq.s32.totalorder %s2705_s28, 0 }
   0x5   : > { %s2618_s30 = smov [#allocation4]   ;;  %s2560_s16 = scalar_lea.vmem %s347_s27, 3072 }
   0x6   : > { %p2709_p2 = pnand %p2083_p0, %p334_p1  ;;  %s380_s14 = sshll.u32 %s2618_s30, 4  ;;  %s381_s14 = int_to_ptr.vmem [resolvable:$true] %s380_s14 }
   0x7   : > { %p2561_p7 = scmp.ne.s32.totalorder %s347_s27, %s2560_s16  ;;  %p2568_p10 = scmp.lt.s32.totalorder %s347_s27, %s347_s27 }
   0x8   : > { %p2378_p4 = pneg %p2709_p2  ;;  %p2569_p11 = scmp.lt.s32.totalorder %s2560_s16, %s2560_s16 }
   0xa   : > { %p2718_p5 = pnand %p2385_p3, %p2378_p4  ;;  %p2570_p12 = por %p2569_p11, %p2568_p10 }
   0xc   : > { %p2551_p6 = pneg %p2718_p5 }
   0xe   : > { %p2563_p8 = pnand %p2561_p7, %p2551_p6 }
  0x10   : > { %p2564_p9 = pneg %p2563_p8 }
  0x12   : > { %p2571_p13 = pnand %p2570_p12, %p2564_p9 }
  0x14   : > { %2574 = shalt.err (!%p2571_p13)
}
  0x15   : > { %s2619_s17 = smov 192   ;;  %s2620_s18 = smov 12  }
  0x16   : > { %2381 = dma.hbm_to_vmem [thread:$0]  (!%p2718_p5), %s3034_s1, 3072, %s347_s27, [#allocation3], %s2619_s17, %s2619_s17, %s2620_s18  }
  0x17   : > { %s2586_s21 = scalar_lea.vmem %s381_s14, 4096  ;;  %p2594_p7 = scmp.lt.s32.totalorder %s381_s14, %s381_s14 }
  0x18   : > { %p2587_p0 = scmp.ne.s32.totalorder %s381_s14, %s2586_s21  ;;  %p2595_p8 = scmp.lt.s32.totalorder %s2586_s21, %s2586_s21 }
  0x1a   : > { %p2589_p1 = pnand %p2587_p0, %p2551_p6  ;;  %p2596_p10 = por %p2595_p8, %p2594_p7 }
  0x1c   : > { %p2590_p4 = pneg %p2589_p1 }
  0x1e   : > { %p2597_p9 = pnand %p2596_p10, %p2590_p4 }
  0x20   : > { %2600 = shalt.err (!%p2597_p9)
}
  0x21   : > { %s2621_s22 = smov 64   ;;  %s2622_s23 = smov 4  }
  0x22   : > { %2384 = dma.hbm_to_vmem [thread:$0]  (!%p2718_p5), %s3042_s9, 4096, %s381_s14, [#allocation5], %s2621_s22, %s2621_s22, %s2622_s23  }
  0x23   : > { %412 = sbr.rel (%p2709_p2) target bundleno = 2860 (0xb2c), region = 72 }
  0x28   : > { %2606 = dma.done.wait (%p2385_p3), [#allocation3], 3072  }
  0x29   : > { %2608 = vsyncadd (%p2385_p3), [#allocation3], 4294964224 }
  0x2a   : > { %2610 = dma.done.wait (%p2385_p3), [#allocation5], 4096  }
  0x2b   : > { %2612 = vsyncadd (%p2385_p3), [#allocation5], 4294963200  ;;  %v2623_v0 = vmov 0   ;;  %v2624_v1 = vmov 0.0   ;;  %v2409_v2 = vld [vmem:[#allocation2 + $0xac] ss:$12 sps:$4 sm:$0xff]   ;;  %v520_v27 = vlaneseq }
  0x2c   : > { %695 = vmatprep.mubr.bf16.mxu0 %v2623_v0  ;;  %2282 = vmatprep.subr.bf16.mxu1 %v2624_v1  ;;  %v2411_v3 = vld [vmem:[#allocation2 + $0xa8] ss:$12 sps:$4 sm:$0xff]   ;;  %v2414_v5 = vld [vmem:[#allocation2 + $0x90] ss:$12 sps:$4 sm:$0xff]   ;;  %p458_p2 = scmp.lt.s32.totalorder %s2705_s28, 1  ;;  %vm2625_vm0 = vmmov 0  }
  0x2d   : > { %663 = vmatprep.subr.bf16.mxu0 %v2409_v2  ;;  %v2412_v4 = vld [vmem:[#allocation2 + $0x94] ss:$12 sps:$4 sm:$0xff]   ;;  %v2415_v6 = vld [vmem:[#allocation2 + $0x7c] ss:$12 sps:$4 sm:$0xff]   ;;  %v2417_v7 = vld [vmem:[#allocation2 + $0x78] ss:$12 sps:$4 sm:$0xff]   ;;  %2298 = vmatprep.mubr.msk.bf16.mxu1 %vm2625_vm0, %v2624_v1 }
  0x2e   : > { %664 = vmatpush1.bf16.msra.mxu0 %v2411_v3  ;;  %v2418_v8 = vld [vmem:[#allocation2 + $0x64] ss:$12 sps:$4 sm:$0xff]   ;;  %v2420_v9 = vld [vmem:[#allocation2 + $0x60] ss:$12 sps:$4 sm:$0xff]   ;;  %s3050_s28 = smov (!%p458_p2, %s2705_s28), 1  ;;  %v2781_v28 = vshrl.u32 %v520_v27, 7 }
  0x2f   : > { %665 = vmatprep.subr.bf16.mxu0 %v2412_v4  ;;  %v2433_v10 = vld [vmem:[#allocation2 + $0xb0] ss:$12 sps:$4 sm:$0xff]   ;;  %v2421_v11 = vld [vmem:[#allocation2 + $0x4c] ss:$12 sps:$4 sm:$0xff]   ;;  %s2090_s27 = sshll.u32 %s3050_s28, 2  ;;  %vm747_vm1 = vcmask 261120  }
  0x30   : > { %2283 = vmatpush3.bf16.msra.mxu1 %v2433_v10  ;;  %v2434_v12 = vld [vmem:[#allocation2 + $0x98] ss:$12 sps:$4 sm:$0xff]   ;;  %v2423_v13 = vld [vmem:[#allocation2 + $0x48] ss:$12 sps:$4 sm:$0xff]   ;;  %v2426_v15 = vld [vmem:[#allocation2 + $0x30] ss:$12 sps:$4 sm:$0xff]   ;;  %s461_s14 = scalar_lea.vmem %s3033_s0, %s2090_s27  ;;  %s465_s21 = scalar_lea.vmem %s3046_s13, %s2090_s27 }
  0x31   : > { %2284 = vmatprep.subr.bf16.mxu1 %v2624_v1  ;;  %v2424_v14 = vld [vmem:[#allocation2 + $0x34] ss:$12 sps:$4 sm:$0xff]   ;;  %v2427_v17 = vld [vmem:[#allocation2 + $0x1c] ss:$12 sps:$4 sm:$0xff]   ;;  %v2429_v19 = vld [vmem:[#allocation2 + $0x18] ss:$12 sps:$4 sm:$0xff]  }
  0x32   : > { %666 = vmatpush1.bf16.msra.mxu0 %v2414_v5  ;;  %v2435_v16 = vld [vmem:[#allocation2 + $0x80] ss:$12 sps:$4 sm:$0xff]   ;;  %v2436_v18 = vld [vmem:[#allocation2 + $0x68] ss:$12 sps:$4 sm:$0xff]   ;;  %v2430_v20 = vld [vmem:[#allocation2 + $0x4] ss:$12 sps:$4 sm:$0xff]  }
  0x33   : > { %667 = vmatprep.subr.bf16.mxu0 %v2415_v6  ;;  %v2437_v21 = vld [vmem:[#allocation2 + $0x50] ss:$12 sps:$4 sm:$0xff]   ;;  %v2432_v22 = vld [vmem:[#allocation2] ss:$12 sps:$4 sm:$0xff]   ;;  %v2438_v23 = vld [vmem:[#allocation2 + $0x38] ss:$12 sps:$4 sm:$0xff]  }
  0x34   : > { %2285 = vmatpush3.bf16.msra.mxu1 %v2434_v12  ;;  %v2766_v24 = vld [vmem:[%s461_s14] sm:$0xf]  ;;  %v2440_v26 = vld [vmem:[#allocation2 + $0x8] ss:$12 sps:$4 sm:$0xff]   ;;  %v526_v29 = vsub.s32 1, %v2781_v28  ;;  %v522_v30 = vsub.s32 0, %v2781_v28 }
  0x35   : > { %2286 = vmatprep.subr.bf16.mxu1 %v2624_v1  ;;  %v2439_v25 = vld [vmem:[#allocation2 + $0x20] ss:$12 sps:$4 sm:$0xff]   ;;  %s2626_s17 = smov 96   ;;  %s2627_s18 = smov 64   ;;  %v530_v43 = vsub.s32 2, %v2781_v28  ;;  %vm810_vm2 = vcmask 1043456  }
  0x36   : > { %668 = vmatpush1.bf16.msra.mxu0 %v2417_v7  ;;  %v501_v31 = vld [vmem:[%s3035_s2] sm:$0x7]  ;;  %s2628_s19 = smov 32   ;;  %vm794_vm3 = vcmask 64512   ;;  %vm1200_vm4 = vcmask 523264   ;;  %vm1202_vm5 = vcmask 785408  }
  0x37   : > { %669 = vmatprep.subr.bf16.mxu0 %v2418_v8  ;;  %v527_v32 = vrot.slane %v501_v31, %v526_v29  ;;  %v523_v34 = vrot.slane %v501_v31, %v522_v30  ;;  %v531_v44 = vrot.slane %v501_v31, %v530_v43 }
  0x38   : > { %2287 = vmatpush3.bf16.msra.mxu1 %v2435_v16 }
  0x39   : > { %2288 = vmatprep.subr.bf16.mxu1 %v2624_v1 }
  0x3a   : > { %670 = vmatpush1.bf16.msra.mxu0 %v2420_v9 }
  0x3b   : > { %671 = vmatprep.subr.bf16.mxu0 %v2421_v11 }
  0x3c   : > { %2289 = vmatpush3.bf16.msra.mxu1 %v2436_v18 }
  0x3d   : > { %2290 = vmatprep.subr.bf16.mxu1 %v2624_v1 }
  0x3e   : > { %672 = vmatpush1.bf16.msra.mxu0 %v2423_v13 }
  0x3f   : > { %673 = vmatprep.subr.bf16.mxu0 %v2424_v14 }
  0x40   : > { %2291 = vmatpush3.bf16.msra.mxu1 %v2437_v21 }
  0x41   : > { %2292 = vmatprep.subr.bf16.mxu1 %v2624_v1 }
  0x42   : > { %674 = vmatpush1.bf16.msra.mxu0 %v2426_v15 }
  0x43   : > { %675 = vmatprep.subr.bf16.mxu0 %v2427_v17 }
  0x44   : > { %2293 = vmatpush3.bf16.msra.mxu1 %v2438_v23 }
  0x45   : > { %2294 = vmatprep.subr.bf16.mxu1 %v2624_v1 }
  0x46   : > { %676 = vmatpush1.bf16.msra.mxu0 %v2429_v19 }
  0x47   : > { %677 = vmatprep.subr.bf16.mxu0 %v2430_v20 }
  0x48   : > { %2295 = vmatpush3.bf16.msra.mxu1 %v2439_v25 }
  0x49   : > { %2296 = vmatprep.subr.bf16.mxu1 %v2624_v1 }
  0x4a   : > { %678 = vmatpush1.bf16.msra.mxu0 %v2432_v22 }
  0x4b   : > { %2326 = vmatprep.subr.bf16.mxu0 %v2624_v1 }
  0x4c   : > { %2297 = vmatpush3.bf16.msra.mxu1 %v2440_v26 }
  0x4d   : > { %696 = vmatmul.mubr.bf16.vlgmr.msra.gmra.mxu0 %v2766_v24  ;;  %2302 = vmatprep.subr.bf16.mxu1 %v2624_v1 }
  0x4e   : > { %2328 = vmatprep.mubr.msk.bf16.mxu0 %vm2625_vm0, %v2624_v1 }
  0x4f   : > { %2299 = vmatmul.mubr.bf16.vlgmr.msra.gmra.mxu1 %v2766_v24 }
  0x50   : > { %2304 = vmatprep.mubr.msk.bf16.mxu1 %vm2625_vm0, %v2624_v1 }
 0x10d   : > { %v697_v33 = vpop.f32.mrf.mxu0 }
 0x10e   : > { %v698_v38 = vadd.f32 %v697_v33, %v523_v34 }
 0x10f   : > { %v699_v35 = vpop.f32.mrf.mxu0  ;;  %v738_v45 = vpop.f32.mrf.mxu1 }
 0x110   : > { %v700_v36 = vadd.f32 %v699_v35, %v527_v32  ;;  %v744_v42 = vpack.c.bf16 %v698_v38, %v698_v38  ;;  %v739_v46 = vadd.f32 %v738_v45, %v531_v44 }
 0x111   : > { %v701_v37 = vpop.f32.mrf.mxu0  ;;  %v2300_v47 = vpop.f32.mrf.mxu1 }
 0x112   : > { %v745_v39 = vpack.c.bf16 %v700_v36, %v700_v36  ;;  %v2805_v48 = vpack.c.bf16 %v739_v46, %v739_v46 }
 0x113   : > { %v702_v40 = vpop.f32.mrf.mxu0  ;;  %v741_v49 = vpop.f32.mrf.mxu1 }
 0x114   : > { %858 = vrot.lane.b32.xlu1 %v745_v39, %s2626_s17  ;;  %v752_v41 = vsel %vm747_vm1, %v745_v39, 0  ;;  %v812_v50 = vsel %vm810_vm2, %v2805_v48, 0 }
 0x115   : > { %2303 = vmatpush3.bf16.xpose.msra.mxu1 %v752_v41  ;;  %v2301_v51 = vpop.f32.mrf.mxu1 }
 0x116   : > { %2308 = vmatprep.subr.bf16.mxu1 %v2624_v1 }
 0x118   : > { %855 = vrot.lane.b32.xlu1 %v744_v42, %s2626_s17 }
 0x11c   : > { %967 = vrot.lane.b32.xlu1 %v744_v42, %s2627_s18  ;;  %2305 = vmatmul.mubr.msk.bf16.vlgmr.msra.gmra.mxu1 %vm747_vm1, %v744_v42 }
 0x11d   : > { %2310 = vmatprep.mubr.msk.bf16.mxu1 %vm2625_vm0, %v2624_v1  ;;  %2309 = vmatpush3.bf16.msra.mxu1 %v812_v50 }
 0x11e   : > { %2314 = vmatprep.subr.bf16.mxu1 %v2624_v1 }
 0x120   : > { %1079 = vrot.lane.b32.xlu1 %v745_v39, %s2628_s19 }
 0x124   : > { %1077 = vrot.lane.b32.xlu1 %v744_v42, %s2628_s19 }
 0x186   : > { %v859_v62 = vpop.permute.xlu1 %858 }
 0x187   : > { %v864_v11 = vsel %vm747_vm1, %v859_v62, 0 }
 0x18a   : > { %v856_v63 = vpop.permute.xlu1 %855 }
 0x18e   : > { %v968_v3 = vpop.permute.xlu1 %967 }
 0x192   : > { %v1080_v6 = vpop.permute.xlu1 %1079 }
 0x193   : > { %v1085_v7 = vsel %vm747_vm1, %v1080_v6, 0 }
 0x196   : > { %v1078_v12 = vpop.permute.xlu1 %1077 }
 0x1dc   : > { %v788_v52 = vpop.f32.mrf.mxu1 }
 0x1dd   : > { %v795_v53 = vsel %vm794_vm3, %v788_v52, -inf }
 0x1de   : > { %796 = vmax.xlane.f32.xlu0 %v795_v53  ;;  %v2306_v54 = vpop.f32.mrf.mxu1 }
 0x1e0   : > { %v791_v55 = vpop.f32.mrf.mxu1 }
 0x1e2   : > { %v2307_v56 = vpop.f32.mrf.mxu1 }
 0x267   : > { %v797_v57 = vpop.xlane.xlu0 %796 }
 0x268   : > { %v798_v58 = vsub.f32 %v788_v52, %v797_v57 }
 0x26a   : > { %v799_v59 = vmul.f32 1.442695, %v798_v58 }
 0x26c   : > { %2529 = vpow2.f32 %v799_v59 }
 0x279   : > { %v2530_v60 = vpop.eup %2529 }
 0x27a   : > { %v801_v61 = vsel %vm794_vm3, %v2530_v60, 0.0 }
 0x27b   : > { %802 = vadd.xlane.f32.xlu0 %v801_v61 }
 0x291   : > { %969 = vrot.lane.b32.xlu0 %v745_v39, %s2627_s18 }
 0x304   : > { %v803_v2 = vpop.xlane.xlu0 %802 }
 0x305   : > { %2531 = vrcp.f32 %v803_v2 }
 0x308   : > { %v970_v4 = vpop.permute.xlu0 %969 }
 0x309   : > { %v975_v5 = vsel %vm747_vm1, %v970_v4, 0 }
 0x30a   : > { %2327 = vmatpush3.bf16.xpose.msra.mxu0 %v975_v5 }
 0x30b   : > { %2338 = vmatprep.subr.bf16.mxu0 %v2624_v1 }
 0x311   : > { %2329 = vmatmul.mubr.msk.bf16.vlgmr.msra.gmra.mxu0 %vm747_vm1, %v968_v3 }
 0x312   : > { %v2532_v8 = vpop.eup %2531  ;;  %2339 = vmatpush3.bf16.xpose.msra.mxu0 %v1085_v7  ;;  %2340 = vmatprep.mubr.msk.bf16.mxu0 %vm2625_vm0, %v2624_v1 }
 0x313   : > { %v805_v9 = vmul.f32 %v2532_v8, %v2530_v60  ;;  %2350 = vmatprep.subr.bf16.mxu0 %v2624_v1  ;;  %v2441_v8 = vld [vmem:[%s3036_s3 + $0x38] sm:$0xff]  }
 0x315   : > { %v806_v10 = vpack.c.bf16 %v805_v9, %v805_v9  ;;  %v2442_v9 = vld [vmem:[%s3036_s3 + $0x30] sm:$0xff]  }
 0x317   : > { %2311 = vmatmul.mubr.msk.bf16.vlgmr.msra.gmra.mxu1 %vm794_vm3, %v806_v10  ;;  %v2443_v10 = vld [vmem:[%s3036_s3 + $0x28] sm:$0xff]  }
 0x318   : > { %2315 = vmatpush3.bf16.xpose.msra.mxu1 %v864_v11  ;;  %2316 = vmatprep.mubr.msk.bf16.mxu1 %vm2625_vm0, %v2624_v1  ;;  %v2444_v11 = vld [vmem:[%s3036_s3 + $0x20] sm:$0xff]  }
 0x319   : > { %2341 = vmatmul.mubr.msk.bf16.vlgmr.msra.gmra.mxu0 %vm747_vm1, %v1078_v12  ;;  %2320 = vmatprep.subr.bf16.mxu1 %v2624_v1  ;;  %v2445_v12 = vld [vmem:[%s3036_s3 + $0x18] sm:$0xff]  }
 0x31a   : > { %2366 = vmatprep.mubr.msk.bf16.mxu0 %vm2625_vm0, %v2624_v1  ;;  %2351 = vmatpush3.bf16.msra.mxu0 %v2441_v8  ;;  %v2484_v8 = vld [vmem:[%s3040_s7 + $0x4c] ss:$16 sps:$4 sm:$0xff]  }
 0x31b   : > { %2352 = vmatprep.subr.bf16.mxu0 %v2624_v1 }
 0x31e   : > { %2353 = vmatpush3.bf16.msra.mxu0 %v2442_v9  ;;  %v2479_v9 = vld [vmem:[%s3040_s7 + $0x40] ss:$16 sps:$4 sm:$0xff]  }
 0x31f   : > { %2317 = vmatmul.mubr.msk.bf16.vlgmr.msra.gmra.mxu1 %vm747_vm1, %v856_v63  ;;  %2354 = vmatprep.subr.bf16.mxu0 %v2624_v1 }
 0x320   : > { %2322 = vmatprep.mubr.msk.bf16.mxu1 %vm2625_vm0, %v2624_v1 }
 0x322   : > { %2355 = vmatpush3.bf16.msra.mxu0 %v2443_v10  ;;  %v2482_v10 = vld [vmem:[%s3040_s7 + $0x48] ss:$16 sps:$4 sm:$0xff]  }
 0x323   : > { %2356 = vmatprep.subr.bf16.mxu0 %v2624_v1 }
 0x326   : > { %2357 = vmatpush3.bf16.msra.mxu0 %v2444_v11  ;;  %v2487_v11 = vld [vmem:[%s3040_s7 + $0x24] ss:$16 sps:$4 sm:$0xff]  }
 0x327   : > { %2358 = vmatprep.subr.bf16.mxu0 %v2624_v1 }
 0x32a   : > { %2359 = vmatpush3.bf16.msra.mxu0 %v2445_v12  ;;  %v2490_v12 = vld [vmem:[%s3040_s7 + $0x2c] ss:$16 sps:$4 sm:$0xff]  }
 0x32b   : > { %2360 = vmatprep.subr.bf16.mxu0 %v2624_v1 }
 0x3d1   : > { %v1011_v13 = vpop.f32.mrf.mxu0 }
 0x3d2   : > { %v1017_v14 = vsel %vm794_vm3, %v1011_v13, -inf }
 0x3d3   : > { %1018 = vmax.xlane.f32.xlu0 %v1017_v14  ;;  %v2330_v15 = vpop.f32.mrf.mxu0  ;;  %v2447_v14 = vld [vmem:[%s3036_s3 + $0x8] sm:$0xff]  }
 0x3d5   : > { %v1014_v16 = vpop.f32.mrf.mxu0 }
 0x3d7   : > { %v2832_v17 = vpop.f32.mrf.mxu1  ;;  %v2331_v18 = vpop.f32.mrf.mxu0 }
 0x3d8   : > { %v2448_v18 = vld [vmem:[%s3036_s3] sm:$0xff]  }
 0x3d9   : > { %v2312_v19 = vpop.f32.mrf.mxu1  ;;  %v1121_v20 = vpop.f32.mrf.mxu0 }
 0x3da   : > { %v1127_v34 = vsel %vm794_vm3, %v1121_v20, -inf }
 0x3db   : > { %v851_v21 = vpop.f32.mrf.mxu1  ;;  %v2342_v22 = vpop.f32.mrf.mxu0 }
 0x3dd   : > { %v2313_v23 = vpop.f32.mrf.mxu1  ;;  %v1124_v25 = vpop.f32.mrf.mxu0 }
 0x3df   : > { %v900_v26 = vpop.f32.mrf.mxu1  ;;  %v2343_v27 = vpop.f32.mrf.mxu0 }
 0x3e0   : > { %v906_v31 = vsel %vm794_vm3, %v900_v26, -inf }
 0x3e1   : > { %907 = vmax.xlane.f32.xlu1 %v906_v31  ;;  %v2318_v32 = vpop.f32.mrf.mxu1 }
 0x3e3   : > { %v903_v33 = vpop.f32.mrf.mxu1 }
 0x3e5   : > { %1128 = vmax.xlane.f32.xlu1 %v1127_v34  ;;  %v2319_v35 = vpop.f32.mrf.mxu1 }
 0x45c   : > { %v1019_v36 = vpop.xlane.xlu0 %1018 }
 0x45d   : > { %v1020_v37 = vsub.f32 %v1011_v13, %v1019_v36  ;;  %v2446_v13 = vld [vmem:[%s3036_s3 + $0x10] sm:$0xff]  }
 0x45e   : > { %2361 = vmatpush3.bf16.msra.mxu0 %v2446_v13  ;;  %v2485_v13 = vld [vmem:[%s3040_s7 + $0x20] ss:$16 sps:$4 sm:$0xff]  }
 0x45f   : > { %v1021_v38 = vmul.f32 1.442695, %v1020_v37  ;;  %2362 = vmatprep.subr.bf16.mxu0 %v2624_v1 }
 0x461   : > { %2533 = vpow2.f32 %v1021_v38 }
 0x462   : > { %2363 = vmatpush3.bf16.msra.mxu0 %v2447_v14  ;;  %v2488_v14 = vld [vmem:[%s3040_s7 + $0x28] ss:$16 sps:$4 sm:$0xff]  }
 0x463   : > { %2364 = vmatprep.subr.bf16.mxu0 %v2624_v1 }
 0x466   : > { %2365 = vmatpush3.bf16.msra.mxu0 %v2448_v18  ;;  %v2491_v18 = vld [vmem:[%s3040_s7] ss:$16 sps:$4 sm:$0xff]  }
 0x46a   : > { %v908_v39 = vpop.xlane.xlu1 %907 }
 0x46b   : > { %v909_v40 = vsub.f32 %v900_v26, %v908_v39  ;;  %v2124_v39 = vld [vmem:[%s3037_s4] ss:$0 sm:$0xff] }
 0x46d   : > { %v910_v46 = vmul.f32 1.442695, %v909_v40  ;;  %v468_v40 = vunpack.c.l.bf16 %v2766_v24  ;;  %v2454_v24 = vld [vmem:[%s3040_s7 + $0xec] ss:$16 sps:$4 sm:$0xff]  }
 0x46e   : > { %v2534_v41 = vpop.eup %2533  ;;  %v1129_v42 = vpop.xlane.xlu1 %1128  ;;  %1649 = vmatprep.subr.bf16.mxu0 %v2454_v24  ;;  %v2514_v24 = vld [vmem:[#allocation4 + $0xd8] sm:$0xff]  }
 0x46f   : > { %v1130_v44 = vsub.f32 %v1121_v20, %v1129_v42  ;;  %v1023_v45 = vsel %vm794_vm3, %v2534_v41, 0.0 }
 0x470   : > { %1024 = vadd.xlane.f32.xlu0 %v1023_v45 }
 0x471   : > { %v1131_v47 = vmul.f32 1.442695, %v1130_v44 }
 0x473   : > { %2535 = vpow2.f32 %v1131_v47  ;;  %v2449_v47 = vld [vmem:[%s3040_s7 + $0xe0] ss:$16 sps:$4 sm:$0xff]  }
 0x474   : > { %2537 = vpow2.f32 %v910_v46 }
 0x480   : > { %v2536_v49 = vpop.eup %2535 }
 0x481   : > { %v1133_v50 = vsel %vm794_vm3, %v2536_v49, 0.0  ;;  %v2538_v51 = vpop.eup %2537 }
 0x482   : > { %1134 = vadd.xlane.f32.xlu1 %v1133_v50  ;;  %v912_v52 = vsel %vm794_vm3, %v2538_v51, 0.0  ;;  %v2457_v50 = vld [vmem:[%s3040_s7 + $0xc4] ss:$16 sps:$4 sm:$0xff]  }
 0x486   : > { %919 = vrot.lane.b32.xlu0 %v2805_v48, %s2626_s17  ;;  %913 = vadd.xlane.f32.xlu1 %v912_v52  ;;  %v2455_v52 = vld [vmem:[%s3040_s7 + $0xc0] ss:$16 sps:$4 sm:$0xff]  }
 0x497   : > { %1029 = vrot.lane.b32.xlu1 %v2805_v48, %s2627_s18 }
 0x49b   : > { %1139 = vrot.lane.b32.xlu1 %v2805_v48, %s2628_s19 }
 0x4f9   : > { %v1025_v53 = vpop.xlane.xlu0 %1024 }
 0x4fd   : > { %v920_v54 = vpop.permute.xlu0 %919 }
 0x4fe   : > { %v925_v55 = vsel %vm810_vm2, %v920_v54, 0 }
 0x4ff   : > { %2321 = vmatpush3.bf16.msra.mxu1 %v925_v55 }
 0x500   : > { %2332 = vmatprep.subr.bf16.mxu1 %v2624_v1 }
 0x50b   : > { %v1135_v56 = vpop.xlane.xlu1 %1134 }
 0x50f   : > { %v914_v57 = vpop.xlane.xlu1 %913 }
 0x510   : > { %2539 = vrcp.f32 %v914_v57 }
 0x511   : > { %2541 = vrcp.f32 %v1025_v53  ;;  %v2458_v53 = vld [vmem:[%s3040_s7 + $0xc8] ss:$16 sps:$4 sm:$0xff]  }
 0x512   : > { %2543 = vrcp.f32 %v1135_v56 }
 0x513   : > { %v1030_v60 = vpop.permute.xlu1 %1029 }
 0x514   : > { %v1035_v63 = vsel %vm810_vm2, %v1030_v60, 0  ;;  %v2461_v60 = vld [vmem:[%s3040_s7 + $0xa0] ss:$16 sps:$4 sm:$0xff]  }
 0x517   : > { %v1140_v2 = vpop.permute.xlu1 %1139 }
 0x518   : > { %v1145_v5 = vsel %vm810_vm2, %v1140_v2, 0  ;;  %v2472_v2 = vld [vmem:[%s3040_s7 + $0x8c] ss:$16 sps:$4 sm:$0xff]  }
 0x51d   : > { %v2540_v58 = vpop.eup %2539 }
 0x51e   : > { %v916_v59 = vmul.f32 %v2540_v58, %v2538_v51  ;;  %v2542_v62 = vpop.eup %2541  ;;  %v2460_v51 = vld [vmem:[%s3040_s7 + $0xcc] ss:$16 sps:$4 sm:$0xff]   ;;  %v2463_v58 = vld [vmem:[%s3040_s7 + $0xa4] ss:$16 sps:$4 sm:$0xff]  }
 0x51f   : > { %v1027_v48 = vmul.f32 %v2542_v62, %v2534_v41  ;;  %v2544_v4 = vpop.eup %2543  ;;  %v2467_v62 = vld [vmem:[%s3040_s7 + $0x80] ss:$16 sps:$4 sm:$0xff]  }
 0x520   : > { %v917_v61 = vpack.c.bf16 %v916_v59, %v916_v59  ;;  %v1137_v6 = vmul.f32 %v2544_v4, %v2536_v49  ;;  %v2452_v49 = vld [vmem:[%s3040_s7 + $0xe8] ss:$16 sps:$4 sm:$0xff]   ;;  %v2466_v59 = vld [vmem:[%s3040_s7 + $0xac] ss:$16 sps:$4 sm:$0xff]  }
 0x521   : > { %v1028_v3 = vpack.c.bf16 %v1027_v48, %v1027_v48  ;;  %v2470_v48 = vld [vmem:[%s3040_s7 + $0x88] ss:$16 sps:$4 sm:$0xff]   ;;  %v2478_v4 = vld [vmem:[%s3040_s7 + $0x6c] ss:$16 sps:$4 sm:$0xff]  }
 0x522   : > { %2323 = vmatmul.mubr.msk.bf16.vlgmr.msra.gmra.mxu1 %vm794_vm3, %v917_v61  ;;  %v1138_v7 = vpack.c.bf16 %v1137_v6, %v1137_v6  ;;  %v2464_v61 = vld [vmem:[%s3040_s7 + $0xa8] ss:$16 sps:$4 sm:$0xff]  }
 0x523   : > { %2333 = vmatpush3.bf16.msra.mxu1 %v1035_v63  ;;  %2334 = vmatprep.mubr.msk.bf16.mxu1 %vm2625_vm0, %v2624_v1  ;;  %v2469_v63 = vld [vmem:[%s3040_s7 + $0x84] ss:$16 sps:$4 sm:$0xff]   ;;  %v2476_v6 = vld [vmem:[%s3040_s7 + $0x68] ss:$16 sps:$4 sm:$0xff]  }
 0x524   : > { %2344 = vmatprep.subr.bf16.mxu1 %v2624_v1 }
 0x52a   : > { %2335 = vmatmul.mubr.msk.bf16.vlgmr.msra.gmra.mxu1 %vm794_vm3, %v1028_v3  ;;  %v2475_v3 = vld [vmem:[%s3040_s7 + $0x64] ss:$16 sps:$4 sm:$0xff]  }
 0x52b   : > { %2345 = vmatpush3.bf16.msra.mxu1 %v1145_v5  ;;  %2346 = vmatprep.mubr.msk.bf16.mxu1 %vm2625_vm0, %v2624_v1  ;;  %v2473_v5 = vld [vmem:[%s3040_s7 + $0x60] ss:$16 sps:$4 sm:$0xff]  }
 0x532   : > { %2347 = vmatmul.mubr.msk.bf16.vlgmr.msra.gmra.mxu1 %vm794_vm3, %v1138_v7  ;;  %v2481_v7 = vld [vmem:[%s3040_s7 + $0x44] ss:$16 sps:$4 sm:$0xff]  }
 0x533   : > { %1640 = vmatprep.mubr.bf16.mxu1 %v2623_v0 }
 0x5e2   : > { %v961_v15 = vpop.f32.mrf.mxu1 }
 0x5e3   : > { %1188 = vrot.lane.b32.xlu0 %v961_v15, %s2628_s19  ;;  %v2493_v15 = vld [vmem:[%s3040_s7 + $0x4] ss:$16 sps:$4 sm:$0xff]  }
 0x5e4   : > { %v2324_v16 = vpop.f32.mrf.mxu1 }
 0x5e5   : > { %v2496_v16 = vld [vmem:[%s3040_s7 + $0xc] ss:$16 sps:$4 sm:$0xff]  }
 0x5e6   : > { %v964_v19 = vpop.f32.mrf.mxu1 }
 0x5e7   : > { %v2494_v19 = vld [vmem:[%s3040_s7 + $0x8] ss:$16 sps:$4 sm:$0xff]  }
 0x5e8   : > { %v2325_v20 = vpop.f32.mrf.mxu1 }
 0x5e9   : > { %v2497_v20 = vld [vmem:[#allocation4 + $0x78] sm:$0xff]  }
 0x5ea   : > { %v1071_v21 = vpop.f32.mrf.mxu1 }
 0x5eb   : > { %1192 = vrot.lane.b32.xlu1 %v1071_v21, %s2627_s18  ;;  %v2498_v21 = vld [vmem:[#allocation4 + $0xf8] sm:$0xff]  }
 0x5ec   : > { %v2336_v22 = vpop.f32.mrf.mxu1 }
 0x5ee   : > { %v1074_v23 = vpop.f32.mrf.mxu1 }
 0x5f0   : > { %v2337_v25 = vpop.f32.mrf.mxu1 }
 0x5f2   : > { %v1181_v26 = vpop.f32.mrf.mxu1 }
 0x5f3   : > { %1196 = vrot.lane.b32.xlu0 %v1181_v26, %s2626_s17 }
 0x5f4   : > { %v2348_v27 = vpop.f32.mrf.mxu1 }
 0x5f5   : > { %v2133_v27 = vld [vmem:[%s3038_s5] ss:$0 sm:$0xff] }
 0x5f6   : > { %v1184_v31 = vpop.f32.mrf.mxu1 }
 0x5f8   : > { %v2349_v32 = vpop.f32.mrf.mxu1 }
 0x5f9   : > { %v2134_v32 = vld [vmem:[%s3039_s6] ss:$0 sm:$0xff] }
 0x655   : > { %v1189_v1 = vpop.permute.xlu0 %1188 }
 0x656   : > { %v1199_v34 = vsel %vm747_vm1, %v2832_v17, %v1189_v1 }
 0x65d   : > { %v1193_v33 = vpop.permute.xlu1 %1192 }
 0x65e   : > { %v1201_v35 = vsel %vm1200_vm4, %v1199_v34, %v1193_v33  ;;  %v2499_v34 = vld [vmem:[#allocation4 + $0x38] sm:$0xff]  }
 0x665   : > { %v1197_v36 = vpop.permute.xlu0 %1196 }
 0x666   : > { %v1203_v37 = vsel %vm1202_vm5, %v1201_v35, %v1197_v36  ;;  %v2500_v35 = vld [vmem:[#allocation4 + $0xb8] sm:$0xff]  }
 0x667   : > { %v1204_v38 = vpack.c.bf16 %v1203_v37, %v1203_v37  ;;  %v2501_v37 = vld [vmem:[#allocation4 + $0x70] sm:$0xff]  }
 0x669   : > { %2367 = vmatmul.mubr.bf16.vlgmr.msra.gmra.mxu0 %v1204_v38  ;;  %v2502_v38 = vld [vmem:[#allocation4 + $0xf0] sm:$0xff]  }
 0x66a   : > { %1681 = vmatprep.mubr.bf16.mxu0 %v2623_v0  ;;  %v2451_v0 = vld [vmem:[%s3040_s7 + $0xe4] ss:$16 sps:$4 sm:$0xff]   ;;  %1650 = vmatpush1.bf16.msra.mxu0 %v2452_v49  ;;  %v2513_v49 = vld [vmem:[#allocation4 + $0x58] sm:$0xff]  }
 0x66b   : > { %1608 = vmatprep.subr.bf16.mxu1 %v2451_v0  ;;  %1651 = vmatprep.subr.bf16.mxu0 %v2460_v51  ;;  %v2512_v0 = vld [vmem:[#allocation4 + $0xa0] sm:$0xff]   ;;  %v2516_v51 = vld [vmem:[#allocation4 + $0x98] sm:$0xff]  }
 0x66c   : > { %1609 = vmatpush1.bf16.msra.mxu1 %v2449_v47  ;;  %v2511_v47 = vld [vmem:[#allocation4 + $0x20] sm:$0xff]  }
 0x66d   : > { %1610 = vmatprep.subr.bf16.mxu1 %v2457_v50  ;;  %v2515_v50 = vld [vmem:[#allocation4 + $0x18] sm:$0xff]  }
 0x66e   : > { %1652 = vmatpush1.bf16.msra.mxu0 %v2458_v53  ;;  %v2518_v53 = vld [vmem:[#allocation4 + $0xd0] sm:$0xff]  }
 0x66f   : > { %1653 = vmatprep.subr.bf16.mxu0 %v2466_v59  ;;  %v2524_v59 = vld [vmem:[#allocation4 + $0x88] sm:$0xff]  }
 0x670   : > { %1611 = vmatpush1.bf16.msra.mxu1 %v2455_v52  ;;  %v2517_v52 = vld [vmem:[#allocation4 + $0x50] sm:$0xff]  }
 0x671   : > { %1612 = vmatprep.subr.bf16.mxu1 %v2463_v58  ;;  %v2523_v58 = vld [vmem:[#allocation4 + $0x8] sm:$0xff]  }
 0x672   : > { %1654 = vmatpush1.bf16.msra.mxu0 %v2464_v61  ;;  %v2526_v61 = vld [vmem:[#allocation4 + $0xc0] sm:$0xff]  }
 0x673   : > { %1655 = vmatprep.subr.bf16.mxu0 %v2472_v2  ;;  %v1442_v2 = vsub.s32 3, %v2781_v28 }
 0x674   : > { %1613 = vmatpush1.bf16.msra.mxu1 %v2461_v60  ;;  %v2525_v60 = vld [vmem:[#allocation4 + $0x40] sm:$0xff]  }
 0x675   : > { %1614 = vmatprep.subr.bf16.mxu1 %v2469_v63  ;;  %v2528_v63 = vld [vmem:[#allocation4 + $0x80] sm:$0xff]  }
 0x676   : > { %1656 = vmatpush1.bf16.msra.mxu0 %v2470_v48  ;;  %v1360_v48 = vld [vmem:[%s3041_s8] sm:$0xf] }
 0x677   : > { %1657 = vmatprep.subr.bf16.mxu0 %v2478_v4  ;;  %v1439_v4 = vrot.slane %v1360_v48, %v530_v43 }
 0x678   : > { %1615 = vmatpush1.bf16.msra.mxu1 %v2467_v62  ;;  %v2527_v62 = vld [vmem:[#allocation4] sm:$0xff]  }
 0x679   : > { %1616 = vmatprep.subr.bf16.mxu1 %v2475_v3  ;;  %v1431_v3 = vrot.slane %v1360_v48, %v522_v30 }
 0x67a   : > { %1658 = vmatpush1.bf16.msra.mxu0 %v2476_v6  ;;  %v1443_v6 = vrot.slane %v1360_v48, %v1442_v2 }
 0x67b   : > { %1659 = vmatprep.subr.bf16.mxu0 %v2484_v8 }
 0x67c   : > { %1617 = vmatpush1.bf16.msra.mxu1 %v2473_v5  ;;  %v1435_v5 = vrot.slane %v1360_v48, %v526_v29 }
 0x67d   : > { %1618 = vmatprep.subr.bf16.mxu1 %v2481_v7 }
 0x67e   : > { %1660 = vmatpush1.bf16.msra.mxu0 %v2482_v10 }
 0x67f   : > { %1661 = vmatprep.subr.bf16.mxu0 %v2490_v12 }
 0x680   : > { %1619 = vmatpush1.bf16.msra.mxu1 %v2479_v9 }
 0x681   : > { %1620 = vmatprep.subr.bf16.mxu1 %v2487_v11 }
 0x682   : > { %1662 = vmatpush1.bf16.msra.mxu0 %v2488_v14 }
 0x683   : > { %1663 = vmatprep.subr.bf16.mxu0 %v2496_v16 }
 0x684   : > { %1621 = vmatpush1.bf16.msra.mxu1 %v2485_v13 }
 0x685   : > { %1622 = vmatprep.subr.bf16.mxu1 %v2493_v15 }
 0x686   : > { %1664 = vmatpush1.bf16.msra.mxu0 %v2494_v19 }
 0x687   : > { %2260 = vmatprep.subr.bf16.mxu0 %v2498_v21 }
 0x688   : > { %1623 = vmatpush1.bf16.msra.mxu1 %v2491_v18 }
 0x689   : > { %2238 = vmatprep.subr.bf16.mxu1 %v2497_v20 }
 0x729   : > { %v1293_v41 = vpop.f32.mrf.mxu0 }
 0x72a   : > { %v1294_v42 = vadd.f32 %v2124_v39, %v1293_v41  ;;  %v2503_v39 = vld [vmem:[#allocation4 + $0x30] sm:$0xff]   ;;  %v2505_v41 = vld [vmem:[#allocation4 + $0x68] sm:$0xff]  }
 0x72b   : > { %v2368_v44 = vpop.f32.mrf.mxu0 }
 0x72c   : > { %v1299_v45 = vadd.f32 %v1294_v42, %v468_v40  ;;  %v2504_v40 = vld [vmem:[#allocation4 + $0xb0] sm:$0xff]   ;;  %v2506_v42 = vld [vmem:[#allocation4 + $0xe8] sm:$0xff]  }
 0x72d   : > { %v1296_v46 = vpop.f32.mrf.mxu0  ;;  %v2507_v44 = vld [vmem:[#allocation4 + $0x28] sm:$0xff]  }
 0x72e   : > { %1302 = vadd.xlane.f32.xlu1 %v1299_v45  ;;  %v2509_v46 = vld [vmem:[#allocation4 + $0x60] sm:$0xff]  }
 0x72f   : > { %v2369_v17 = vpop.f32.mrf.mxu0 }
 0x730   : > { %v2510_v17 = vld [vmem:[#allocation4 + $0xe0] sm:$0xff]  }
 0x7b7   : > { %v1303_v54 = vpop.xlane.xlu1 %1302 }
 0x7b8   : > { %v1305_v55 = vmul.f32 0.0078125, %v1303_v54  ;;  %v2519_v54 = vld [vmem:[#allocation4 + $0x10] sm:$0xff]  }
 0x7ba   : > { %v1306_v56 = vsub.f32 %v1299_v45, %v1305_v55  ;;  %v2508_v45 = vld [vmem:[#allocation4 + $0xa8] sm:$0xff]   ;;  %v2520_v55 = vld [vmem:[#allocation4 + $0x90] sm:$0xff]  }
 0x7bc   : > { %v1307_v57 = vmul.f32 %v1306_v56, %v1306_v56 }
 0x7be   : > { %1308 = vadd.xlane.f32.xlu0 %v1307_v57  ;;  %v2522_v57 = vld [vmem:[#allocation4 + $0xc8] sm:$0xff]  }
 0x847   : > { %v1309_v22 = vpop.xlane.xlu0 %1308 }
 0x848   : > { %v1310_v23 = vmul.f32 0.0078125, %v1309_v22 }
 0x84a   : > { %v1311_v25 = vadd.f32 1e-05, %v1310_v23 }
 0x84c   : > { %2545 = vrsqrt.f32 %v1311_v25 }
 0x859   : > { %v2546_v26 = vpop.eup %2545 }
 0x85a   : > { %v1313_v31 = vmul.f32 %v2546_v26, %v1306_v56  ;;  %v2521_v56 = vld [vmem:[#allocation4 + $0x48] sm:$0xff]  }
 0x85c   : > { %v1320_v1 = vmul.f32 %v2133_v27, %v1313_v31  ;;  %v2167_v27 = vld [vmem:[%s3043_s10] ss:$0 sm:$0xff] }
 0x85e   : > { %v3001_v33 = vadd.f32 %v2134_v32, %v1320_v1 }
 0x860   : > { %v1426_v36 = vpack.c.bf16 %v3001_v33, %v3001_v33 }
 0x862   : > { %1641 = vmatmul.mubr.bf16.vlgmr.msra.gmra.mxu1 %v1426_v36  ;;  %1682 = vmatmul.mubr.bf16.vlgmr.msra.gmra.mxu0 %v1426_v36 }
 0x863   : > { %2239 = vmatpush3.bf16.msra.mxu1 %v2499_v34  ;;  %2261 = vmatpush3.bf16.msra.mxu0 %v2500_v35 }
 0x864   : > { %2240 = vmatprep.subr.bf16.mxu1 %v2501_v37  ;;  %2262 = vmatprep.subr.bf16.mxu0 %v2502_v38 }
 0x867   : > { %2241 = vmatpush3.bf16.msra.mxu1 %v2503_v39  ;;  %2263 = vmatpush3.bf16.msra.mxu0 %v2504_v40 }
 0x868   : > { %2242 = vmatprep.subr.bf16.mxu1 %v2505_v41  ;;  %2264 = vmatprep.subr.bf16.mxu0 %v2506_v42 }
 0x86b   : > { %2243 = vmatpush3.bf16.msra.mxu1 %v2507_v44  ;;  %2265 = vmatpush3.bf16.msra.mxu0 %v2508_v45 }
 0x86c   : > { %2244 = vmatprep.subr.bf16.mxu1 %v2509_v46  ;;  %2266 = vmatprep.subr.bf16.mxu0 %v2510_v17 }
 0x86f   : > { %2245 = vmatpush3.bf16.msra.mxu1 %v2511_v47  ;;  %2267 = vmatpush3.bf16.msra.mxu0 %v2512_v0 }
 0x870   : > { %2246 = vmatprep.subr.bf16.mxu1 %v2513_v49  ;;  %2268 = vmatprep.subr.bf16.mxu0 %v2514_v24  ;;  %v2200_v24 = vld [vmem:[%s3044_s11] ss:$0 sm:$0xff] }
 0x873   : > { %2247 = vmatpush3.bf16.msra.mxu1 %v2515_v50  ;;  %2269 = vmatpush3.bf16.msra.mxu0 %v2516_v51 }
 0x874   : > { %2248 = vmatprep.subr.bf16.mxu1 %v2517_v52  ;;  %2270 = vmatprep.subr.bf16.mxu0 %v2518_v53 }
 0x877   : > { %2249 = vmatpush3.bf16.msra.mxu1 %v2519_v54  ;;  %2271 = vmatpush3.bf16.msra.mxu0 %v2520_v55 }
 0x878   : > { %2250 = vmatprep.subr.bf16.mxu1 %v2521_v56  ;;  %2272 = vmatprep.subr.bf16.mxu0 %v2522_v57 }
 0x87b   : > { %2251 = vmatpush3.bf16.msra.mxu1 %v2523_v58  ;;  %2273 = vmatpush3.bf16.msra.mxu0 %v2524_v59 }
 0x87c   : > { %2252 = vmatprep.subr.bf16.mxu1 %v2525_v60  ;;  %2274 = vmatprep.subr.bf16.mxu0 %v2526_v61 }
 0x87f   : > { %2253 = vmatpush3.bf16.msra.mxu1 %v2527_v62  ;;  %2275 = vmatpush3.bf16.msra.mxu0 %v2528_v63 }
 0x922   : > { %v1642_v7 = vpop.f32.mrf.mxu1  ;;  %v1683_v8 = vpop.f32.mrf.mxu0 }
 0x923   : > { %v1643_v9 = vadd.f32 %v1642_v7, %v1431_v3  ;;  %v1684_v10 = vadd.f32 %v1683_v8, %v1439_v4 }
 0x924   : > { %v1644_v11 = vpop.f32.mrf.mxu1  ;;  %v1685_v12 = vpop.f32.mrf.mxu0 }
 0x925   : > { %v1645_v13 = vadd.f32 %v1644_v11, %v1435_v5  ;;  %v1686_v14 = vadd.f32 %v1685_v12, %v1443_v6  ;;  %v1690_v15 = vmax.f32 %v1643_v9, 0.0  ;;  %v1692_v16 = vmax.f32 %v1684_v10, 0.0 }
 0x926   : > { %v1646_v18 = vpop.f32.mrf.mxu1  ;;  %v1687_v19 = vpop.f32.mrf.mxu0 }
 0x927   : > { %v1691_v30 = vmax.f32 %v1645_v13, 0.0  ;;  %v1693_v20 = vmax.f32 %v1686_v14, 0.0  ;;  %v1694_v29 = vpack.c.bf16 %v1690_v15, %v1690_v15  ;;  %v1696_v23 = vpack.c.bf16 %v1692_v16, %v1692_v16 }
 0x928   : > { %v1647_v21 = vpop.f32.mrf.mxu1  ;;  %v1688_v43 = vpop.f32.mrf.mxu0 }
 0x929   : > { %v1695_v22 = vpack.c.bf16 %v1691_v30, %v1691_v30  ;;  %v1697_v28 = vpack.c.bf16 %v1693_v20, %v1693_v20 }
 0x92b   : > { %1928 = vmatprep.mubr.bf16.mxu1 %v1695_v22  ;;  %1968 = vmatprep.mubr.bf16.mxu0 %v1697_v28 }
 0x92c   : > { %1929 = vmatmul.mubr.bf16.vlgmr.msra.gmra.mxu1 %v1694_v29  ;;  %1969 = vmatmul.mubr.bf16.vlgmr.msra.gmra.mxu0 %v1696_v23 }
 0x9ec   : > { %v2254_v25 = vpop.f32.mrf.mxu1  ;;  %v2276_v26 = vpop.f32.mrf.mxu0 }
 0x9ee   : > { %v2255_v31 = vpop.f32.mrf.mxu1  ;;  %v2277_v32 = vpop.f32.mrf.mxu0 }
 0x9ef   : > { %v2256_v1 = vadd.f32 %v2255_v31, %v2254_v25  ;;  %v2278_v37 = vadd.f32 %v2277_v32, %v2276_v26 }
 0x9f0   : > { %v2257_v34 = vpop.f32.mrf.mxu1  ;;  %v2279_v35 = vpop.f32.mrf.mxu0 }
 0x9f1   : > { %v1931_v36 = vadd.f32 %v2256_v1, %v2167_v27 }
 0x9f2   : > { %v2258_v38 = vpop.f32.mrf.mxu1  ;;  %v2280_v39 = vpop.f32.mrf.mxu0 }
 0x9f3   : > { %v1971_v40 = vadd.f32 %v2278_v37, %v1931_v36 }
 0x9f5   : > { %v1976_v41 = vadd.f32 %v1971_v40, %v3001_v33  ;;  %v2201_v33 = vld [vmem:[%s3045_s12] ss:$0 sm:$0xff] }
 0x9f7   : > { %1979 = vadd.xlane.f32.xlu0 %v1976_v41 }
 0xa80   : > { %v1980_v42 = vpop.xlane.xlu0 %1979 }
 0xa81   : > { %v1981_v44 = vmul.f32 0.0078125, %v1980_v42 }
 0xa83   : > { %v1982_v45 = vsub.f32 %v1976_v41, %v1981_v44 }
 0xa85   : > { %v1983_v46 = vmul.f32 %v1982_v45, %v1982_v45 }
 0xa87   : > { %1984 = vadd.xlane.f32.xlu1 %v1983_v46 }
 0xb10   : > { %v1985_v17 = vpop.xlane.xlu1 %1984 }
 0xb11   : > { %v1986_v47 = vmul.f32 0.0078125, %v1985_v17 }
 0xb13   : > { %v1987_v0 = vadd.f32 1e-05, %v1986_v47 }
 0xb15   : > { %2547 = vrsqrt.f32 %v1987_v0 }
 0xb22   : > { %v2548_v49 = vpop.eup %2547 }
 0xb23   : > { %v1989_v50 = vmul.f32 %v2548_v49, %v1982_v45 }
 0xb25   : > { %v1996_v51 = vmul.f32 %v2200_v24, %v1989_v50 }
 0xb27   : > { %v2003_v52 = vadd.f32 %v2201_v33, %v1996_v51 }
 0xb29   : > { %v2004_v53 = vpack.c.bf16 %v2003_v52, %v2003_v52 }
 0xb2b   : > { %2005 = vst [vmem:[%s465_s21] sm:$0xf] %v2004_v53 }
 0xb2c PF: > { %s25_s25 = sadd.s32 1, %s2615_s25  }
 0xb2d   : > { %p22_p3 = scmp.ge.s32.totalorder %s25_s25, 4  }
 0xb2f   :  { %24 = sbr.rel (!%p22_p3) target bundleno = 2 (0x2), region = 111 }
 0xb34   :  { %2025 = vsyncpa [#allocation3], 1 }
 0xb35   :  { %2027 = vsyncpa [#allocation3 + $0x1], 1 }
 0xb36   :  { %2028 = vsyncpa [#allocation5], 1 }

// kernel: _lambda_.6
= control target key start
LH: loop header
LB: loop body
LE: loop exit
PB: predicated region body
PF: predicated region fallthrough
CT: control target
= control target key end

     0   :  { %s4776_s0 = inlined_call_operand.vmem [shape: bf16[2,8,128], index: 0, kind: input, shape index: {}]   ;;  %s4777_s1 = inlined_call_operand.vmem [shape: bf16[2,8,128], index: 1, kind: input, shape index: {}]   ;;  %s4778_s2 = inlined_call_operand.vmem [shape: bf16[128,384], index: 2, kind: input, shape index: {}]   ;;  %s4779_s3 = inlined_call_operand.vmem [shape: f32[1,384], index: 3, kind: input, shape index: {}]   ;;  %s4780_s4 = inlined_call_operand.vmem [shape: bf16[128,128], index: 4, kind: input, shape index: {}]   ;;  %s4781_s5 = inlined_call_operand.vmem [shape: f32[1,128], index: 5, kind: input, shape index: {}, may-alias: {5,7,9,13,15,19,21}]   ;;  %s4782_s6 = inlined_call_operand.vmem [shape: f32[1,128], index: 6, kind: input, shape index: {}, may-alias: {6,14,20}]   ;;  %s4783_s7 = inlined_call_operand.vmem [shape: f32[1,128], index: 7, kind: input, shape index: {}, may-alias: {5,7,9,13,15,19,21}]   ;;  %s4784_s8 = inlined_call_operand.hbm [shape: bf16[128,128], index: 8, kind: input, shape index: {}]   ;;  %s4785_s9 = inlined_call_operand.vmem [shape: f32[1,128], index: 9, kind: input, shape index: {}, may-alias: {5,7,9,13,15,19,21}]   ;;  %s4786_s10 = inlined_call_operand.vmem [shape: bf16[128,256], index: 10, kind: input, shape index: {}]   ;;  %s4787_s11 = inlined_call_operand.vmem [shape: f32[1,256], index: 11, kind: input, shape index: {}]   ;;  %s4788_s12 = inlined_call_operand.hbm [shape: bf16[128,128], index: 12, kind: input, shape index: {}]   ;;  %s4789_s13 = inlined_call_operand.vmem [shape: f32[1,128], index: 13, kind: input, shape index: {}, may-alias: {5,7,9,13,15,19,21}]   ;;  %s4790_s14 = inlined_call_operand.vmem [shape: f32[1,128], index: 14, kind: input, shape index: {}, may-alias: {6,14,20}]   ;;  %s4791_s15 = inlined_call_operand.vmem [shape: f32[1,128], index: 15, kind: input, shape index: {}, may-alias: {5,7,9,13,15,19,21}]   ;;  %s4792_s16 = inlined_call_operand.vmem [shape: bf16[128,512], index: 16, kind: input, shape index: {}]   ;;  %s4793_s17 = inlined_call_operand.vmem [shape: f32[1,512], index: 17, kind: input, shape index: {}]   ;;  %s4794_s18 = inlined_call_operand.vmem [shape: bf16[512,128], index: 18, kind: input, shape index: {}]   ;;  %s4795_s19 = inlined_call_operand.vmem [shape: f32[1,128], index: 19, kind: input, shape index: {}, may-alias: {5,7,9,13,15,19,21}]   ;;  %s4796_s20 = inlined_call_operand.vmem [shape: f32[1,128], index: 20, kind: input, shape index: {}, may-alias: {6,14,20}]   ;;  %s4797_s21 = inlined_call_operand.vmem [shape: f32[1,128], index: 21, kind: input, shape index: {}, may-alias: {5,7,9,13,15,19,21}]   ;;  %s4798_s22 = inlined_call_operand.vmem [shape: bf16[2,8,128], index: 22, kind: output, shape index: {}]  }
   0x1   :  { %4805 = sst [smem:[#allocation8_spill]] %s4776_s0 }
   0x2   :  { %4806 = sst [smem:[#allocation9_spill]] %s4777_s1 }
   0x3   :  { %4807 = sst [smem:[#allocation10_spill]] %s4778_s2 }
   0x4   :  { %4808 = sst [smem:[#allocation11_spill]] %s4779_s3 }
   0x5   :  { %4809 = sst [smem:[#allocation12_spill]] %s4780_s4 }
   0x6   :  { %4810 = sst [smem:[#allocation13_spill]] %s4781_s5 }
   0x7   :  { %4811 = sst [smem:[#allocation14_spill]] %s4782_s6 }
   0x8   :  { %27 = vsyncpa [#allocation3], 0 }
   0x9   :  { %28 = vsyncpa [#allocation5], 0  ;;  %s4100_s3 = smov 0  }
   0xa LB: > { %s4106_s28 = sadd.s32 4294967295, %s3973_s3   ;;  %p3218_p0 = scmp.ge.s32.totalorder %s3973_s3, 1  ;;  %s3973_s3 = sphi %s4100_s3, %s34_s3  }
   0xb   : > { %p537_p1 = scmp.lt.s32.totalorder %s3973_s3, 3  ;;  %s3975_s29 = smov [#allocation2]  }
   0xc   : > { %s567_s30 = sshll.u32 %s3975_s29, 4  ;;  %p3687_p3 = scmp.eq.s32.totalorder %s4106_s28, 0  ;;  %s568_s30 = int_to_ptr.vmem [resolvable:$true] %s567_s30 }
   0xd   : > { %p4110_p2 = pnand %p3218_p0, %p537_p1  ;;  %s3976_s0 = smov [#allocation4]  }
   0xe   : > { %s589_s23 = sshll.u32 %s3976_s0, 4  ;;  %s3918_s5 = scalar_lea.vmem %s568_s30, 1024  ;;  %s590_s23 = int_to_ptr.vmem [resolvable:$true] %s589_s23 }
   0xf   : > { %p3680_p4 = pneg %p4110_p2  ;;  %p3919_p7 = scmp.ne.s32.totalorder %s568_s30, %s3918_s5 }
  0x10   : > { %p3926_p10 = scmp.lt.s32.totalorder %s568_s30, %s568_s30  ;;  %p3927_p11 = scmp.lt.s32.totalorder %s3918_s5, %s3918_s5 }
  0x11   : > { %p4119_p5 = pnand %p3687_p3, %p3680_p4 }
  0x12   : > { %p3928_p12 = por %p3927_p11, %p3926_p10 }
  0x13   : > { %p3909_p6 = pneg %p4119_p5 }
  0x15   : > { %p3921_p8 = pnand %p3919_p7, %p3909_p6 }
  0x17   : > { %p3922_p9 = pneg %p3921_p8 }
  0x19   : > { %p3929_p13 = pnand %p3928_p12, %p3922_p9 }
  0x1b   : > { %3932 = shalt.err (!%p3929_p13)
}
  0x1c   : > { %s3977_s24 = smov 64   ;;  %s3978_s6 = smov 4  }
  0x1d   : > { %3683 = dma.hbm_to_vmem [thread:$0]  (!%p4119_p5), %s4784_s8, 1024, %s568_s30, [#allocation3], %s3977_s24, %s3977_s24, %s3978_s6  }
  0x1e   : > { %s3944_s2 = scalar_lea.vmem %s590_s23, 1024  ;;  %p3952_p7 = scmp.lt.s32.totalorder %s590_s23, %s590_s23 }
  0x1f   : > { %p3945_p0 = scmp.ne.s32.totalorder %s590_s23, %s3944_s2  ;;  %p3953_p8 = scmp.lt.s32.totalorder %s3944_s2, %s3944_s2 }
  0x21   : > { %p3947_p1 = pnand %p3945_p0, %p3909_p6  ;;  %p3954_p10 = por %p3953_p8, %p3952_p7 }
  0x23   : > { %p3948_p4 = pneg %p3947_p1 }
  0x25   : > { %p3955_p9 = pnand %p3954_p10, %p3948_p4 }
  0x27   : > { %3958 = shalt.err (!%p3955_p9)
}
  0x28   : > { %3686 = dma.hbm_to_vmem [thread:$0]  (!%p4119_p5), %s4788_s12, 1024, %s590_s23, [#allocation5], %s3977_s24, %s3977_s24, %s3978_s6  }
  0x29   : > { %646 = sbr.rel (%p4110_p2) target bundleno = 4928 (0x1340), region = 108 }
  0x2e   : > { %3964 = dma.done.wait (%p3687_p3), [#allocation3], 1024  }
  0x2f   : > { %3966 = vsyncadd (%p3687_p3), [#allocation3], 4294966272 }
  0x30   : > { %3968 = dma.done.wait (%p3687_p3), [#allocation5], 1024  }
  0x31   : > { %3970 = vsyncadd (%p3687_p3), [#allocation5], 4294966272  ;;  %v3979_v0 = vmov 0   ;;  %v3980_v1 = vmov 0.0   ;;  %s4814_s0 = sld [smem:[#allocation10_spill]]  ;;  %p714_p2 = scmp.lt.s32.totalorder %s4106_s28, 1  ;;  %v730_v27 = vlaneseq }
  0x32   : > { %962 = vmatprep.mubr.bf16.mxu0 %v3979_v0  ;;  %3496 = vmatprep.subr.bf16.mxu1 %v3980_v1  ;;  %s4815_s26 = sld [smem:[#allocation8_spill]]  ;;  %vm3981_vm0 = vmmov 0   ;;  %vm1014_vm1 = vcmask 261120   ;;  %s3982_s25 = smov 96   ;;  %vm1077_vm2 = vcmask 1043456   ;;  %vm1061_vm4 = vcmask 64512  }
  0x33   : > { %s4824_s28 = smov (!%p714_p2, %s4106_s28), 1  ;;  %3512 = vmatprep.mubr.msk.bf16.mxu1 %vm3981_vm0, %v3980_v1  ;;  %v4252_v28 = vshrl.u32 %v730_v27, 7  ;;  %s4816_s6 = sld [smem:[#allocation11_spill]]  ;;  %v733_v52 = vand.u32 127, %v730_v27  ;;  %vm1467_vm5 = vcmask 523264   ;;  %vm1469_vm6 = vcmask 785408  }
  0x34   : > { %s4188_s27 = sshll.u32 %s4824_s28, 2  ;;  %s4817_s4 = sld [smem:[#allocation12_spill]] }
  0x35   : > { %v4255_v29 = vsub.s32 1, %v4252_v28  ;;  %v4258_v30 = vsub.s32 0, %v4252_v28  ;;  %v797_v43 = vsub.s32 2, %v4252_v28  ;;  %vm734_vm3 = vcmp.gt.s32.totalorder %v733_v52, %v4252_v28  ;;  %s4818_s23 = sld [smem:[#allocation13_spill]] }
  0x36   : > { %v4285_v53 = vsel %vm734_vm3, -1e+09, %v3980_v1  ;;  %s4820_s30 = sld [smem:[#allocation14_spill]] }
  0x37   : > { %v3709_v2 = vld [vmem:[%s4814_s0 + $0xac] ss:$12 sps:$4 sm:$0xff]   ;;  %v3711_v3 = vld [vmem:[%s4814_s0 + $0xa8] ss:$12 sps:$4 sm:$0xff]   ;;  %v3714_v5 = vld [vmem:[%s4814_s0 + $0x90] ss:$12 sps:$4 sm:$0xff]  }
  0x38   : > { %930 = vmatprep.subr.bf16.mxu0 %v3709_v2  ;;  %v3712_v4 = vld [vmem:[%s4814_s0 + $0x94] ss:$12 sps:$4 sm:$0xff]   ;;  %v3715_v6 = vld [vmem:[%s4814_s0 + $0x7c] ss:$12 sps:$4 sm:$0xff]   ;;  %v3717_v7 = vld [vmem:[%s4814_s0 + $0x78] ss:$12 sps:$4 sm:$0xff]   ;;  %s717_s2 = scalar_lea.vmem %s4815_s26, %s4188_s27 }
  0x39   : > { %931 = vmatpush1.bf16.msra.mxu0 %v3711_v3  ;;  %v3718_v8 = vld [vmem:[%s4814_s0 + $0x64] ss:$12 sps:$4 sm:$0xff]   ;;  %v3720_v9 = vld [vmem:[%s4814_s0 + $0x60] ss:$12 sps:$4 sm:$0xff]   ;;  %v3723_v13 = vld [vmem:[%s4814_s0 + $0x48] ss:$12 sps:$4 sm:$0xff]  }
  0x3a   : > { %932 = vmatprep.subr.bf16.mxu0 %v3712_v4  ;;  %v3733_v10 = vld [vmem:[%s4814_s0 + $0xb0] ss:$12 sps:$4 sm:$0xff]   ;;  %v3721_v11 = vld [vmem:[%s4814_s0 + $0x4c] ss:$12 sps:$4 sm:$0xff]   ;;  %v3724_v14 = vld [vmem:[%s4814_s0 + $0x34] ss:$12 sps:$4 sm:$0xff]  }
  0x3b   : > { %3497 = vmatpush3.bf16.msra.mxu1 %v3733_v10  ;;  %v3734_v12 = vld [vmem:[%s4814_s0 + $0x98] ss:$12 sps:$4 sm:$0xff]   ;;  %v3726_v15 = vld [vmem:[%s4814_s0 + $0x30] ss:$12 sps:$4 sm:$0xff]   ;;  %v3735_v16 = vld [vmem:[%s4814_s0 + $0x80] ss:$12 sps:$4 sm:$0xff]  }
  0x3c   : > { %3498 = vmatprep.subr.bf16.mxu1 %v3980_v1  ;;  %v3727_v17 = vld [vmem:[%s4814_s0 + $0x1c] ss:$12 sps:$4 sm:$0xff]   ;;  %v3729_v19 = vld [vmem:[%s4814_s0 + $0x18] ss:$12 sps:$4 sm:$0xff]   ;;  %v3732_v22 = vld [vmem:[%s4814_s0] ss:$12 sps:$4 sm:$0xff]  }
  0x3d   : > { %933 = vmatpush1.bf16.msra.mxu0 %v3714_v5  ;;  %v3736_v18 = vld [vmem:[%s4814_s0 + $0x68] ss:$12 sps:$4 sm:$0xff]   ;;  %v3730_v20 = vld [vmem:[%s4814_s0 + $0x4] ss:$12 sps:$4 sm:$0xff]   ;;  %v4231_v24 = vld [vmem:[%s717_s2] sm:$0xf] }
  0x3e   : > { %934 = vmatprep.subr.bf16.mxu0 %v3715_v6  ;;  %v3737_v21 = vld [vmem:[%s4814_s0 + $0x50] ss:$12 sps:$4 sm:$0xff]   ;;  %v3738_v23 = vld [vmem:[%s4814_s0 + $0x38] ss:$12 sps:$4 sm:$0xff]   ;;  %v3739_v25 = vld [vmem:[%s4814_s0 + $0x20] ss:$12 sps:$4 sm:$0xff]  }
  0x3f   : > { %3499 = vmatpush3.bf16.msra.mxu1 %v3734_v12  ;;  %v3740_v26 = vld [vmem:[%s4814_s0 + $0x8] ss:$12 sps:$4 sm:$0xff]   ;;  %v768_v31 = vld [vmem:[%s4816_s6] sm:$0x7]  ;;  %s4803_s26 = smov 64   ;;  %s4801_s2 = smov 32  }
  0x40   : > { %3500 = vmatprep.subr.bf16.mxu1 %v3980_v1  ;;  %v794_v32 = vrot.slane %v768_v31, %v4255_v29  ;;  %v790_v34 = vrot.slane %v768_v31, %v4258_v30  ;;  %v798_v44 = vrot.slane %v768_v31, %v797_v43  ;;  %s4822_s6 = smov 32  }
  0x41   : > { %935 = vmatpush1.bf16.msra.mxu0 %v3717_v7 }
  0x42   : > { %936 = vmatprep.subr.bf16.mxu0 %v3718_v8 }
  0x43   : > { %3501 = vmatpush3.bf16.msra.mxu1 %v3735_v16 }
  0x44   : > { %3502 = vmatprep.subr.bf16.mxu1 %v3980_v1 }
  0x45   : > { %937 = vmatpush1.bf16.msra.mxu0 %v3720_v9 }
  0x46   : > { %938 = vmatprep.subr.bf16.mxu0 %v3721_v11 }
  0x47   : > { %3503 = vmatpush3.bf16.msra.mxu1 %v3736_v18 }
  0x48   : > { %3504 = vmatprep.subr.bf16.mxu1 %v3980_v1 }
  0x49   : > { %939 = vmatpush1.bf16.msra.mxu0 %v3723_v13 }
  0x4a   : > { %940 = vmatprep.subr.bf16.mxu0 %v3724_v14 }
  0x4b   : > { %3505 = vmatpush3.bf16.msra.mxu1 %v3737_v21 }
  0x4c   : > { %3506 = vmatprep.subr.bf16.mxu1 %v3980_v1 }
  0x4d   : > { %941 = vmatpush1.bf16.msra.mxu0 %v3726_v15 }
  0x4e   : > { %942 = vmatprep.subr.bf16.mxu0 %v3727_v17 }
  0x4f   : > { %3507 = vmatpush3.bf16.msra.mxu1 %v3738_v23 }
  0x50   : > { %3508 = vmatprep.subr.bf16.mxu1 %v3980_v1 }
  0x51   : > { %943 = vmatpush1.bf16.msra.mxu0 %v3729_v19 }
  0x52   : > { %944 = vmatprep.subr.bf16.mxu0 %v3730_v20 }
  0x53   : > { %3509 = vmatpush3.bf16.msra.mxu1 %v3739_v25 }
  0x54   : > { %3510 = vmatprep.subr.bf16.mxu1 %v3980_v1 }
  0x55   : > { %945 = vmatpush1.bf16.msra.mxu0 %v3732_v22 }
  0x56   : > { %3540 = vmatprep.subr.bf16.mxu0 %v3980_v1 }
  0x57   : > { %3511 = vmatpush3.bf16.msra.mxu1 %v3740_v26 }
  0x58   : > { %963 = vmatmul.mubr.bf16.vlgmr.msra.gmra.mxu0 %v4231_v24  ;;  %3516 = vmatprep.subr.bf16.mxu1 %v3980_v1 }
  0x59   : > { %3542 = vmatprep.mubr.msk.bf16.mxu0 %vm3981_vm0, %v3980_v1 }
  0x5a   : > { %3513 = vmatmul.mubr.bf16.vlgmr.msra.gmra.mxu1 %v4231_v24 }
  0x5b   : > { %3518 = vmatprep.mubr.msk.bf16.mxu1 %vm3981_vm0, %v3980_v1 }
 0x118   : > { %v964_v33 = vpop.f32.mrf.mxu0 }
 0x119   : > { %v965_v38 = vadd.f32 %v964_v33, %v790_v34 }
 0x11a   : > { %v966_v35 = vpop.f32.mrf.mxu0  ;;  %v1005_v45 = vpop.f32.mrf.mxu1 }
 0x11b   : > { %v967_v36 = vadd.f32 %v966_v35, %v794_v32  ;;  %v1011_v42 = vpack.c.bf16 %v965_v38, %v965_v38  ;;  %v1006_v46 = vadd.f32 %v1005_v45, %v798_v44 }
 0x11c   : > { %v968_v37 = vpop.f32.mrf.mxu0  ;;  %v3514_v47 = vpop.f32.mrf.mxu1 }
 0x11d   : > { %v1012_v39 = vpack.c.bf16 %v967_v36, %v967_v36  ;;  %v4278_v48 = vpack.c.bf16 %v1006_v46, %v1006_v46 }
 0x11e   : > { %v969_v40 = vpop.f32.mrf.mxu0  ;;  %v1008_v49 = vpop.f32.mrf.mxu1 }
 0x11f   : > { %1125 = vrot.lane.b32.xlu1 %v1012_v39, %s3982_s25  ;;  %v1019_v41 = vsel %vm1014_vm1, %v1012_v39, 0  ;;  %v1079_v50 = vsel %vm1077_vm2, %v4278_v48, 0 }
 0x120   : > { %3517 = vmatpush3.bf16.xpose.msra.mxu1 %v1019_v41  ;;  %v3515_v51 = vpop.f32.mrf.mxu1 }
 0x121   : > { %3522 = vmatprep.subr.bf16.mxu1 %v3980_v1 }
 0x123   : > { %1122 = vrot.lane.b32.xlu1 %v1011_v42, %s3982_s25 }
 0x127   : > { %1234 = vrot.lane.b32.xlu1 %v1011_v42, %s4803_s26  ;;  %3519 = vmatmul.mubr.msk.bf16.vlgmr.msra.gmra.mxu1 %vm1014_vm1, %v1011_v42 }
 0x128   : > { %3524 = vmatprep.mubr.msk.bf16.mxu1 %vm3981_vm0, %v3980_v1  ;;  %3523 = vmatpush3.bf16.msra.mxu1 %v1079_v50 }
 0x129   : > { %3528 = vmatprep.subr.bf16.mxu1 %v3980_v1 }
 0x12b   : > { %1346 = vrot.lane.b32.xlu1 %v1012_v39, %s4801_s2 }
 0x12f   : > { %1344 = vrot.lane.b32.xlu1 %v1011_v42, %s4801_s2 }
 0x191   : > { %v1126_v3 = vpop.permute.xlu1 %1125 }
 0x192   : > { %v1131_v14 = vsel %vm1014_vm1, %v1126_v3, 0 }
 0x195   : > { %v1123_v4 = vpop.permute.xlu1 %1122 }
 0x199   : > { %v1235_v6 = vpop.permute.xlu1 %1234 }
 0x19d   : > { %v1347_v9 = vpop.permute.xlu1 %1346 }
 0x19e   : > { %v1352_v10 = vsel %vm1014_vm1, %v1347_v9, 0 }
 0x1a1   : > { %v1345_v15 = vpop.permute.xlu1 %1344 }
 0x1e7   : > { %v1055_v54 = vpop.f32.mrf.mxu1 }
 0x1e8   : > { %v1056_v55 = vadd.f32 %v1055_v54, %v4285_v53 }
 0x1e9   : > { %v3520_v56 = vpop.f32.mrf.mxu1 }
 0x1ea   : > { %v1062_v57 = vsel %vm1061_vm4, %v1056_v55, -inf }
 0x1eb   : > { %1063 = vmax.xlane.f32.xlu0 %v1062_v57  ;;  %v1058_v58 = vpop.f32.mrf.mxu1 }
 0x1ed   : > { %v3521_v59 = vpop.f32.mrf.mxu1 }
 0x274   : > { %v1064_v60 = vpop.xlane.xlu0 %1063 }
 0x275   : > { %v1065_v61 = vsub.f32 %v1056_v55, %v1064_v60 }
 0x277   : > { %v1066_v62 = vmul.f32 1.442695, %v1065_v61 }
 0x279   : > { %3869 = vpow2.f32 %v1066_v62 }
 0x286   : > { %v3870_v63 = vpop.eup %3869 }
 0x287   : > { %v1068_v2 = vsel %vm1061_vm4, %v3870_v63, 0.0 }
 0x288   : > { %1069 = vadd.xlane.f32.xlu0 %v1068_v2 }
 0x29e   : > { %1236 = vrot.lane.b32.xlu0 %v1012_v39, %s4803_s26 }
 0x311   : > { %v1070_v5 = vpop.xlane.xlu0 %1069 }
 0x312   : > { %3871 = vrcp.f32 %v1070_v5 }
 0x315   : > { %v1237_v7 = vpop.permute.xlu0 %1236 }
 0x316   : > { %v1242_v8 = vsel %vm1014_vm1, %v1237_v7, 0 }
 0x317   : > { %3541 = vmatpush3.bf16.xpose.msra.mxu0 %v1242_v8 }
 0x318   : > { %3552 = vmatprep.subr.bf16.mxu0 %v3980_v1 }
 0x31e   : > { %3543 = vmatmul.mubr.msk.bf16.vlgmr.msra.gmra.mxu0 %vm1014_vm1, %v1235_v6 }
 0x31f   : > { %v3872_v11 = vpop.eup %3871  ;;  %3553 = vmatpush3.bf16.xpose.msra.mxu0 %v1352_v10  ;;  %3554 = vmatprep.mubr.msk.bf16.mxu0 %vm3981_vm0, %v3980_v1 }
 0x320   : > { %v1072_v12 = vmul.f32 %v3872_v11, %v3870_v63  ;;  %3564 = vmatprep.subr.bf16.mxu0 %v3980_v1 }
 0x322   : > { %v1073_v13 = vpack.c.bf16 %v1072_v12, %v1072_v12 }
 0x324   : > { %3525 = vmatmul.mubr.msk.bf16.vlgmr.msra.gmra.mxu1 %vm1061_vm4, %v1073_v13 }
 0x325   : > { %3529 = vmatpush3.bf16.xpose.msra.mxu1 %v1131_v14  ;;  %3530 = vmatprep.mubr.msk.bf16.mxu1 %vm3981_vm0, %v3980_v1  ;;  %v3741_v14 = vld [vmem:[%s4817_s4 + $0x38] sm:$0xff]  }
 0x326   : > { %3555 = vmatmul.mubr.msk.bf16.vlgmr.msra.gmra.mxu0 %vm1014_vm1, %v1345_v15  ;;  %3534 = vmatprep.subr.bf16.mxu1 %v3980_v1  ;;  %v3742_v15 = vld [vmem:[%s4817_s4 + $0x30] sm:$0xff]  }
 0x327   : > { %3580 = vmatprep.mubr.msk.bf16.mxu0 %vm3981_vm0, %v3980_v1  ;;  %3565 = vmatpush3.bf16.msra.mxu0 %v3741_v14  ;;  %v3774_v14 = vld [vmem:[%s4786_s10] ss:$8 sps:$4 sm:$0xff]  }
 0x328   : > { %3566 = vmatprep.subr.bf16.mxu0 %v3980_v1 }
 0x32b   : > { %3567 = vmatpush3.bf16.msra.mxu0 %v3742_v15  ;;  %v3777_v15 = vld [vmem:[#allocation2 + $0x18] sm:$0xff]  }
 0x32c   : > { %3531 = vmatmul.mubr.msk.bf16.vlgmr.msra.gmra.mxu1 %vm1014_vm1, %v1123_v4  ;;  %3568 = vmatprep.subr.bf16.mxu0 %v3980_v1 }
 0x32d   : > { %3536 = vmatprep.mubr.msk.bf16.mxu1 %vm3981_vm0, %v3980_v1 }
 0x3de   : > { %v1278_v16 = vpop.f32.mrf.mxu0 }
 0x3df   : > { %v1279_v17 = vadd.f32 %v1278_v16, %v4285_v53  ;;  %v3743_v16 = vld [vmem:[%s4817_s4 + $0x28] sm:$0xff]  }
 0x3e0   : > { %v3544_v18 = vpop.f32.mrf.mxu0  ;;  %3569 = vmatpush3.bf16.msra.mxu0 %v3743_v16 }
 0x3e1   : > { %v1284_v19 = vsel %vm1061_vm4, %v1279_v17, -inf  ;;  %3570 = vmatprep.subr.bf16.mxu0 %v3980_v1  ;;  %v3745_v18 = vld [vmem:[%s4817_s4 + $0x18] sm:$0xff]  }
 0x3e2   : > { %1285 = vmax.xlane.f32.xlu0 %v1284_v19  ;;  %v1281_v20 = vpop.f32.mrf.mxu0  ;;  %v3746_v19 = vld [vmem:[%s4817_s4 + $0x10] sm:$0xff]  }
 0x3e3   : > { %v3747_v20 = vld [vmem:[%s4817_s4 + $0x8] sm:$0xff]  }
 0x3e4   : > { %v4311_v21 = vpop.f32.mrf.mxu1  ;;  %v3545_v22 = vpop.f32.mrf.mxu0 }
 0x3e6   : > { %v3526_v23 = vpop.f32.mrf.mxu1  ;;  %v1388_v25 = vpop.f32.mrf.mxu0 }
 0x3e7   : > { %v1389_v37 = vadd.f32 %v1388_v25, %v4285_v53  ;;  %v3748_v25 = vld [vmem:[%s4817_s4] sm:$0xff]  }
 0x3e8   : > { %v1118_v26 = vpop.f32.mrf.mxu1  ;;  %v3556_v27 = vpop.f32.mrf.mxu0 }
 0x3e9   : > { %v1394_v41 = vsel %vm1061_vm4, %v1389_v37, -inf }
 0x3ea   : > { %v3527_v31 = vpop.f32.mrf.mxu1  ;;  %v1391_v32 = vpop.f32.mrf.mxu0 }
 0x3ec   : > { %v1167_v33 = vpop.f32.mrf.mxu1  ;;  %v3557_v34 = vpop.f32.mrf.mxu0 }
 0x3ed   : > { %v1168_v35 = vadd.f32 %v1167_v33, %v4285_v53 }
 0x3ee   : > { %v3532_v36 = vpop.f32.mrf.mxu1 }
 0x3ef   : > { %v1173_v38 = vsel %vm1061_vm4, %v1168_v35, -inf }
 0x3f0   : > { %1174 = vmax.xlane.f32.xlu1 %v1173_v38  ;;  %v1170_v39 = vpop.f32.mrf.mxu1 }
 0x3f2   : > { %v3533_v40 = vpop.f32.mrf.mxu1 }
 0x3f4   : > { %1395 = vmax.xlane.f32.xlu1 %v1394_v41 }
 0x46b   : > { %v1286_v42 = vpop.xlane.xlu0 %1285 }
 0x46c   : > { %v1287_v44 = vsub.f32 %v1279_v17, %v1286_v42  ;;  %v3744_v17 = vld [vmem:[%s4817_s4 + $0x20] sm:$0xff]  }
 0x46d   : > { %3571 = vmatpush3.bf16.msra.mxu0 %v3744_v17  ;;  %v3778_v17 = vld [vmem:[#allocation2 + $0x10] sm:$0xff]  }
 0x46e   : > { %v1288_v45 = vmul.f32 1.442695, %v1287_v44  ;;  %3572 = vmatprep.subr.bf16.mxu0 %v3980_v1 }
 0x470   : > { %3873 = vpow2.f32 %v1288_v45 }
 0x471   : > { %3573 = vmatpush3.bf16.msra.mxu0 %v3745_v18  ;;  %v3779_v18 = vld [vmem:[#allocation2 + $0x8] sm:$0xff]  }
 0x472   : > { %3574 = vmatprep.subr.bf16.mxu0 %v3980_v1 }
 0x475   : > { %3575 = vmatpush3.bf16.msra.mxu0 %v3746_v19  ;;  %v3780_v19 = vld [vmem:[#allocation2] sm:$0xff]  }
 0x476   : > { %3576 = vmatprep.subr.bf16.mxu0 %v3980_v1 }
 0x479   : > { %v1175_v46 = vpop.xlane.xlu1 %1174  ;;  %3577 = vmatpush3.bf16.msra.mxu0 %v3747_v20 }
 0x47a   : > { %v1176_v47 = vsub.f32 %v1168_v35, %v1175_v46  ;;  %3578 = vmatprep.subr.bf16.mxu0 %v3980_v1 }
 0x47c   : > { %v1177_v53 = vmul.f32 1.442695, %v1176_v47  ;;  %v3260_v47 = vld [vmem:[%s4818_s23] ss:$0 sm:$0xff] }
 0x47d   : > { %v3874_v49 = vpop.eup %3873  ;;  %v1396_v50 = vpop.xlane.xlu1 %1395  ;;  %3579 = vmatpush3.bf16.msra.mxu0 %v3748_v25 }
 0x47e   : > { %v1397_v51 = vsub.f32 %v1389_v37, %v1396_v50  ;;  %v1290_v52 = vsel %vm1061_vm4, %v3874_v49, 0.0 }
 0x47f   : > { %1291 = vadd.xlane.f32.xlu0 %v1290_v52 }
 0x480   : > { %v1398_v54 = vmul.f32 1.442695, %v1397_v51 }
 0x482   : > { %3875 = vpow2.f32 %v1398_v54 }
 0x483   : > { %3877 = vpow2.f32 %v1177_v53 }
 0x48f   : > { %v3876_v55 = vpop.eup %3875 }
 0x490   : > { %v1400_v56 = vsel %vm1061_vm4, %v3876_v55, 0.0  ;;  %v3878_v57 = vpop.eup %3877 }
 0x491   : > { %1401 = vadd.xlane.f32.xlu1 %v1400_v56  ;;  %v1179_v58 = vsel %vm1061_vm4, %v3878_v57, 0.0  ;;  %v3751_v56 = vld [vmem:[%s4786_s10 + $0x74] ss:$8 sps:$4 sm:$0xff]  }
 0x492   : > { %1832 = vmatprep.subr.bf16.mxu0 %v3751_v56 }
 0x495   : > { %1186 = vrot.lane.b32.xlu0 %v4278_v48, %s3982_s25  ;;  %1180 = vadd.xlane.f32.xlu1 %v1179_v58  ;;  %v3752_v58 = vld [vmem:[%s4786_s10 + $0x60] ss:$8 sps:$4 sm:$0xff]  }
 0x4a6   : > { %1296 = vrot.lane.b32.xlu1 %v4278_v48, %s4803_s26 }
 0x4aa   : > { %1406 = vrot.lane.b32.xlu1 %v4278_v48, %s4801_s2 }
 0x508   : > { %v1292_v59 = vpop.xlane.xlu0 %1291 }
 0x50c   : > { %v1187_v60 = vpop.permute.xlu0 %1186 }
 0x50d   : > { %v1192_v61 = vsel %vm1077_vm2, %v1187_v60, 0  ;;  %v3765_v60 = vld [vmem:[#allocation2 + $0x30] sm:$0xff]  }
 0x50e   : > { %3535 = vmatpush3.bf16.msra.mxu1 %v1192_v61  ;;  %v3755_v61 = vld [vmem:[%s4786_s10 + $0x50] ss:$8 sps:$4 sm:$0xff]  }
 0x50f   : > { %3546 = vmatprep.subr.bf16.mxu1 %v3980_v1 }
 0x51a   : > { %v1402_v62 = vpop.xlane.xlu1 %1401 }
 0x51e   : > { %v1181_v63 = vpop.xlane.xlu1 %1180 }
 0x51f   : > { %3879 = vrcp.f32 %v1181_v63  ;;  %v3758_v63 = vld [vmem:[%s4786_s10 + $0x40] ss:$8 sps:$4 sm:$0xff]  }
 0x520   : > { %3881 = vrcp.f32 %v1292_v59  ;;  %v3757_v59 = vld [vmem:[%s4786_s10 + $0x54] ss:$8 sps:$4 sm:$0xff]  }
 0x521   : > { %3883 = vrcp.f32 %v1402_v62  ;;  %v3760_v62 = vld [vmem:[%s4786_s10 + $0x44] ss:$8 sps:$4 sm:$0xff]  }
 0x522   : > { %v1297_v4 = vpop.permute.xlu1 %1296 }
 0x523   : > { %v1302_v7 = vsel %vm1077_vm2, %v1297_v4, 0 }
 0x526   : > { %v1407_v8 = vpop.permute.xlu1 %1406 }
 0x527   : > { %v1412_v11 = vsel %vm1077_vm2, %v1407_v8, 0  ;;  %v3766_v8 = vld [vmem:[%s4786_s10 + $0x20] ss:$8 sps:$4 sm:$0xff]  }
 0x52c   : > { %v3880_v2 = vpop.eup %3879 }
 0x52d   : > { %v1183_v3 = vmul.f32 %v3880_v2, %v3878_v57  ;;  %v3882_v6 = vpop.eup %3881  ;;  %v3754_v57 = vld [vmem:[%s4786_s10 + $0x64] ss:$8 sps:$4 sm:$0xff]   ;;  %v3764_v2 = vld [vmem:[%s4786_s10 + $0x34] ss:$8 sps:$4 sm:$0xff]  }
 0x52e   : > { %v1294_v48 = vmul.f32 %v3882_v6, %v3874_v49  ;;  %v3884_v10 = vpop.eup %3883  ;;  %v728_v49 = vunpack.c.l.bf16 %v4231_v24  ;;  %v3761_v24 = vld [vmem:[#allocation2 + $0x38] sm:$0xff]  }
 0x52f   : > { %v1184_v5 = vpack.c.bf16 %v1183_v3, %v1183_v3  ;;  %v1404_v12 = vmul.f32 %v3884_v10, %v3876_v55  ;;  %v3749_v55 = vld [vmem:[%s4786_s10 + $0x70] ss:$8 sps:$4 sm:$0xff]   ;;  %v3772_v10 = vld [vmem:[%s4786_s10 + $0x14] ss:$8 sps:$4 sm:$0xff]  }
 0x530   : > { %v1295_v9 = vpack.c.bf16 %v1294_v48, %v1294_v48  ;;  %v3762_v3 = vld [vmem:[%s4786_s10 + $0x30] ss:$8 sps:$4 sm:$0xff]   ;;  %v3768_v48 = vld [vmem:[%s4786_s10 + $0x24] ss:$8 sps:$4 sm:$0xff]  }
 0x531   : > { %3537 = vmatmul.mubr.msk.bf16.vlgmr.msra.gmra.mxu1 %vm1061_vm4, %v1184_v5  ;;  %v1405_v13 = vpack.c.bf16 %v1404_v12, %v1404_v12  ;;  %v3773_v12 = vld [vmem:[#allocation2 + $0x20] sm:$0xff]  }
 0x532   : > { %3547 = vmatpush3.bf16.msra.mxu1 %v1302_v7  ;;  %3548 = vmatprep.mubr.msk.bf16.mxu1 %vm3981_vm0, %v3980_v1 }
 0x533   : > { %3558 = vmatprep.subr.bf16.mxu1 %v3980_v1 }
 0x539   : > { %3549 = vmatmul.mubr.msk.bf16.vlgmr.msra.gmra.mxu1 %vm1061_vm4, %v1295_v9  ;;  %v3769_v9 = vld [vmem:[#allocation2 + $0x28] sm:$0xff]  }
 0x53a   : > { %3559 = vmatpush3.bf16.msra.mxu1 %v1412_v11  ;;  %3560 = vmatprep.mubr.msk.bf16.mxu1 %vm3981_vm0, %v3980_v1  ;;  %v3770_v11 = vld [vmem:[%s4786_s10 + $0x10] ss:$8 sps:$4 sm:$0xff]  }
 0x53b   : > { %3584 = vmatprep.subr.bf16.mxu1 %v3980_v1 }
 0x541   : > { %3561 = vmatmul.mubr.msk.bf16.vlgmr.msra.gmra.mxu1 %vm1061_vm4, %v1405_v13  ;;  %v3776_v13 = vld [vmem:[%s4786_s10 + $0x4] ss:$8 sps:$4 sm:$0xff]  }
 0x542   : > { %3600 = vmatprep.mubr.msk.bf16.mxu1 %vm3981_vm0, %v3980_v1  ;;  %3585 = vmatpush3.bf16.msra.mxu1 %v3761_v24 }
 0x543   : > { %3586 = vmatprep.subr.bf16.mxu1 %v3980_v1 }
 0x546   : > { %3587 = vmatpush3.bf16.msra.mxu1 %v3765_v60 }
 0x547   : > { %3588 = vmatprep.subr.bf16.mxu1 %v3980_v1 }
 0x54a   : > { %3589 = vmatpush3.bf16.msra.mxu1 %v3769_v9 }
 0x54b   : > { %3590 = vmatprep.subr.bf16.mxu1 %v3980_v1 }
 0x54e   : > { %3591 = vmatpush3.bf16.msra.mxu1 %v3773_v12 }
 0x54f   : > { %3592 = vmatprep.subr.bf16.mxu1 %v3980_v1 }
 0x552   : > { %3593 = vmatpush3.bf16.msra.mxu1 %v3777_v15 }
 0x553   : > { %3594 = vmatprep.subr.bf16.mxu1 %v3980_v1 }
 0x556   : > { %3595 = vmatpush3.bf16.msra.mxu1 %v3778_v17 }
 0x557   : > { %3596 = vmatprep.subr.bf16.mxu1 %v3980_v1 }
 0x55a   : > { %3597 = vmatpush3.bf16.msra.mxu1 %v3779_v18 }
 0x55b   : > { %3598 = vmatprep.subr.bf16.mxu1 %v3980_v1 }
 0x55e   : > { %3599 = vmatpush3.bf16.msra.mxu1 %v3780_v19 }
 0x55f   : > { %3604 = vmatprep.subr.bf16.mxu1 %v3980_v1 }
 0x5f1   : > { %v1228_v22 = vpop.f32.mrf.mxu1 }
 0x5f2   : > { %1455 = vrot.lane.b32.xlu0 %v1228_v22, %s4801_s2 }
 0x5f3   : > { %v3538_v23 = vpop.f32.mrf.mxu1 }
 0x5f5   : > { %v1231_v26 = vpop.f32.mrf.mxu1 }
 0x5f6   : > { %v3269_v26 = vld [vmem:[%s4820_s30] ss:$0 sm:$0xff]  ;;  %s725_s30 = scalar_lea.vmem %s4798_s22, %s4188_s27 }
 0x5f7   : > { %v3539_v27 = vpop.f32.mrf.mxu1 }
 0x5f9   : > { %v1338_v31 = vpop.f32.mrf.mxu1 }
 0x5fa   : > { %1459 = vrot.lane.b32.xlu1 %v1338_v31, %s4803_s26  ;;  %s4819_s26 = sld [smem:[#allocation9_spill]]  ;;  %v3270_v31 = vld [vmem:[%s4783_s7] ss:$0 sm:$0xff] }
 0x5fb   : > { %v3550_v32 = vpop.f32.mrf.mxu1 }
 0x5fd   : > { %v1341_v33 = vpop.f32.mrf.mxu1 }
 0x5ff   : > { %v3551_v34 = vpop.f32.mrf.mxu1 }
 0x600   : > { %s721_s2 = scalar_lea.vmem %s4819_s26, %s4188_s27 }
 0x601   : > { %v1448_v35 = vpop.f32.mrf.mxu1  ;;  %v729_v16 = vld [vmem:[%s721_s2] sm:$0xf]  ;;  %s4821_s2 = smov 64  }
 0x602   : > { %1463 = vrot.lane.b32.xlu0 %v1448_v35, %s3982_s25  ;;  %v1628_v35 = vld [vmem:[%s4787_s11] sm:$0x3] }
 0x603   : > { %v3562_v36 = vpop.f32.mrf.mxu1 }
 0x604   : > { %v1745_v36 = vrot.slane %v1628_v35, %v4258_v30 }
 0x605   : > { %v1451_v37 = vpop.f32.mrf.mxu1 }
 0x606   : > { %v1749_v37 = vrot.slane %v1628_v35, %v4255_v29 }
 0x607   : > { %v3563_v38 = vpop.f32.mrf.mxu1 }
 0x664   : > { %v1456_v39 = vpop.permute.xlu0 %1455 }
 0x665   : > { %v1466_v41 = vsel %vm1014_vm1, %v4311_v21, %v1456_v39 }
 0x66c   : > { %v1460_v40 = vpop.permute.xlu1 %1459 }
 0x66d   : > { %v1468_v42 = vsel %vm1467_vm5, %v1466_v41, %v1460_v40 }
 0x674   : > { %v1464_v44 = vpop.permute.xlu0 %1463 }
 0x675   : > { %v1470_v45 = vsel %vm1469_vm6, %v1468_v42, %v1464_v44 }
 0x676   : > { %v1471_v46 = vpack.c.bf16 %v1470_v45, %v1470_v45 }
 0x678   : > { %3581 = vmatmul.mubr.bf16.vlgmr.msra.gmra.mxu0 %v1471_v46 }
 0x679   : > { %1864 = vmatprep.mubr.bf16.mxu0 %v3979_v0  ;;  %1833 = vmatpush1.bf16.msra.mxu0 %v3749_v55 }
 0x67a   : > { %1834 = vmatprep.subr.bf16.mxu0 %v3754_v57 }
 0x67d   : > { %1835 = vmatpush1.bf16.msra.mxu0 %v3752_v58 }
 0x67e   : > { %1836 = vmatprep.subr.bf16.mxu0 %v3757_v59 }
 0x681   : > { %1837 = vmatpush1.bf16.msra.mxu0 %v3755_v61 }
 0x682   : > { %1838 = vmatprep.subr.bf16.mxu0 %v3760_v62 }
 0x685   : > { %1839 = vmatpush1.bf16.msra.mxu0 %v3758_v63 }
 0x686   : > { %1840 = vmatprep.subr.bf16.mxu0 %v3764_v2 }
 0x689   : > { %1841 = vmatpush1.bf16.msra.mxu0 %v3762_v3 }
 0x68a   : > { %1842 = vmatprep.subr.bf16.mxu0 %v3768_v48 }
 0x68d   : > { %1843 = vmatpush1.bf16.msra.mxu0 %v3766_v8 }
 0x68e   : > { %1844 = vmatprep.subr.bf16.mxu0 %v3772_v10 }
 0x691   : > { %1845 = vmatpush1.bf16.msra.mxu0 %v3770_v11 }
 0x692   : > { %1846 = vmatprep.subr.bf16.mxu0 %v3776_v13 }
 0x695   : > { %1847 = vmatpush1.bf16.msra.mxu0 %v3774_v14 }
 0x696   : > { %3628 = vmatprep.subr.bf16.mxu0 %v3980_v1 }
 0x698   : > { %1865 = vmatmul.mubr.bf16.vlgmr.msra.gmra.mxu0 %v729_v16 }
 0x699   : > { %3630 = vmatprep.mubr.msk.bf16.mxu0 %vm3981_vm0, %v3980_v1 }
 0x738   : > { %v1560_v50 = vpop.f32.mrf.mxu0 }
 0x739   : > { %v1561_v51 = vadd.f32 %v3260_v47, %v1560_v50  ;;  %v3271_v47 = vld [vmem:[%s4785_s9] ss:$0 sm:$0xff] }
 0x73a   : > { %v3582_v52 = vpop.f32.mrf.mxu0 }
 0x73b   : > { %v1566_v53 = vadd.f32 %v1561_v51, %v728_v49 }
 0x73c   : > { %v1563_v21 = vpop.f32.mrf.mxu0 }
 0x73d   : > { %1569 = vadd.xlane.f32.xlu1 %v1566_v53 }
 0x73e   : > { %v3583_v54 = vpop.f32.mrf.mxu0 }
 0x758   : > { %v1866_v38 = vpop.f32.mrf.mxu0 }
 0x759   : > { %v1867_v39 = vadd.f32 %v1866_v38, %v1745_v36 }
 0x75a   : > { %v1868_v40 = vpop.f32.mrf.mxu0 }
 0x75b   : > { %v1874_v41 = vpack.c.bf16 %v1867_v39, %v1867_v39  ;;  %v1869_v42 = vadd.f32 %v1868_v40, %v1749_v37 }
 0x75c   : > { %v1870_v44 = vpop.f32.mrf.mxu0 }
 0x75d   : > { %v1880_v45 = vsel %vm1014_vm1, %v1874_v41, 0  ;;  %v4469_v50 = vpack.c.bf16 %v1869_v42, %v1869_v42 }
 0x75e   : > { %v1871_v46 = vpop.f32.mrf.mxu0 }
 0x75f   : > { %v1938_v54 = vsel %vm1077_vm2, %v4469_v50, 0 }
 0x7c6   : > { %v1570_v4 = vpop.xlane.xlu1 %1569 }
 0x7c7   : > { %v1572_v5 = vmul.f32 0.0078125, %v1570_v4 }
 0x7c9   : > { %v1573_v6 = vsub.f32 %v1566_v53, %v1572_v5 }
 0x7cb   : > { %v1574_v7 = vmul.f32 %v1573_v6, %v1573_v6 }
 0x7cd   : > { %1575 = vadd.xlane.f32.xlu0 %v1574_v7 }
 0x856   : > { %v1576_v20 = vpop.xlane.xlu0 %1575 }
 0x857   : > { %v1577_v22 = vmul.f32 0.0078125, %v1576_v20 }
 0x859   : > { %v1578_v23 = vadd.f32 1e-05, %v1577_v22 }
 0x85b   : > { %3885 = vrsqrt.f32 %v1578_v23 }
 0x868   : > { %v3886_v25 = vpop.eup %3885 }
 0x869   : > { %v1580_v27 = vmul.f32 %v3886_v25, %v1573_v6 }
 0x86b   : > { %v1587_v32 = vmul.f32 %v3269_v26, %v1580_v27 }
 0x86d   : > { %v4453_v33 = vadd.f32 %v3270_v31, %v1587_v32 }
 0x86f   : > { %v1646_v34 = vpack.c.bf16 %v4453_v33, %v4453_v33 }
 0x871   : > { %3601 = vmatmul.mubr.bf16.vlgmr.msra.gmra.mxu1 %v1646_v34 }
 0x872   : > { %3606 = vmatprep.mubr.msk.bf16.mxu1 %vm3981_vm0, %v3980_v1  ;;  %3605 = vmatpush3.bf16.xpose.msra.mxu1 %v1880_v45 }
 0x873   : > { %3610 = vmatprep.subr.bf16.mxu1 %v3980_v1 }
 0x931   : > { %v1735_v49 = vpop.f32.mrf.mxu1 }
 0x932   : > { %v1736_v51 = vadd.f32 %v3271_v47, %v1735_v49 }
 0x933   : > { %v3602_v52 = vpop.f32.mrf.mxu1 }
 0x934   : > { %v1873_v53 = vpack.c.bf16 %v1736_v51, %v1736_v51 }
 0x935   : > { %v1738_v21 = vpop.f32.mrf.mxu1 }
 0x936   : > { %3607 = vmatmul.mubr.msk.bf16.vlgmr.msra.gmra.mxu1 %vm1014_vm1, %v1873_v53 }
 0x937   : > { %3611 = vmatpush3.bf16.msra.mxu1 %v1938_v54  ;;  %v3603_v55 = vpop.f32.mrf.mxu1  ;;  %3612 = vmatprep.mubr.msk.bf16.mxu1 %vm3981_vm0, %v3980_v1 }
 0x938   : > { %3616 = vmatprep.subr.bf16.mxu1 %v3980_v1 }
 0x9f6   : > { %v1916_v56 = vpop.f32.mrf.mxu1 }
 0x9f7   : > { %v1922_v57 = vsel %vm1061_vm4, %v1916_v56, -inf }
 0x9f8   : > { %1923 = vmax.xlane.f32.xlu0 %v1922_v57  ;;  %v3608_v24 = vpop.f32.mrf.mxu1 }
 0x9fa   : > { %v1919_v58 = vpop.f32.mrf.mxu1 }
 0x9fc   : > { %v3609_v59 = vpop.f32.mrf.mxu1 }
 0xa0e   : > { %1984 = vrot.lane.b32.xlu0 %v1874_v41, %s3982_s25 }
 0xa12   : > { %2093 = vrot.lane.b32.xlu0 %v1873_v53, %s4821_s2 }
 0xa16   : > { %2203 = vrot.lane.b32.xlu0 %v1873_v53, %s4822_s6 }
 0xa81   : > { %v1924_v60 = vpop.xlane.xlu0 %1923 }
 0xa82   : > { %v1925_v61 = vsub.f32 %v1916_v56, %v1924_v60 }
 0xa84   : > { %v1926_v62 = vmul.f32 1.442695, %v1925_v61 }
 0xa85   : > { %v1985_v7 = vpop.permute.xlu0 %1984 }
 0xa86   : > { %3887 = vpow2.f32 %v1926_v62  ;;  %v1990_v13 = vsel %vm1014_vm1, %v1985_v7, 0 }
 0xa89   : > { %v2094_v10 = vpop.permute.xlu0 %2093 }
 0xa8d   : > { %v2204_v14 = vpop.permute.xlu0 %2203 }
 0xa93   : > { %v3888_v63 = vpop.eup %3887 }
 0xa94   : > { %v1928_v2 = vsel %vm1061_vm4, %v3888_v63, 0.0 }
 0xa95   : > { %1929 = vadd.xlane.f32.xlu1 %v1928_v2 }
 0xaa6   : > { %1981 = vrot.lane.b32.xlu1 %v1873_v53, %s3982_s25 }
 0xaaa   : > { %2095 = vrot.lane.b32.xlu1 %v1874_v41, %s4821_s2 }
 0xaae   : > { %2205 = vrot.lane.b32.xlu1 %v1874_v41, %s4822_s6 }
 0xb1e   : > { %v1930_v3 = vpop.xlane.xlu1 %1929 }
 0xb1f   : > { %3889 = vrcp.f32 %v1930_v3 }
 0xb22   : > { %v1982_v4 = vpop.permute.xlu1 %1981 }
 0xb26   : > { %v2096_v5 = vpop.permute.xlu1 %2095 }
 0xb27   : > { %v2101_v6 = vsel %vm1014_vm1, %v2096_v5, 0 }
 0xb28   : > { %3629 = vmatpush3.bf16.xpose.msra.mxu0 %v2101_v6 }
 0xb29   : > { %3640 = vmatprep.subr.bf16.mxu0 %v3980_v1 }
 0xb2a   : > { %v2206_v8 = vpop.permute.xlu1 %2205 }
 0xb2b   : > { %v2211_v11 = vsel %vm1014_vm1, %v2206_v8, 0 }
 0xb2c   : > { %v3890_v48 = vpop.eup %3889 }
 0xb2d   : > { %v1932_v9 = vmul.f32 %v3890_v48, %v3888_v63 }
 0xb2f   : > { %3631 = vmatmul.mubr.msk.bf16.vlgmr.msra.gmra.mxu0 %vm1014_vm1, %v2094_v10  ;;  %v1933_v12 = vpack.c.bf16 %v1932_v9, %v1932_v9  ;;  %v3781_v10 = vld [vmem:[#allocation4 + $0x38] sm:$0xff]  }
 0xb30   : > { %3641 = vmatpush3.bf16.xpose.msra.mxu0 %v2211_v11  ;;  %3642 = vmatprep.mubr.msk.bf16.mxu0 %vm3981_vm0, %v3980_v1  ;;  %v3782_v11 = vld [vmem:[#allocation4 + $0x30] sm:$0xff]  }
 0xb31   : > { %3613 = vmatmul.mubr.msk.bf16.vlgmr.msra.gmra.mxu1 %vm1061_vm4, %v1933_v12  ;;  %3652 = vmatprep.subr.bf16.mxu0 %v3980_v1  ;;  %v3783_v12 = vld [vmem:[#allocation4 + $0x28] sm:$0xff]  }
 0xb32   : > { %3617 = vmatpush3.bf16.xpose.msra.mxu1 %v1990_v13  ;;  %3618 = vmatprep.mubr.msk.bf16.mxu1 %vm3981_vm0, %v3980_v1  ;;  %v3784_v13 = vld [vmem:[#allocation4 + $0x20] sm:$0xff]  }
 0xb33   : > { %3622 = vmatprep.subr.bf16.mxu1 %v3980_v1 }
 0xb37   : > { %3643 = vmatmul.mubr.msk.bf16.vlgmr.msra.gmra.mxu0 %vm1014_vm1, %v2204_v14  ;;  %v3785_v14 = vld [vmem:[#allocation4 + $0x18] sm:$0xff]  }
 0xb38   : > { %3668 = vmatprep.mubr.msk.bf16.mxu0 %vm3981_vm0, %v3980_v1  ;;  %3653 = vmatpush3.bf16.msra.mxu0 %v3781_v10  ;;  %v3819_v10 = vld [vmem:[%s4792_s16 + $0x40] ss:$16 sps:$4 sm:$0xff]  }
 0xb39   : > { %3619 = vmatmul.mubr.msk.bf16.vlgmr.msra.gmra.mxu1 %vm1014_vm1, %v1982_v4  ;;  %3654 = vmatprep.subr.bf16.mxu0 %v3980_v1 }
 0xb3a   : > { %3624 = vmatprep.mubr.msk.bf16.mxu1 %vm3981_vm0, %v3980_v1 }
 0xb3c   : > { %3655 = vmatpush3.bf16.msra.mxu0 %v3782_v11  ;;  %v3822_v11 = vld [vmem:[%s4792_s16 + $0x48] ss:$16 sps:$4 sm:$0xff]  }
 0xb3d   : > { %3656 = vmatprep.subr.bf16.mxu0 %v3980_v1 }
 0xb40   : > { %3657 = vmatpush3.bf16.msra.mxu0 %v3783_v12  ;;  %v3827_v12 = vld [vmem:[%s4792_s16 + $0x24] ss:$16 sps:$4 sm:$0xff]  }
 0xb41   : > { %3658 = vmatprep.subr.bf16.mxu0 %v3980_v1 }
 0xb44   : > { %3659 = vmatpush3.bf16.msra.mxu0 %v3784_v13  ;;  %v3830_v13 = vld [vmem:[%s4792_s16 + $0x2c] ss:$16 sps:$4 sm:$0xff]  }
 0xb45   : > { %3660 = vmatprep.subr.bf16.mxu0 %v3980_v1 }
 0xb48   : > { %3661 = vmatpush3.bf16.msra.mxu0 %v3785_v14  ;;  %v3825_v14 = vld [vmem:[%s4792_s16 + $0x20] ss:$16 sps:$4 sm:$0xff]  }
 0xb49   : > { %3662 = vmatprep.subr.bf16.mxu0 %v3980_v1 }
 0xbef   : > { %v2137_v15 = vpop.f32.mrf.mxu0 }
 0xbf0   : > { %v2143_v16 = vsel %vm1061_vm4, %v2137_v15, -inf }
 0xbf1   : > { %2144 = vmax.xlane.f32.xlu0 %v2143_v16  ;;  %v4504_v17 = vpop.f32.mrf.mxu1  ;;  %v3632_v18 = vpop.f32.mrf.mxu0  ;;  %v3787_v16 = vld [vmem:[#allocation4 + $0x8] sm:$0xff]  }
 0xbf3   : > { %v3614_v19 = vpop.f32.mrf.mxu1  ;;  %v2140_v20 = vpop.f32.mrf.mxu0 }
 0xbf4   : > { %v3788_v20 = vld [vmem:[#allocation4] sm:$0xff]  }
 0xbf5   : > { %v1977_v22 = vpop.f32.mrf.mxu1  ;;  %v3633_v23 = vpop.f32.mrf.mxu0 }
 0xbf7   : > { %v3615_v25 = vpop.f32.mrf.mxu1  ;;  %v2247_v26 = vpop.f32.mrf.mxu0 }
 0xbf8   : > { %v2253_v27 = vsel %vm1061_vm4, %v2247_v26, -inf }
 0xbf9   : > { %2254 = vmax.xlane.f32.xlu0 %v2253_v27  ;;  %v2026_v31 = vpop.f32.mrf.mxu1  ;;  %v3644_v32 = vpop.f32.mrf.mxu0 }
 0xbfa   : > { %v2032_v34 = vsel %vm1061_vm4, %v2026_v31, -inf }
 0xbfb   : > { %v2250_v35 = vpop.f32.mrf.mxu0  ;;  %2033 = vmax.xlane.f32.xlu1 %v2032_v34  ;;  %v3620_v36 = vpop.f32.mrf.mxu1 }
 0xbfd   : > { %v2029_v37 = vpop.f32.mrf.mxu1  ;;  %v3645_v38 = vpop.f32.mrf.mxu0 }
 0xbff   : > { %v3621_v39 = vpop.f32.mrf.mxu1 }
 0xc7a   : > { %v2145_v40 = vpop.xlane.xlu0 %2144 }
 0xc7b   : > { %v2146_v41 = vsub.f32 %v2137_v15, %v2145_v40  ;;  %v3786_v15 = vld [vmem:[#allocation4 + $0x10] sm:$0xff]  }
 0xc7c   : > { %3663 = vmatpush3.bf16.msra.mxu0 %v3786_v15  ;;  %v3828_v15 = vld [vmem:[%s4792_s16 + $0x28] ss:$16 sps:$4 sm:$0xff]  }
 0xc7d   : > { %v2147_v42 = vmul.f32 1.442695, %v2146_v41  ;;  %3664 = vmatprep.subr.bf16.mxu0 %v3980_v1 }
 0xc7f   : > { %3891 = vpow2.f32 %v2147_v42 }
 0xc80   : > { %3665 = vmatpush3.bf16.msra.mxu0 %v3787_v16  ;;  %v3833_v16 = vld [vmem:[%s4792_s16 + $0x4] ss:$16 sps:$4 sm:$0xff]  }
 0xc81   : > { %3666 = vmatprep.subr.bf16.mxu0 %v3980_v1 }
 0xc82   : > { %v2255_v44 = vpop.xlane.xlu0 %2254 }
 0xc83   : > { %v2256_v45 = vsub.f32 %v2247_v26, %v2255_v44  ;;  %v3304_v44 = vld [vmem:[%s4789_s13] ss:$0 sm:$0xff] }
 0xc84   : > { %v2034_v46 = vpop.xlane.xlu1 %2033  ;;  %3667 = vmatpush3.bf16.msra.mxu0 %v3788_v20  ;;  %v3834_v20 = vld [vmem:[%s4792_s16 + $0x8] ss:$16 sps:$4 sm:$0xff]  }
 0xc85   : > { %v2257_v47 = vmul.f32 1.442695, %v2256_v45  ;;  %v2035_v49 = vsub.f32 %v2026_v31, %v2034_v46 }
 0xc87   : > { %3893 = vpow2.f32 %v2257_v47  ;;  %v2036_v51 = vmul.f32 1.442695, %v2035_v49 }
 0xc89   : > { %3895 = vpow2.f32 %v2036_v51 }
 0xc8c   : > { %v3892_v52 = vpop.eup %3891 }
 0xc8d   : > { %v2149_v53 = vsel %vm1061_vm4, %v3892_v52, 0.0 }
 0xc8e   : > { %2150 = vadd.xlane.f32.xlu0 %v2149_v53  ;;  %v3792_v53 = vld [vmem:[%s4792_s16 + $0xe8] ss:$16 sps:$4 sm:$0xff]  }
 0xc94   : > { %v3894_v21 = vpop.eup %3893 }
 0xc95   : > { %v2259_v54 = vsel %vm1061_vm4, %v3894_v21, 0.0 }
 0xc96   : > { %v3896_v55 = vpop.eup %3895  ;;  %2260 = vadd.xlane.f32.xlu1 %v2259_v54  ;;  %v3800_v54 = vld [vmem:[%s4792_s16 + $0xcc] ss:$16 sps:$4 sm:$0xff]  }
 0xc97   : > { %v2038_v56 = vsel %vm1061_vm4, %v3896_v55, 0.0 }
 0xc9a   : > { %2039 = vadd.xlane.f32.xlu1 %v2038_v56  ;;  %v3798_v56 = vld [vmem:[%s4792_s16 + $0xc8] ss:$16 sps:$4 sm:$0xff]  }
 0xca4   : > { %2045 = vrot.lane.b32.xlu0 %v4469_v50, %s3982_s25 }
 0xcab   : > { %2155 = vrot.lane.b32.xlu1 %v4469_v50, %s4821_s2 }
 0xcaf   : > { %2265 = vrot.lane.b32.xlu1 %v4469_v50, %s4822_s6 }
 0xd17   : > { %v2151_v57 = vpop.xlane.xlu0 %2150 }
 0xd1b   : > { %v2046_v24 = vpop.permute.xlu0 %2045 }
 0xd1c   : > { %v2051_v58 = vsel %vm1077_vm2, %v2046_v24, 0 }
 0xd1d   : > { %3623 = vmatpush3.bf16.msra.mxu1 %v2051_v58 }
 0xd1e   : > { %3634 = vmatprep.subr.bf16.mxu1 %v3980_v1 }
 0xd1f   : > { %v2261_v59 = vpop.xlane.xlu1 %2260 }
 0xd23   : > { %v2040_v60 = vpop.xlane.xlu1 %2039 }
 0xd24   : > { %3897 = vrcp.f32 %v2040_v60  ;;  %v3803_v60 = vld [vmem:[%s4792_s16 + $0xa4] ss:$16 sps:$4 sm:$0xff]  }
 0xd25   : > { %3899 = vrcp.f32 %v2151_v57 }
 0xd26   : > { %3901 = vrcp.f32 %v2261_v59 }
 0xd27   : > { %v2156_v63 = vpop.permute.xlu1 %2155 }
 0xd28   : > { %v2161_v4 = vsel %vm1077_vm2, %v2156_v63, 0  ;;  %v3804_v63 = vld [vmem:[%s4792_s16 + $0xa8] ss:$16 sps:$4 sm:$0xff]  }
 0xd2b   : > { %v2266_v5 = vpop.permute.xlu1 %2265 }
 0xd2c   : > { %v2271_v48 = vsel %vm1077_vm2, %v2266_v5, 0  ;;  %v3815_v5 = vld [vmem:[%s4792_s16 + $0x64] ss:$16 sps:$4 sm:$0xff]  }
 0xd31   : > { %v3898_v61 = vpop.eup %3897 }
 0xd32   : > { %v2042_v62 = vmul.f32 %v3898_v61, %v3896_v55  ;;  %v3900_v3 = vpop.eup %3899  ;;  %v3795_v55 = vld [vmem:[%s4792_s16 + $0xc0] ss:$16 sps:$4 sm:$0xff]   ;;  %v3806_v61 = vld [vmem:[%s4792_s16 + $0xac] ss:$16 sps:$4 sm:$0xff]  }
 0xd33   : > { %v2153_v50 = vmul.f32 %v3900_v3, %v3892_v52  ;;  %v3902_v7 = vpop.eup %3901  ;;  %v3789_v52 = vld [vmem:[%s4792_s16 + $0xe0] ss:$16 sps:$4 sm:$0xff]   ;;  %v3809_v3 = vld [vmem:[%s4792_s16 + $0x84] ss:$16 sps:$4 sm:$0xff]  }
 0xd34   : > { %v2043_v2 = vpack.c.bf16 %v2042_v62, %v2042_v62  ;;  %v2263_v8 = vmul.f32 %v3902_v7, %v3894_v21  ;;  %v3794_v21 = vld [vmem:[%s4792_s16 + $0xec] ss:$16 sps:$4 sm:$0xff]   ;;  %v3801_v62 = vld [vmem:[%s4792_s16 + $0xa0] ss:$16 sps:$4 sm:$0xff]  }
 0xd35   : > { %v2154_v6 = vpack.c.bf16 %v2153_v50, %v2153_v50  ;;  %2772 = vmatprep.subr.bf16.mxu0 %v3794_v21  ;;  %v3812_v50 = vld [vmem:[%s4792_s16 + $0x8c] ss:$16 sps:$4 sm:$0xff]   ;;  %v3813_v7 = vld [vmem:[%s4792_s16 + $0x60] ss:$16 sps:$4 sm:$0xff]  }
 0xd36   : > { %3625 = vmatmul.mubr.msk.bf16.vlgmr.msra.gmra.mxu1 %vm1061_vm4, %v2043_v2  ;;  %v2264_v9 = vpack.c.bf16 %v2263_v8, %v2263_v8  ;;  %v3807_v2 = vld [vmem:[%s4792_s16 + $0x80] ss:$16 sps:$4 sm:$0xff]   ;;  %v3821_v8 = vld [vmem:[%s4792_s16 + $0x44] ss:$16 sps:$4 sm:$0xff]   ;;  %v3854_v21 = vld [vmem:[%s4794_s18 + $0xd8] sm:$0xff]  }
 0xd37   : > { %3635 = vmatpush3.bf16.msra.mxu1 %v2161_v4  ;;  %3636 = vmatprep.mubr.msk.bf16.mxu1 %vm3981_vm0, %v3980_v1  ;;  %v3810_v4 = vld [vmem:[%s4792_s16 + $0x88] ss:$16 sps:$4 sm:$0xff]  }
 0xd38   : > { %3646 = vmatprep.subr.bf16.mxu1 %v3980_v1 }
 0xd3e   : > { %3637 = vmatmul.mubr.msk.bf16.vlgmr.msra.gmra.mxu1 %vm1061_vm4, %v2154_v6  ;;  %v3818_v6 = vld [vmem:[%s4792_s16 + $0x6c] ss:$16 sps:$4 sm:$0xff]  }
 0xd3f   : > { %3647 = vmatpush3.bf16.msra.mxu1 %v2271_v48  ;;  %3648 = vmatprep.mubr.msk.bf16.mxu1 %vm3981_vm0, %v3980_v1  ;;  %v3816_v48 = vld [vmem:[%s4792_s16 + $0x68] ss:$16 sps:$4 sm:$0xff]  }
 0xd46   : > { %3649 = vmatmul.mubr.msk.bf16.vlgmr.msra.gmra.mxu1 %vm1061_vm4, %v2264_v9  ;;  %v3824_v9 = vld [vmem:[%s4792_s16 + $0x4c] ss:$16 sps:$4 sm:$0xff]  }
 0xd47   : > { %2763 = vmatprep.mubr.bf16.mxu1 %v3979_v0 }
 0xdf6   : > { %v2087_v18 = vpop.f32.mrf.mxu1 }
 0xdf7   : > { %2314 = vrot.lane.b32.xlu0 %v2087_v18, %s4822_s6  ;;  %v3836_v18 = vld [vmem:[%s4792_s16 + $0xc] ss:$16 sps:$4 sm:$0xff]  }
 0xdf8   : > { %v3626_v19 = vpop.f32.mrf.mxu1 }
 0xdf9   : > { %v3831_v19 = vld [vmem:[%s4792_s16] ss:$16 sps:$4 sm:$0xff]  }
 0xdfa   : > { %v2090_v22 = vpop.f32.mrf.mxu1 }
 0xdfb   : > { %v3837_v22 = vld [vmem:[%s4794_s18 + $0x78] sm:$0xff]  }
 0xdfc   : > { %v3627_v23 = vpop.f32.mrf.mxu1 }
 0xdfd   : > { %v3838_v23 = vld [vmem:[%s4794_s18 + $0xf8] sm:$0xff]  }
 0xdfe   : > { %v2197_v25 = vpop.f32.mrf.mxu1 }
 0xdff   : > { %2318 = vrot.lane.b32.xlu1 %v2197_v25, %s4821_s2 }
 0xe00   : > { %v3638_v26 = vpop.f32.mrf.mxu1 }
 0xe02   : > { %v2200_v27 = vpop.f32.mrf.mxu1 }
 0xe04   : > { %v3639_v31 = vpop.f32.mrf.mxu1 }
 0xe06   : > { %v2307_v32 = vpop.f32.mrf.mxu1 }
 0xe07   : > { %2322 = vrot.lane.b32.xlu0 %v2307_v32, %s3982_s25  ;;  %v3313_v32 = vld [vmem:[%s4790_s14] ss:$0 sm:$0xff] }
 0xe08   : > { %v3650_v34 = vpop.f32.mrf.mxu1 }
 0xe0a   : > { %v2310_v35 = vpop.f32.mrf.mxu1 }
 0xe0b   : > { %v3314_v35 = vld [vmem:[%s4791_s15] ss:$0 sm:$0xff] }
 0xe0c   : > { %v3651_v36 = vpop.f32.mrf.mxu1 }
 0xe69   : > { %v2315_v37 = vpop.permute.xlu0 %2314 }
 0xe6a   : > { %v2325_v1 = vsel %vm1014_vm1, %v4504_v17, %v2315_v37 }
 0xe71   : > { %v2319_v38 = vpop.permute.xlu1 %2318 }
 0xe72   : > { %v2326_v39 = vsel %vm1467_vm5, %v2325_v1, %v2319_v38  ;;  %v3839_v38 = vld [vmem:[%s4794_s18 + $0x38] sm:$0xff]  }
 0xe73   : > { %v3840_v1 = vld [vmem:[%s4794_s18 + $0xb8] sm:$0xff]  }
 0xe79   : > { %v2323_v40 = vpop.permute.xlu0 %2322 }
 0xe7a   : > { %v2327_v41 = vsel %vm1469_vm6, %v2326_v39, %v2323_v40  ;;  %v3841_v40 = vld [vmem:[%s4794_s18 + $0x70] sm:$0xff]  }
 0xe7b   : > { %v2328_v42 = vpack.c.bf16 %v2327_v41, %v2327_v41  ;;  %v3842_v41 = vld [vmem:[%s4794_s18 + $0xf0] sm:$0xff]  }
 0xe7d   : > { %3669 = vmatmul.mubr.bf16.vlgmr.msra.gmra.mxu0 %v2328_v42  ;;  %v3843_v42 = vld [vmem:[%s4794_s18 + $0x30] sm:$0xff]  }
 0xe7e   : > { %2804 = vmatprep.mubr.bf16.mxu0 %v3979_v0  ;;  %v3791_v0 = vld [vmem:[%s4792_s16 + $0xe4] ss:$16 sps:$4 sm:$0xff]   ;;  %2773 = vmatpush1.bf16.msra.mxu0 %v3792_v53  ;;  %v3853_v53 = vld [vmem:[%s4794_s18 + $0x58] sm:$0xff]  }
 0xe7f   : > { %2731 = vmatprep.subr.bf16.mxu1 %v3791_v0  ;;  %2774 = vmatprep.subr.bf16.mxu0 %v3800_v54  ;;  %v3852_v0 = vld [vmem:[%s4794_s18 + $0xa0] sm:$0xff]   ;;  %v3856_v54 = vld [vmem:[%s4794_s18 + $0x98] sm:$0xff]  }
 0xe80   : > { %2732 = vmatpush1.bf16.msra.mxu1 %v3789_v52  ;;  %v3851_v52 = vld [vmem:[%s4794_s18 + $0x20] sm:$0xff]  }
 0xe82   : > { %2775 = vmatpush1.bf16.msra.mxu0 %v3798_v56  ;;  %v3858_v56 = vld [vmem:[%s4794_s18 + $0xd0] sm:$0xff]  }
 0xe83   : > { %2776 = vmatprep.subr.bf16.mxu0 %v3806_v61  ;;  %v3864_v61 = vld [vmem:[%s4794_s18 + $0x88] sm:$0xff]  }
 0xe86   : > { %2777 = vmatpush1.bf16.msra.mxu0 %v3804_v63  ;;  %v3866_v63 = vld [vmem:[%s4794_s18 + $0xc0] sm:$0xff]  }
 0xe87   : > { %2778 = vmatprep.subr.bf16.mxu0 %v3812_v50  ;;  %v2565_v50 = vsub.s32 3, %v4252_v28 }
 0xe8a   : > { %2779 = vmatpush1.bf16.msra.mxu0 %v3810_v4  ;;  %v2483_v4 = vld [vmem:[%s4793_s17] sm:$0xf] }
 0xe8b   : > { %2780 = vmatprep.subr.bf16.mxu0 %v3818_v6  ;;  %v2562_v6 = vrot.slane %v2483_v4, %v797_v43 }
 0xe8e   : > { %2781 = vmatpush1.bf16.msra.mxu0 %v3816_v48  ;;  %v2566_v48 = vrot.slane %v2483_v4, %v2565_v50 }
 0xe8f   : > { %2782 = vmatprep.subr.bf16.mxu0 %v3824_v9 }
 0xe92   : > { %2783 = vmatpush1.bf16.msra.mxu0 %v3822_v11 }
 0xe93   : > { %2784 = vmatprep.subr.bf16.mxu0 %v3830_v13 }
 0xe96   : > { %2785 = vmatpush1.bf16.msra.mxu0 %v3828_v15 }
 0xe97   : > { %2786 = vmatprep.subr.bf16.mxu0 %v3836_v18 }
 0xe9a   : > { %2787 = vmatpush1.bf16.msra.mxu0 %v3834_v20 }
 0xe9b   : > { %3474 = vmatprep.subr.bf16.mxu0 %v3838_v23 }
 0xf3d   : > { %v2417_v45 = vpop.f32.mrf.mxu0 }
 0xf3e   : > { %v2418_v46 = vadd.f32 %v3304_v44, %v2417_v45  ;;  %v3844_v44 = vld [vmem:[%s4794_s18 + $0xb0] sm:$0xff]   ;;  %v3845_v45 = vld [vmem:[%s4794_s18 + $0x68] sm:$0xff]  }
 0xf3f   : > { %v3670_v47 = vpop.f32.mrf.mxu0 }
 0xf40   : > { %v2423_v49 = vadd.f32 %v2418_v46, %v4453_v33  ;;  %v3797_v33 = vld [vmem:[%s4792_s16 + $0xc4] ss:$16 sps:$4 sm:$0xff]   ;;  %v3846_v46 = vld [vmem:[%s4794_s18 + $0xe8] sm:$0xff]  }
 0xf41   : > { %v2420_v51 = vpop.f32.mrf.mxu0  ;;  %2733 = vmatprep.subr.bf16.mxu1 %v3797_v33  ;;  %v3847_v47 = vld [vmem:[%s4794_s18 + $0x28] sm:$0xff]   ;;  %v3855_v33 = vld [vmem:[%s4794_s18 + $0x18] sm:$0xff]  }
 0xf42   : > { %2426 = vadd.xlane.f32.xlu1 %v2423_v49  ;;  %2734 = vmatpush1.bf16.msra.mxu1 %v3795_v55  ;;  %v3849_v51 = vld [vmem:[%s4794_s18 + $0x60] sm:$0xff]   ;;  %v3857_v55 = vld [vmem:[%s4794_s18 + $0x50] sm:$0xff]  }
 0xf43   : > { %v3671_v17 = vpop.f32.mrf.mxu0  ;;  %2735 = vmatprep.subr.bf16.mxu1 %v3803_v60  ;;  %v3863_v60 = vld [vmem:[%s4794_s18 + $0x8] sm:$0xff]  }
 0xf44   : > { %v3850_v17 = vld [vmem:[%s4794_s18 + $0xe0] sm:$0xff]  }
 0xf46   : > { %2736 = vmatpush1.bf16.msra.mxu1 %v3801_v62  ;;  %v3865_v62 = vld [vmem:[%s4794_s18 + $0x40] sm:$0xff]  }
 0xf47   : > { %2737 = vmatprep.subr.bf16.mxu1 %v3809_v3  ;;  %v3868_v3 = vld [vmem:[%s4794_s18 + $0x80] sm:$0xff]  }
 0xf4a   : > { %2738 = vmatpush1.bf16.msra.mxu1 %v3807_v2  ;;  %v3867_v2 = vld [vmem:[%s4794_s18] sm:$0xff]  }
 0xf4b   : > { %2739 = vmatprep.subr.bf16.mxu1 %v3815_v5  ;;  %v2554_v5 = vrot.slane %v2483_v4, %v4258_v30 }
 0xf4e   : > { %2740 = vmatpush1.bf16.msra.mxu1 %v3813_v7  ;;  %v2558_v7 = vrot.slane %v2483_v4, %v4255_v29 }
 0xf4f   : > { %2741 = vmatprep.subr.bf16.mxu1 %v3821_v8 }
 0xf52   : > { %2742 = vmatpush1.bf16.msra.mxu1 %v3819_v10 }
 0xf53   : > { %2743 = vmatprep.subr.bf16.mxu1 %v3827_v12 }
 0xf56   : > { %2744 = vmatpush1.bf16.msra.mxu1 %v3825_v14 }
 0xf57   : > { %2745 = vmatprep.subr.bf16.mxu1 %v3833_v16 }
 0xf5a   : > { %2746 = vmatpush1.bf16.msra.mxu1 %v3831_v19 }
 0xf5b   : > { %3452 = vmatprep.subr.bf16.mxu1 %v3837_v22 }
 0xfcb   : > { %v2427_v57 = vpop.xlane.xlu1 %2426 }
 0xfcc   : > { %v2428_v24 = vmul.f32 0.0078125, %v2427_v57  ;;  %v3859_v57 = vld [vmem:[%s4794_s18 + $0x10] sm:$0xff]  }
 0xfce   : > { %v2429_v58 = vsub.f32 %v2423_v49, %v2428_v24  ;;  %v3848_v49 = vld [vmem:[%s4794_s18 + $0xa8] sm:$0xff]   ;;  %v3860_v24 = vld [vmem:[%s4794_s18 + $0x90] sm:$0xff]  }
 0xfd0   : > { %v2430_v59 = vmul.f32 %v2429_v58, %v2429_v58 }
 0xfd2   : > { %2431 = vadd.xlane.f32.xlu0 %v2430_v59  ;;  %v3862_v59 = vld [vmem:[%s4794_s18 + $0xc8] sm:$0xff]  }
0x105b   : > { %v2432_v25 = vpop.xlane.xlu0 %2431 }
0x105c   : > { %v2433_v26 = vmul.f32 0.0078125, %v2432_v25 }
0x105e   : > { %v2434_v27 = vadd.f32 1e-05, %v2433_v26 }
0x1060   : > { %3903 = vrsqrt.f32 %v2434_v27 }
0x106d   : > { %v3904_v31 = vpop.eup %3903 }
0x106e   : > { %v2436_v34 = vmul.f32 %v3904_v31, %v2429_v58  ;;  %v3861_v58 = vld [vmem:[%s4794_s18 + $0x48] sm:$0xff]  }
0x1070   : > { %v2443_v36 = vmul.f32 %v3313_v32, %v2436_v34  ;;  %v3347_v32 = vld [vmem:[%s4795_s19] ss:$0 sm:$0xff] }
0x1072   : > { %v4657_v37 = vadd.f32 %v3314_v35, %v2443_v36 }
0x1074   : > { %v2549_v39 = vpack.c.bf16 %v4657_v37, %v4657_v37 }
0x1076   : > { %2764 = vmatmul.mubr.bf16.vlgmr.msra.gmra.mxu1 %v2549_v39  ;;  %2805 = vmatmul.mubr.bf16.vlgmr.msra.gmra.mxu0 %v2549_v39 }
0x1077   : > { %3453 = vmatpush3.bf16.msra.mxu1 %v3839_v38  ;;  %3475 = vmatpush3.bf16.msra.mxu0 %v3840_v1 }
0x1078   : > { %3454 = vmatprep.subr.bf16.mxu1 %v3841_v40  ;;  %3476 = vmatprep.subr.bf16.mxu0 %v3842_v41 }
0x107b   : > { %3455 = vmatpush3.bf16.msra.mxu1 %v3843_v42  ;;  %3477 = vmatpush3.bf16.msra.mxu0 %v3844_v44 }
0x107c   : > { %3456 = vmatprep.subr.bf16.mxu1 %v3845_v45  ;;  %3478 = vmatprep.subr.bf16.mxu0 %v3846_v46 }
0x107f   : > { %3457 = vmatpush3.bf16.msra.mxu1 %v3847_v47  ;;  %3479 = vmatpush3.bf16.msra.mxu0 %v3848_v49 }
0x1080   : > { %3458 = vmatprep.subr.bf16.mxu1 %v3849_v51  ;;  %3480 = vmatprep.subr.bf16.mxu0 %v3850_v17 }
0x1083   : > { %3459 = vmatpush3.bf16.msra.mxu1 %v3851_v52  ;;  %3481 = vmatpush3.bf16.msra.mxu0 %v3852_v0 }
0x1084   : > { %3460 = vmatprep.subr.bf16.mxu1 %v3853_v53  ;;  %3482 = vmatprep.subr.bf16.mxu0 %v3854_v21  ;;  %v3380_v21 = vld [vmem:[%s4796_s20] ss:$0 sm:$0xff] }
0x1087   : > { %3461 = vmatpush3.bf16.msra.mxu1 %v3855_v33  ;;  %3483 = vmatpush3.bf16.msra.mxu0 %v3856_v54 }
0x1088   : > { %3462 = vmatprep.subr.bf16.mxu1 %v3857_v55  ;;  %3484 = vmatprep.subr.bf16.mxu0 %v3858_v56 }
0x108b   : > { %3463 = vmatpush3.bf16.msra.mxu1 %v3859_v57  ;;  %3485 = vmatpush3.bf16.msra.mxu0 %v3860_v24 }
0x108c   : > { %3464 = vmatprep.subr.bf16.mxu1 %v3861_v58  ;;  %3486 = vmatprep.subr.bf16.mxu0 %v3862_v59 }
0x108f   : > { %3465 = vmatpush3.bf16.msra.mxu1 %v3863_v60  ;;  %3487 = vmatpush3.bf16.msra.mxu0 %v3864_v61 }
0x1090   : > { %3466 = vmatprep.subr.bf16.mxu1 %v3865_v62  ;;  %3488 = vmatprep.subr.bf16.mxu0 %v3866_v63 }
0x1093   : > { %3467 = vmatpush3.bf16.msra.mxu1 %v3867_v2  ;;  %3489 = vmatpush3.bf16.msra.mxu0 %v3868_v3 }
0x1136   : > { %v2765_v8 = vpop.f32.mrf.mxu1  ;;  %v2806_v9 = vpop.f32.mrf.mxu0 }
0x1137   : > { %v2766_v10 = vadd.f32 %v2765_v8, %v2554_v5  ;;  %v2807_v11 = vadd.f32 %v2806_v9, %v2562_v6 }
0x1138   : > { %v2767_v12 = vpop.f32.mrf.mxu1  ;;  %v2808_v13 = vpop.f32.mrf.mxu0 }
0x1139   : > { %v2768_v14 = vadd.f32 %v2767_v12, %v2558_v7  ;;  %v2809_v15 = vadd.f32 %v2808_v13, %v2566_v48  ;;  %v2813_v16 = vmax.f32 %v2766_v10, 0.0  ;;  %v2815_v18 = vmax.f32 %v2807_v11, 0.0 }
0x113a   : > { %v2769_v19 = vpop.f32.mrf.mxu1  ;;  %v2810_v20 = vpop.f32.mrf.mxu0 }
0x113b   : > { %v2814_v22 = vmax.f32 %v2768_v14, 0.0  ;;  %v2816_v30 = vmax.f32 %v2809_v15, 0.0  ;;  %v2817_v29 = vpack.c.bf16 %v2813_v16, %v2813_v16  ;;  %v2819_v26 = vpack.c.bf16 %v2815_v18, %v2815_v18 }
0x113c   : > { %v2770_v23 = vpop.f32.mrf.mxu1  ;;  %v2811_v28 = vpop.f32.mrf.mxu0 }
0x113d   : > { %v2818_v43 = vpack.c.bf16 %v2814_v22, %v2814_v22  ;;  %v2820_v25 = vpack.c.bf16 %v2816_v30, %v2816_v30 }
0x113f   : > { %3051 = vmatprep.mubr.bf16.mxu1 %v2818_v43  ;;  %3091 = vmatprep.mubr.bf16.mxu0 %v2820_v25 }
0x1140   : > { %3052 = vmatmul.mubr.bf16.vlgmr.msra.gmra.mxu1 %v2817_v29  ;;  %3092 = vmatmul.mubr.bf16.vlgmr.msra.gmra.mxu0 %v2819_v26 }
0x1200   : > { %v3468_v27 = vpop.f32.mrf.mxu1  ;;  %v3490_v31 = vpop.f32.mrf.mxu0 }
0x1202   : > { %v3469_v34 = vpop.f32.mrf.mxu1  ;;  %v3491_v35 = vpop.f32.mrf.mxu0 }
0x1203   : > { %v3470_v36 = vadd.f32 %v3469_v34, %v3468_v27  ;;  %v3492_v40 = vadd.f32 %v3491_v35, %v3490_v31 }
0x1204   : > { %v3471_v38 = vpop.f32.mrf.mxu1  ;;  %v3493_v1 = vpop.f32.mrf.mxu0 }
0x1205   : > { %v3054_v39 = vadd.f32 %v3470_v36, %v3347_v32 }
0x1206   : > { %v3472_v41 = vpop.f32.mrf.mxu1  ;;  %v3494_v42 = vpop.f32.mrf.mxu0 }
0x1207   : > { %v3094_v44 = vadd.f32 %v3492_v40, %v3054_v39 }
0x1209   : > { %v3099_v45 = vadd.f32 %v3094_v44, %v4657_v37  ;;  %v3381_v37 = vld [vmem:[%s4797_s21] ss:$0 sm:$0xff] }
0x120b   : > { %3102 = vadd.xlane.f32.xlu0 %v3099_v45 }
0x1294   : > { %v3103_v46 = vpop.xlane.xlu0 %3102 }
0x1295   : > { %v3104_v47 = vmul.f32 0.0078125, %v3103_v46 }
0x1297   : > { %v3105_v49 = vsub.f32 %v3099_v45, %v3104_v47 }
0x1299   : > { %v3106_v51 = vmul.f32 %v3105_v49, %v3105_v49 }
0x129b   : > { %3107 = vadd.xlane.f32.xlu1 %v3106_v51 }
0x1324   : > { %v3108_v17 = vpop.xlane.xlu1 %3107 }
0x1325   : > { %v3109_v52 = vmul.f32 0.0078125, %v3108_v17 }
0x1327   : > { %v3110_v0 = vadd.f32 1e-05, %v3109_v52 }
0x1329   : > { %3905 = vrsqrt.f32 %v3110_v0 }
0x1336   : > { %v3906_v53 = vpop.eup %3905 }
0x1337   : > { %v3112_v33 = vmul.f32 %v3906_v53, %v3105_v49 }
0x1339   : > { %v3119_v54 = vmul.f32 %v3380_v21, %v3112_v33 }
0x133b   : > { %v3126_v55 = vadd.f32 %v3381_v37, %v3119_v54 }
0x133d   : > { %v3127_v56 = vpack.c.bf16 %v3126_v55, %v3126_v55 }
0x133f   : > { %3128 = vst [vmem:[%s725_s30] sm:$0xf] %v3127_v56 }
0x1340 PF: > { %s34_s3 = sadd.s32 1, %s3973_s3  }
0x1341   : > { %p31_p3 = scmp.ge.s32.totalorder %s34_s3, 4  }
0x1343   :  { %33 = sbr.rel (!%p31_p3) target bundleno = 10 (0xa), region = 150 }
0x1348   :  { %3148 = vsyncpa [#allocation3], 1 }
0x1349   :  { %3150 = vsyncpa [#allocation3 + $0x1], 1 }
0x134a   :  { %3151 = vsyncpa [#allocation5], 1 }

</bundles_post_ra>
